<compile_context>
chip_gen: v7x
topology: tpu7x:2x2x1
jax: 0.10.0
libtpu: 0.0.40
codegen_flags: <defaults>
</compile_context>

<pallas_src>
import functools

import numpy as np
import jax
import jax.numpy as jnp
from jax import lax
from jax.experimental import pallas as pl
from jax.experimental.pallas import tpu as pltpu


# ----------------------------- small helpers --------------------------------
def _round_up(x, m):
    return (x + m - 1) // m * m


def _ln(x, eps=1e-5):
    # LayerNorm without affine (elementwise_affine=False), biased variance.
    m = jnp.mean(x, axis=-1, keepdims=True)
    c = x - m
    v = jnp.mean(c * c, axis=-1, keepdims=True)
    return c * lax.rsqrt(v + eps)


def _silu_kernel(x):
    # In-kernel SiLU: sigmoid via EUP exp + approximate reciprocal (free slot).
    return x * pl.reciprocal(1.0 + jnp.exp(-x), approx=True)


def _silu_ref(x):
    return x * jax.nn.sigmoid(x)


def _gelu(x):
    # tanh approximation; PyTorch default GELU is exact erf (|diff| < 1e-3).
    c = 0.7978845608028654  # sqrt(2/pi)
    return 0.5 * x * (1.0 + jnp.tanh(c * (x + 0.044715 * x * x * x)))


def _bf16(x):
    return x.astype(jnp.bfloat16)


def _gather_nodes(nodes, idx):
    # nodes (B,N,C), idx (B,N,K) -> (B,N,K,C); within-batch gather along N.
    B, N, K = idx.shape
    C = nodes.shape[-1]
    flat = jnp.take_along_axis(nodes, idx.reshape(B, N * K, 1), axis=1)
    return flat.reshape(B, N, K, C)


# ------------------------------ Pallas kernels -------------------------------
def _node_update_kernel(scal_ref, hv_ref, he_ref, nbr_ref, ma_ref, mv_ref,
                        w1s_ref, w1en_ref, b1_ref,
                        w2_ref, b2_ref, w3_ref, b3_ref,
                        wi_ref, bi_ref, wo_ref, bo_ref,
                        out_ref):
    rw = scal_ref[0]          # resweight
    rw_scl = scal_ref[1]      # resweight / scale

    hv = hv_ref[...]                                   # (TM, H) f32
    TM, H = hv.shape
    Kp = he_ref.shape[1]

    # ---- message MLP over the (self | edge | neighbor) concat (fused) ------
    ln_self = _ln(hv)                                  # LN0(h_V)
    x_self = jnp.dot(_bf16(ln_self), w1s_ref[...],
                     preferred_element_type=jnp.float32)            # (TM, H)

    he2 = he_ref[...].reshape(TM * Kp, H)              # bf16 raw h_E
    nbr_ln = _ln(nbr_ref[...].astype(jnp.float32).reshape(TM * Kp, H))
    # 256-deep contraction: [h_E | LN0(h_V_nbr)] @ [W1_edge; W1_nbr]
    en = jnp.concatenate([he2, _bf16(nbr_ln)], axis=-1)             # (TM*Kp, 2H)
    x = (jnp.dot(en, w1en_ref[...], preferred_element_type=jnp.float32)
         + b1_ref[...])                                              # (TM*Kp, H)
    h = _silu_kernel(x.reshape(TM, Kp, H) + x_self[:, None, :])
    h = _silu_kernel(jnp.dot(_bf16(h.reshape(TM * Kp, H)), w2_ref[...],
                             preferred_element_type=jnp.float32) + b2_ref[...])

    # ---- mask + K-sum BEFORE W3 (linear, so algebraically identical) --------
    ma = ma_ref[...]                                   # (TM, Kp) f32
    s = jnp.sum(h.reshape(TM, Kp, H) * ma[:, :, None], axis=1)      # (TM, H)
    cnt = jnp.sum(ma, axis=1, keepdims=True)                        # (TM, 1)
    msg_sum = (jnp.dot(_bf16(s), w3_ref[...],
                       preferred_element_type=jnp.float32)
               + cnt * b3_ref[...])                                  # (TM, H)
    hv1 = hv + msg_sum * rw_scl                        # residual 1

    # ---- position-wise feed-forward (LN2 + GELU) ----------------------------
    f = _gelu(jnp.dot(_bf16(_ln(hv1)), wi_ref[...],
                      preferred_element_type=jnp.float32) + bi_ref[...])
    dh = (jnp.dot(_bf16(f), wo_ref[...],
                  preferred_element_type=jnp.float32) + bo_ref[...]) * rw
    out_ref[...] = (hv1 + dh) * mv_ref[...]            # residual 2 + mask_V


def _edge_update_kernel(hv_ref, he_ref, nbr_ref,
                        w11s_ref, w11en_ref, b11_ref,
                        w12_ref, b12_ref, w13_ref, b13_ref,
                        out_ref):
    hv = hv_ref[...]                                   # (TM, H) f32 updated h_V
    TM, H = hv.shape
    Kp = he_ref.shape[1]
    he_f32 = he_ref[...].astype(jnp.float32)           # (TM, Kp, H) residual
    ln_e = _ln(he_f32.reshape(TM * Kp, H))             # LN4(h_E)
    nbr = nbr_ref[...].reshape(TM * Kp, H)             # bf16 gathered updated h_V

    x_self = jnp.dot(_bf16(hv), w11s_ref[...], preferred_element_type=jnp.float32)
    en = jnp.concatenate([_bf16(ln_e), nbr], axis=-1)  # (TM*Kp, 2H) bf16
    x = (jnp.dot(en, w11en_ref[...], preferred_element_type=jnp.float32)
         + b11_ref[...])
    h = _silu_kernel(x.reshape(TM, Kp, H) + x_self[:, None, :])
    h = _silu_kernel(jnp.dot(_bf16(h.reshape(TM * Kp, H)), w12_ref[...],
                             preferred_element_type=jnp.float32) + b12_ref[...])
    msg = (jnp.dot(_bf16(h), w13_ref[...],
                   preferred_element_type=jnp.float32) + b13_ref[...])
    out_ref[...] = he_f32 + msg.reshape(TM, Kp, H)     # edge residual


# ----------------------------- pallas_call wrappers --------------------------
_VMEM_LIMIT = 48 * 1024 * 1024   # headroom inside v7x's 64 MiB per-TC VMEM


def _node_update_call(scal, hv, he, nbr, ma, mv, w, tm):
    Rp, H = hv.shape
    Kp = he.shape[1]
    row2 = lambda i: (i, 0)
    row3 = lambda i: (i, 0, 0)
    full = lambda i: (0, 0)
    flops = 20 * Rp * H * H + 6 * Rp * Kp * H * H
    trans = 2 * Rp * Kp * H + 4 * Rp * H
    bytes_acc = (4 * (2 * Rp * H + Rp * Kp + Rp) + 2 * (2 * Rp * Kp * H))
    return pl.pallas_call(
        _node_update_kernel,
        out_shape=jax.ShapeDtypeStruct((Rp, H), jnp.float32),
        grid=(Rp // tm,),
        in_specs=[
            pl.BlockSpec(memory_space=pltpu.MemorySpace.SMEM),    # [rw, rw/scale]
            pl.BlockSpec((tm, H), row2),                          # h_V (f32)
            pl.BlockSpec((tm, Kp, H), row3),                      # h_E (bf16)
            pl.BlockSpec((tm, Kp, H), row3),                      # gathered h_V (bf16)
            pl.BlockSpec((tm, Kp), row2),                         # mask_attend (f32)
            pl.BlockSpec((tm, 1), row2),                          # mask_V (f32)
            pl.BlockSpec((H, H), full),                           # W1 self block
            pl.BlockSpec((2 * H, H), full),                       # W1 [edge;nbr] stacked
            pl.BlockSpec((1, H), full),                           # b1
            pl.BlockSpec((H, H), full), pl.BlockSpec((1, H), full),         # W2, b2
            pl.BlockSpec((H, H), full), pl.BlockSpec((1, H), full),         # W3, b3
            pl.BlockSpec((H, 4 * H), full), pl.BlockSpec((1, 4 * H), full),  # W_in, b_in
            pl.BlockSpec((4 * H, H), full), pl.BlockSpec((1, H), full),      # W_out, b_out
        ],
        out_specs=pl.BlockSpec((tm, H), row2),
        compiler_params=pltpu.CompilerParams(
            dimension_semantics=("parallel",),
            vmem_limit_bytes=_VMEM_LIMIT),
        cost_estimate=pl.CostEstimate(flops=flops, transcendentals=trans,
                                      bytes_accessed=bytes_acc),
    )(scal, hv, he, nbr, ma, mv,
      w['w1s'], w['w1en'], w['b1'],
      w['w2'], w['b2'], w['w3'], w['b3'],
      w['wi'], w['bi'], w['wo'], w['bo'])


def _edge_update_call(hv, he, nbr, w, tm):
    Rp, Kp, H = he.shape
    row2 = lambda i: (i, 0)
    row3 = lambda i: (i, 0, 0)
    full = lambda i: (0, 0)
    flops = 2 * Rp * H * H + 8 * Rp * Kp * H * H
    trans = 2 * Rp * Kp * H
    bytes_acc = 4 * Rp * H + 2 * (2 * Rp * Kp * H) + 4 * Rp * Kp * H
    return pl.pallas_call(
        _edge_update_kernel,
        out_shape=jax.ShapeDtypeStruct((Rp, Kp, H), jnp.float32),
        grid=(Rp // tm,),
        in_specs=[
            pl.BlockSpec((tm, H), row2),                          # updated h_V (f32)
            pl.BlockSpec((tm, Kp, H), row3),                      # h_E (bf16, residual)
            pl.BlockSpec((tm, Kp, H), row3),                      # gathered h_V (bf16)
            pl.BlockSpec((H, H), full),                           # W11 self block
            pl.BlockSpec((2 * H, H), full),                       # W11 [edge;nbr]
            pl.BlockSpec((1, H), full),                           # b11
            pl.BlockSpec((H, H), full), pl.BlockSpec((1, H), full),   # W12, b12
            pl.BlockSpec((H, H), full), pl.BlockSpec((1, H), full),   # W13, b13
        ],
        out_specs=pl.BlockSpec((tm, Kp, H), row3),
        compiler_params=pltpu.CompilerParams(
            dimension_semantics=("parallel",),
            vmem_limit_bytes=_VMEM_LIMIT),
        cost_estimate=pl.CostEstimate(flops=flops, transcendentals=trans,
                                      bytes_accessed=bytes_acc),
    )(hv, he, nbr,
      w['w11s'], w['w11en'], w['b11'],
      w['w12'], w['b12'], w['w13'], w['b13'])


# --------------------------- weight preparation -------------------------------
def prepare_enc_weights(params, H=128, scale=30.0):
    """One-time (outside jit) weight prep: bf16 casts, W1/W11 block split."""
    bfw = lambda x: jnp.asarray(x, jnp.bfloat16)
    f32 = lambda x: jnp.asarray(x, jnp.float32)
    W1 = jnp.asarray(params['W1'])
    W11 = jnp.asarray(params['W11'])
    rw = jnp.asarray(params['resweight'], jnp.float32)
    return {
        'node': dict(
            w1s=bfw(W1[0:H]),            # self block
            w1en=bfw(W1[H:3 * H]),       # [edge; neighbor] stacked -> 256-deep
            b1=f32(params['b1']).reshape(1, H),
            w2=bfw(params['W2']), b2=f32(params['b2']).reshape(1, H),
            w3=bfw(params['W3']), b3=f32(params['b3']).reshape(1, H),
            wi=bfw(params['W_in']), bi=f32(params['b_in']).reshape(1, 4 * H),
            wo=bfw(params['W_out']), bo=f32(params['b_out']).reshape(1, H)),
        'edge': dict(
            w11s=bfw(W11[0:H]), w11en=bfw(W11[H:3 * H]),
            b11=f32(params['b11']).reshape(1, H),
            w12=bfw(params['W12']), b12=f32(params['b12']).reshape(1, H),
            w13=bfw(params['W13']), b13=f32(params['b13']).reshape(1, H)),
        'scal': jnp.stack([rw, rw / jnp.float32(scale)]).astype(jnp.float32),
    }


# ------------------------------ EncLayer forward ------------------------------
def enc_layer_forward(prep, h_V, h_E, E_idx, mask_V=None, mask_attend=None,
                      tm=256):
    B, N, K, H = h_E.shape
    R = B * N
    Kp = _round_up(K, 16)                      # bf16 sublane-tile aligned K
    tm = min(tm, _round_up(R, 8))
    if R > 8:                                  # >=2 grid steps for megacore/v7x
        tm = min(tm, _round_up((R + 1) // 2, 8))
    Rp = _round_up(R, tm)

    if mask_V is None:
        mask_V = jnp.ones((B, N), jnp.float32)
    if mask_attend is None:
        mask_attend = jnp.ones((B, N, K), jnp.float32)

    def pad_rows(x):
        if Rp == R:
            return x
        return jnp.pad(x, ((0, Rp - R),) + ((0, 0),) * (x.ndim - 1))

    def pad_k(x):                              # (B,N,K,C) -> (B,N,Kp,C)
        if Kp == K:
            return x
        return jnp.pad(x, ((0, 0), (0, 0), (0, Kp - K), (0, 0)))

    # Node stream stays f32 (residual precision); edge-domain streams are bf16.
    hv = pad_rows(h_V.reshape(R, H).astype(jnp.float32))
    he = pad_rows(pad_k(h_E.astype(jnp.bfloat16)).reshape(R, Kp, H))
    nbr1 = pad_rows(
        pad_k(_gather_nodes(h_V.astype(jnp.bfloat16), E_idx)).reshape(R, Kp, H))

    ma = mask_attend.astype(jnp.float32)
    if Kp != K:
        ma = jnp.pad(ma, ((0, 0), (0, 0), (0, Kp - K)))
    ma = pad_rows(ma.reshape(R, Kp))                      # (Rp, Kp) lane-dense
    mv = pad_rows(mask_V.astype(jnp.float32).reshape(R, 1))

    # ---- kernel 1: message passing + node FFN (fused) ----
    hv_new_p = _node_update_call(prep['scal'], hv, he, nbr1, ma, mv,
                                 prep['node'], tm)
    h_V_new = hv_new_p[:R].reshape(B, N, H)

    # ---- kernel 2: edge update ----
    nbr2 = pad_rows(
        pad_k(_gather_nodes(h_V_new.astype(jnp.bfloat16), E_idx)).reshape(R, Kp, H))
    he_new_p = _edge_update_call(hv_new_p, he, nbr2, prep['edge'], tm)
    h_E_new = he_new_p[:R, :K].reshape(B, N, K, H)
    return h_V_new, h_E_new


# --------------------------- parameters & reference ---------------------------
def init_params(key, H=128):
    num_in = 2 * H               # DDAffinity: EncLayer(hidden, hidden*2)
    d_ev = H + num_in            # 384
    d_ff = 4 * H
    ks = jax.random.split(key, 16)

    def lin(k, fan_in, shape):
        bound = 1.0 / np.sqrt(fan_in)
        return jax.random.uniform(k, shape, jnp.float32, -bound, bound)

    p = {
        'W1': lin(ks[0], d_ev, (d_ev, H)), 'b1': lin(ks[1], d_ev, (H,)),
        'W2': lin(ks[2], H, (H, H)),       'b2': lin(ks[3], H, (H,)),
        'W3': lin(ks[4], H, (H, H)),       'b3': lin(ks[5], H, (H,)),
        'W11': lin(ks[6], d_ev, (d_ev, H)), 'b11': lin(ks[7], d_ev, (H,)),
        'W12': lin(ks[8], H, (H, H)),      'b12': lin(ks[9], H, (H,)),
        'W13': lin(ks[10], H, (H, H)),     'b13': lin(ks[11], H, (H,)),
        'W_in': lin(ks[12], H, (H, d_ff)), 'b_in': lin(ks[13], H, (d_ff,)),
        'W_out': lin(ks[14], d_ff, (d_ff, H)), 'b_out': lin(ks[15], d_ff, (H,)),
        # PyTorch initializes resweight to 0; use a nonzero "trained" value so
        # both residual branches are actually exercised (semantics unchanged).
        'resweight': jnp.float32(0.5),
    }
    return p


def enc_layer_reference(params, h_V, h_E, E_idx, mask_V, mask_attend, scale=30.0):
    # Pure-JAX f32 reference of the PyTorch EncLayer forward (eval mode).
    rw = params['resweight']
    hv_ln = _ln(h_V)
    nbr = _gather_nodes(hv_ln, E_idx)
    hev = jnp.concatenate(
        [jnp.broadcast_to(hv_ln[:, :, None, :], nbr.shape), h_E, nbr], axis=-1)
    h = _silu_ref(hev @ params['W1'] + params['b1'])
    h = _silu_ref(h @ params['W2'] + params['b2'])
    m = (h @ params['W3'] + params['b3']) * mask_attend[..., None].astype(jnp.float32)
    hv1 = h_V + jnp.sum(m, axis=-2) / scale * rw
    f = _gelu(_ln(hv1) @ params['W_in'] + params['b_in'])
    hv2 = (hv1 + (f @ params['W_out'] + params['b_out']) * rw)
    hv2 = hv2 * mask_V[..., None].astype(jnp.float32)
    he_ln = _ln(h_E)
    nbr2 = _gather_nodes(hv2, E_idx)
    hev2 = jnp.concatenate(
        [jnp.broadcast_to(hv2[:, :, None, :], nbr2.shape), he_ln, nbr2], axis=-1)
    h = _silu_ref(hev2 @ params['W11'] + params['b11'])
    h = _silu_ref(h @ params['W12'] + params['b12'])
    he2 = h_E + (h @ params['W13'] + params['b13'])
    return hv2, he2


# ------------------------------------ main ------------------------------------
if __name__ == "__main__":
    key = jax.random.PRNGKey(0)
    kp, kv, ke, ki, km = jax.random.split(key, 5)

    B, N, K, H = 2, 16, 15, 128        # DDAffinity: num_hidden=128, K = 8+4+3
    params = init_params(kp, H)
    prep = prepare_enc_weights(params, H=H, scale=30.0)   # one-time, outside jit

    h_V = jax.random.normal(kv, (B, N, H), jnp.float32)
    h_E = jax.random.normal(ke, (B, N, K, H), jnp.float32)
    E_idx = jax.random.randint(ki, (B, N, K), 0, N, dtype=jnp.int32)
    mask_V = jnp.ones((B, N), jnp.float32).at[:, -1].set(0.0)
    mask_attend = (jax.random.uniform(km, (B, N, K)) > 0.2).astype(jnp.float32)
    mask_attend = mask_attend * mask_V[:, :, None]

    fwd = jax.jit(functools.partial(enc_layer_forward, tm=256))
    hV_out, hE_out = fwd(prep, h_V, h_E, E_idx, mask_V, mask_attend)
    jax.block_until_ready((hV_out, hE_out))

    assert hV_out.shape == (B, N, H)
    assert hE_out.shape == (B, N, K, H)

    hV_ref, hE_ref = jax.jit(enc_layer_reference)(
        params, h_V, h_E, E_idx, mask_V, mask_attend)
    err_v = float(jnp.max(jnp.abs(hV_out - hV_ref)))
    err_e = float(jnp.max(jnp.abs(hE_out - hE_ref)))
    # bf16 inputs + bf16 MXU operands vs the f32 reference -> loose tolerance.
    assert err_v < 0.1 and err_e < 0.1, (err_v, err_e)

    print("KERNEL_OK")
</pallas_src>

<mosaic_0001>
module attributes {stable_mosaic.version = 11 : i64} {
  func.func @_node_update_kernel(%arg0: i32, %arg1: memref<2xf32, #tpu.memory_space<smem>>, %arg2: memref<16x128xf32, #tpu.memory_space<vmem>>, %arg3: memref<16x16x128xbf16, #tpu.memory_space<vmem>>, %arg4: memref<16x16x128xbf16, #tpu.memory_space<vmem>>, %arg5: memref<16x16xf32, #tpu.memory_space<vmem>>, %arg6: memref<16x1xf32, #tpu.memory_space<vmem>>, %arg7: memref<128x128xbf16, #tpu.memory_space<vmem>>, %arg8: memref<256x128xbf16, #tpu.memory_space<vmem>>, %arg9: memref<1x128xf32, #tpu.memory_space<vmem>>, %arg10: memref<128x128xbf16, #tpu.memory_space<vmem>>, %arg11: memref<1x128xf32, #tpu.memory_space<vmem>>, %arg12: memref<128x128xbf16, #tpu.memory_space<vmem>>, %arg13: memref<1x128xf32, #tpu.memory_space<vmem>>, %arg14: memref<128x512xbf16, #tpu.memory_space<vmem>>, %arg15: memref<1x512xf32, #tpu.memory_space<vmem>>, %arg16: memref<512x128xbf16, #tpu.memory_space<vmem>>, %arg17: memref<1x128xf32, #tpu.memory_space<vmem>>, %arg18: memref<16x128xf32, #tpu.memory_space<vmem>>) attributes {dimension_semantics = [#tpu.dimension_semantics<parallel>], iteration_bounds = array<i64: 2>, scalar_prefetch = 0 : i64, scratch_operands = 0 : i64, tpu.core_type = #tpu.core_type<tc>, window_params = [{transform_indices = @transform_0, window_bounds = array<i64: 2>}, {transform_indices = @transform_1, window_bounds = array<i64: 16, 128>}, {transform_indices = @transform_2, window_bounds = array<i64: 16, 16, 128>}, {transform_indices = @transform_3, window_bounds = array<i64: 16, 16, 128>}, {transform_indices = @transform_4, window_bounds = array<i64: 16, 16>}, {transform_indices = @transform_5, window_bounds = array<i64: 16, 1>}, {pipeline_mode = #tpu.pipeline_mode<synchronous>, transform_indices = @transform_6, window_bounds = array<i64: 128, 128>}, {pipeline_mode = #tpu.pipeline_mode<synchronous>, transform_indices = @transform_7, window_bounds = array<i64: 256, 128>}, {pipeline_mode = #tpu.pipeline_mode<synchronous>, transform_indices = @transform_8, window_bounds = array<i64: 1, 128>}, {pipeline_mode = #tpu.pipeline_mode<synchronous>, transform_indices = @transform_9, window_bounds = array<i64: 128, 128>}, {pipeline_mode = #tpu.pipeline_mode<synchronous>, transform_indices = @transform_10, window_bounds = array<i64: 1, 128>}, {pipeline_mode = #tpu.pipeline_mode<synchronous>, transform_indices = @transform_11, window_bounds = array<i64: 128, 128>}, {pipeline_mode = #tpu.pipeline_mode<synchronous>, transform_indices = @transform_12, window_bounds = array<i64: 1, 128>}, {pipeline_mode = #tpu.pipeline_mode<synchronous>, transform_indices = @transform_13, window_bounds = array<i64: 128, 512>}, {pipeline_mode = #tpu.pipeline_mode<synchronous>, transform_indices = @transform_14, window_bounds = array<i64: 1, 512>}, {pipeline_mode = #tpu.pipeline_mode<synchronous>, transform_indices = @transform_15, window_bounds = array<i64: 512, 128>}, {pipeline_mode = #tpu.pipeline_mode<synchronous>, transform_indices = @transform_16, window_bounds = array<i64: 1, 128>}, {transform_indices = @transform_17, window_bounds = array<i64: 16, 128>}]} {
    %c0 = arith.constant 0 : index
    %0 = memref.load %arg1[%c0] : memref<2xf32, #tpu.memory_space<smem>>
    %c1 = arith.constant 1 : index
    %1 = memref.load %arg1[%c1] : memref<2xf32, #tpu.memory_space<smem>>
    %c0_0 = arith.constant 0 : index
    %c0_1 = arith.constant 0 : index
    %2 = vector.load %arg2[%c0_0, %c0_1] : memref<16x128xf32, #tpu.memory_space<vmem>>, vector<16x128xf32>
    %cst = arith.constant dense<0.000000e+00> : vector<16xf32>
    %3 = vector.multi_reduction <add>, %2, %cst [1] : vector<16x128xf32> to vector<16xf32>
    %4 = vector.shape_cast %3 : vector<16xf32> to vector<16x1xf32>
    %cst_2 = arith.constant 1.280000e+02 : f32
    %5 = vector.broadcast %cst_2 : f32 to vector<16x1xf32>
    %6 = arith.divf %4, %5 : vector<16x1xf32>
    %7 = vector.broadcast %6 : vector<16x1xf32> to vector<16x128xf32>
    %8 = arith.subf %2, %7 : vector<16x128xf32>
    %9 = arith.mulf %8, %8 : vector<16x128xf32>
    %cst_3 = arith.constant dense<0.000000e+00> : vector<16xf32>
    %10 = vector.multi_reduction <add>, %9, %cst_3 [1] : vector<16x128xf32> to vector<16xf32>
    %11 = vector.shape_cast %10 : vector<16xf32> to vector<16x1xf32>
    %cst_4 = arith.constant 1.280000e+02 : f32
    %12 = vector.broadcast %cst_4 : f32 to vector<16x1xf32>
    %13 = arith.divf %11, %12 : vector<16x1xf32>
    %cst_5 = arith.constant 9.99999974E-6 : f32
    %14 = vector.broadcast %cst_5 : f32 to vector<16x1xf32>
    %15 = arith.addf %13, %14 : vector<16x1xf32>
    %16 = math.rsqrt %15 : vector<16x1xf32>
    %17 = vector.broadcast %16 : vector<16x1xf32> to vector<16x128xf32>
    %18 = arith.mulf %8, %17 : vector<16x128xf32>
    %19 = arith.truncf %18 : vector<16x128xf32> to vector<16x128xbf16>
    %c0_6 = arith.constant 0 : index
    %c0_7 = arith.constant 0 : index
    %20 = vector.load %arg7[%c0_6, %c0_7] : memref<128x128xbf16, #tpu.memory_space<vmem>>, vector<128x128xbf16>
    %cst_8 = arith.constant dense<0.000000e+00> : vector<16x128xf32>
    %21 = tpu.matmul %19, %20, %cst_8 {dimension_numbers = #tpu.dot_dimension_numbers<[1], [0], [0], [1], [0, 0, 1, 1], [], []>} : vector<16x128xbf16>, vector<128x128xbf16>, vector<16x128xf32> -> vector<16x128xf32>
    %c0_9 = arith.constant 0 : index
    %c0_10 = arith.constant 0 : index
    %c0_11 = arith.constant 0 : index
    %22 = vector.load %arg3[%c0_9, %c0_10, %c0_11] : memref<16x16x128xbf16, #tpu.memory_space<vmem>>, vector<16x16x128xbf16>
    %23 = vector.shape_cast %22 : vector<16x16x128xbf16> to vector<256x128xbf16>
    %c0_12 = arith.constant 0 : index
    %c0_13 = arith.constant 0 : index
    %c0_14 = arith.constant 0 : index
    %24 = vector.load %arg4[%c0_12, %c0_13, %c0_14] : memref<16x16x128xbf16, #tpu.memory_space<vmem>>, vector<16x16x128xbf16>
    %25 = arith.extf %24 : vector<16x16x128xbf16> to vector<16x16x128xf32>
    %26 = vector.shape_cast %25 : vector<16x16x128xf32> to vector<256x128xf32>
    %cst_15 = arith.constant dense<0.000000e+00> : vector<256xf32>
    %27 = vector.multi_reduction <add>, %26, %cst_15 [1] : vector<256x128xf32> to vector<256xf32>
    %28 = vector.shape_cast %27 : vector<256xf32> to vector<256x1xf32>
    %cst_16 = arith.constant 1.280000e+02 : f32
    %29 = vector.broadcast %cst_16 : f32 to vector<256x1xf32>
    %30 = arith.divf %28, %29 : vector<256x1xf32>
    %31 = vector.broadcast %30 : vector<256x1xf32> to vector<256x128xf32>
    %32 = arith.subf %26, %31 : vector<256x128xf32>
    %33 = arith.mulf %32, %32 : vector<256x128xf32>
    %cst_17 = arith.constant dense<0.000000e+00> : vector<256xf32>
    %34 = vector.multi_reduction <add>, %33, %cst_17 [1] : vector<256x128xf32> to vector<256xf32>
    %35 = vector.shape_cast %34 : vector<256xf32> to vector<256x1xf32>
    %cst_18 = arith.constant 1.280000e+02 : f32
    %36 = vector.broadcast %cst_18 : f32 to vector<256x1xf32>
    %37 = arith.divf %35, %36 : vector<256x1xf32>
    %cst_19 = arith.constant 9.99999974E-6 : f32
    %38 = vector.broadcast %cst_19 : f32 to vector<256x1xf32>
    %39 = arith.addf %37, %38 : vector<256x1xf32>
    %40 = math.rsqrt %39 : vector<256x1xf32>
    %41 = vector.broadcast %40 : vector<256x1xf32> to vector<256x128xf32>
    %42 = arith.mulf %32, %41 : vector<256x128xf32>
    %43 = arith.truncf %42 : vector<256x128xf32> to vector<256x128xbf16>
    %44 = tpu.concatenate %23, %43 in 1 : vector<256x128xbf16>, vector<256x128xbf16> -> vector<256x256xbf16>
    %c0_20 = arith.constant 0 : index
    %c0_21 = arith.constant 0 : index
    %45 = vector.load %arg8[%c0_20, %c0_21] : memref<256x128xbf16, #tpu.memory_space<vmem>>, vector<256x128xbf16>
    %cst_22 = arith.constant dense<0.000000e+00> : vector<256x128xf32>
    %46 = tpu.matmul %44, %45, %cst_22 {dimension_numbers = #tpu.dot_dimension_numbers<[1], [0], [0], [1], [0, 0, 1, 1], [], []>} : vector<256x256xbf16>, vector<256x128xbf16>, vector<256x128xf32> -> vector<256x128xf32>
    %c0_23 = arith.constant 0 : index
    %c0_24 = arith.constant 0 : index
    %47 = vector.load %arg9[%c0_23, %c0_24] : memref<1x128xf32, #tpu.memory_space<vmem>>, vector<1x128xf32>
    %48 = vector.broadcast %47 : vector<1x128xf32> to vector<256x128xf32>
    %49 = arith.addf %46, %48 : vector<256x128xf32>
    %50 = vector.shape_cast %49 : vector<256x128xf32> to vector<16x16x128xf32>
    %51 = vector.shape_cast %21 : vector<16x128xf32> to vector<16x1x128xf32>
    %52 = vector.broadcast %51 : vector<16x1x128xf32> to vector<16x16x128xf32>
    %53 = arith.addf %50, %52 : vector<16x16x128xf32>
    %cst_25 = arith.constant 0.000000e+00 : f32
    %54 = vector.broadcast %cst_25 : f32 to vector<16x16x128xf32>
    %55 = arith.subf %54, %53 : vector<16x16x128xf32>
    %56 = math.exp %55 : vector<16x16x128xf32>
    %cst_26 = arith.constant 1.000000e+00 : f32
    %57 = vector.broadcast %cst_26 : f32 to vector<16x16x128xf32>
    %58 = arith.addf %57, %56 : vector<16x16x128xf32>
    %59 = tpu.reciprocal %58 {approx = true} : vector<16x16x128xf32> -> vector<16x16x128xf32>
    %60 = arith.mulf %53, %59 : vector<16x16x128xf32>
    %61 = vector.shape_cast %60 : vector<16x16x128xf32> to vector<256x128xf32>
    %62 = arith.truncf %61 : vector<256x128xf32> to vector<256x128xbf16>
    %c0_27 = arith.constant 0 : index
    %c0_28 = arith.constant 0 : index
    %63 = vector.load %arg10[%c0_27, %c0_28] : memref<128x128xbf16, #tpu.memory_space<vmem>>, vector<128x128xbf16>
    %cst_29 = arith.constant dense<0.000000e+00> : vector<256x128xf32>
    %64 = tpu.matmul %62, %63, %cst_29 {dimension_numbers = #tpu.dot_dimension_numbers<[1], [0], [0], [1], [0, 0, 1, 1], [], []>} : vector<256x128xbf16>, vector<128x128xbf16>, vector<256x128xf32> -> vector<256x128xf32>
    %c0_30 = arith.constant 0 : index
    %c0_31 = arith.constant 0 : index
    %65 = vector.load %arg11[%c0_30, %c0_31] : memref<1x128xf32, #tpu.memory_space<vmem>>, vector<1x128xf32>
    %66 = vector.broadcast %65 : vector<1x128xf32> to vector<256x128xf32>
    %67 = arith.addf %64, %66 : vector<256x128xf32>
    %cst_32 = arith.constant 0.000000e+00 : f32
    %68 = vector.broadcast %cst_32 : f32 to vector<256x128xf32>
    %69 = arith.subf %68, %67 : vector<256x128xf32>
    %70 = math.exp %69 : vector<256x128xf32>
    %cst_33 = arith.constant 1.000000e+00 : f32
    %71 = vector.broadcast %cst_33 : f32 to vector<256x128xf32>
    %72 = arith.addf %71, %70 : vector<256x128xf32>
    %73 = tpu.reciprocal %72 {approx = true} : vector<256x128xf32> -> vector<256x128xf32>
    %74 = arith.mulf %67, %73 : vector<256x128xf32>
    %c0_34 = arith.constant 0 : index
    %c0_35 = arith.constant 0 : index
    %75 = vector.load %arg5[%c0_34, %c0_35] : memref<16x16xf32, #tpu.memory_space<vmem>>, vector<16x16xf32>
    %76 = vector.shape_cast %74 : vector<256x128xf32> to vector<16x16x128xf32>
    %77 = vector.shape_cast %75 : vector<16x16xf32> to vector<16x16x1xf32>
    %78 = vector.broadcast %77 : vector<16x16x1xf32> to vector<16x16x128xf32>
    %79 = arith.mulf %76, %78 : vector<16x16x128xf32>
    %cst_36 = arith.constant dense<0.000000e+00> : vector<16x128xf32>
    %80 = vector.multi_reduction <add>, %79, %cst_36 [1] : vector<16x16x128xf32> to vector<16x128xf32>
    %cst_37 = arith.constant dense<0.000000e+00> : vector<16xf32>
    %81 = vector.multi_reduction <add>, %75, %cst_37 [1] : vector<16x16xf32> to vector<16xf32>
    %82 = vector.shape_cast %81 : vector<16xf32> to vector<16x1xf32>
    %83 = arith.truncf %80 : vector<16x128xf32> to vector<16x128xbf16>
    %c0_38 = arith.constant 0 : index
    %c0_39 = arith.constant 0 : index
    %84 = vector.load %arg12[%c0_38, %c0_39] : memref<128x128xbf16, #tpu.memory_space<vmem>>, vector<128x128xbf16>
    %cst_40 = arith.constant dense<0.000000e+00> : vector<16x128xf32>
    %85 = tpu.matmul %83, %84, %cst_40 {dimension_numbers = #tpu.dot_dimension_numbers<[1], [0], [0], [1], [0, 0, 1, 1], [], []>} : vector<16x128xbf16>, vector<128x128xbf16>, vector<16x128xf32> -> vector<16x128xf32>
    %c0_41 = arith.constant 0 : index
    %c0_42 = arith.constant 0 : index
    %86 = vector.load %arg13[%c0_41, %c0_42] : memref<1x128xf32, #tpu.memory_space<vmem>>, vector<1x128xf32>
    %87 = vector.broadcast %82 : vector<16x1xf32> to vector<16x128xf32>
    %88 = vector.broadcast %86 : vector<1x128xf32> to vector<16x128xf32>
    %89 = arith.mulf %87, %88 : vector<16x128xf32>
    %90 = arith.addf %85, %89 : vector<16x128xf32>
    %91 = vector.broadcast %1 : f32 to vector<16x128xf32>
    %92 = arith.mulf %90, %91 : vector<16x128xf32>
    %93 = arith.addf %2, %92 : vector<16x128xf32>
    %cst_43 = arith.constant dense<0.000000e+00> : vector<16xf32>
    %94 = vector.multi_reduction <add>, %93, %cst_43 [1] : vector<16x128xf32> to vector<16xf32>
    %95 = vector.shape_cast %94 : vector<16xf32> to vector<16x1xf32>
    %cst_44 = arith.constant 1.280000e+02 : f32
    %96 = vector.broadcast %cst_44 : f32 to vector<16x1xf32>
    %97 = arith.divf %95, %96 : vector<16x1xf32>
    %98 = vector.broadcast %97 : vector<16x1xf32> to vector<16x128xf32>
    %99 = arith.subf %93, %98 : vector<16x128xf32>
    %100 = arith.mulf %99, %99 : vector<16x128xf32>
    %cst_45 = arith.constant dense<0.000000e+00> : vector<16xf32>
    %101 = vector.multi_reduction <add>, %100, %cst_45 [1] : vector<16x128xf32> to vector<16xf32>
    %102 = vector.shape_cast %101 : vector<16xf32> to vector<16x1xf32>
    %cst_46 = arith.constant 1.280000e+02 : f32
    %103 = vector.broadcast %cst_46 : f32 to vector<16x1xf32>
    %104 = arith.divf %102, %103 : vector<16x1xf32>
    %cst_47 = arith.constant 9.99999974E-6 : f32
    %105 = vector.broadcast %cst_47 : f32 to vector<16x1xf32>
    %106 = arith.addf %104, %105 : vector<16x1xf32>
    %107 = math.rsqrt %106 : vector<16x1xf32>
    %108 = vector.broadcast %107 : vector<16x1xf32> to vector<16x128xf32>
    %109 = arith.mulf %99, %108 : vector<16x128xf32>
    %110 = arith.truncf %109 : vector<16x128xf32> to vector<16x128xbf16>
    %c0_48 = arith.constant 0 : index
    %c0_49 = arith.constant 0 : index
    %111 = vector.load %arg14[%c0_48, %c0_49] : memref<128x512xbf16, #tpu.memory_space<vmem>>, vector<128x512xbf16>
    %cst_50 = arith.constant dense<0.000000e+00> : vector<16x512xf32>
    %112 = tpu.matmul %110, %111, %cst_50 {dimension_numbers = #tpu.dot_dimension_numbers<[1], [0], [0], [1], [0, 0, 1, 1], [], []>} : vector<16x128xbf16>, vector<128x512xbf16>, vector<16x512xf32> -> vector<16x512xf32>
    %c0_51 = arith.constant 0 : index
    %c0_52 = arith.constant 0 : index
    %113 = vector.load %arg15[%c0_51, %c0_52] : memref<1x512xf32, #tpu.memory_space<vmem>>, vector<1x512xf32>
    %114 = vector.broadcast %113 : vector<1x512xf32> to vector<16x512xf32>
    %115 = arith.addf %112, %114 : vector<16x512xf32>
    %cst_53 = arith.constant 5.000000e-01 : f32
    %116 = vector.broadcast %cst_53 : f32 to vector<16x512xf32>
    %117 = arith.mulf %116, %115 : vector<16x512xf32>
    %cst_54 = arith.constant 4.471500e-02 : f32
    %118 = vector.broadcast %cst_54 : f32 to vector<16x512xf32>
    %119 = arith.mulf %118, %115 : vector<16x512xf32>
    %120 = arith.mulf %119, %115 : vector<16x512xf32>
    %121 = arith.mulf %120, %115 : vector<16x512xf32>
    %122 = arith.addf %115, %121 : vector<16x512xf32>
    %cst_55 = arith.constant 0.797884583 : f32
    %123 = vector.broadcast %cst_55 : f32 to vector<16x512xf32>
    %124 = arith.mulf %123, %122 : vector<16x512xf32>
    %125 = math.tanh %124 : vector<16x512xf32>
    %cst_56 = arith.constant 1.000000e+00 : f32
    %126 = vector.broadcast %cst_56 : f32 to vector<16x512xf32>
    %127 = arith.addf %126, %125 : vector<16x512xf32>
    %128 = arith.mulf %117, %127 : vector<16x512xf32>
    %129 = arith.truncf %128 : vector<16x512xf32> to vector<16x512xbf16>
    %c0_57 = arith.constant 0 : index
    %c0_58 = arith.constant 0 : index
    %130 = vector.load %arg16[%c0_57, %c0_58] : memref<512x128xbf16, #tpu.memory_space<vmem>>, vector<512x128xbf16>
    %cst_59 = arith.constant dense<0.000000e+00> : vector<16x128xf32>
    %131 = tpu.matmul %129, %130, %cst_59 {dimension_numbers = #tpu.dot_dimension_numbers<[1], [0], [0], [1], [0, 0, 1, 1], [], []>} : vector<16x512xbf16>, vector<512x128xbf16>, vector<16x128xf32> -> vector<16x128xf32>
    %c0_60 = arith.constant 0 : index
    %c0_61 = arith.constant 0 : index
    %132 = vector.load %arg17[%c0_60, %c0_61] : memref<1x128xf32, #tpu.memory_space<vmem>>, vector<1x128xf32>
    %133 = vector.broadcast %132 : vector<1x128xf32> to vector<16x128xf32>
    %134 = arith.addf %131, %133 : vector<16x128xf32>
    %135 = vector.broadcast %0 : f32 to vector<16x128xf32>
    %136 = arith.mulf %134, %135 : vector<16x128xf32>
    %137 = arith.addf %93, %136 : vector<16x128xf32>
    %c0_62 = arith.constant 0 : index
    %c0_63 = arith.constant 0 : index
    %138 = vector.load %arg6[%c0_62, %c0_63] : memref<16x1xf32, #tpu.memory_space<vmem>>, vector<16x1xf32>
    %139 = vector.broadcast %138 : vector<16x1xf32> to vector<16x128xf32>
    %140 = arith.mulf %137, %139 : vector<16x128xf32>
    %c0_64 = arith.constant 0 : index
    %c0_65 = arith.constant 0 : index
    %141 = vector.load %arg18[%c0_64, %c0_65] : memref<16x128xf32, #tpu.memory_space<vmem>>, vector<16x128xf32>
    tpu.vector_store %arg18[%c0_64, %c0_65], %140 {strides = array<i32>} : memref<16x128xf32, #tpu.memory_space<vmem>>, vector<16x128xf32>,
    return
  }
  func.func @transform_0(%arg0: i32) -> i32 {
    %c0_i32 = arith.constant 0 : i32
    %c0_i32_0 = arith.constant 0 : i32
    return %c0_i32 : i32
  }
  func.func @transform_1(%arg0: i32) -> (i32, i32) {
    %c0_i32 = arith.constant 0 : i32
    %c0_i32_0 = arith.constant 0 : i32
    return %arg0, %c0_i32 : i32, i32
  }
  func.func @transform_2(%arg0: i32) -> (i32, i32, i32) {
    %c0_i32 = arith.constant 0 : i32
    %c0_i32_0 = arith.constant 0 : i32
    %c0_i32_1 = arith.constant 0 : i32
    return %arg0, %c0_i32, %c0_i32_0 : i32, i32, i32
  }
  func.func @transform_3(%arg0: i32) -> (i32, i32, i32) {
    %c0_i32 = arith.constant 0 : i32
    %c0_i32_0 = arith.constant 0 : i32
    %c0_i32_1 = arith.constant 0 : i32
    return %arg0, %c0_i32, %c0_i32_0 : i32, i32, i32
  }
  func.func @transform_4(%arg0: i32) -> (i32, i32) {
    %c0_i32 = arith.constant 0 : i32
    %c0_i32_0 = arith.constant 0 : i32
    return %arg0, %c0_i32 : i32, i32
  }
  func.func @transform_5(%arg0: i32) -> (i32, i32) {
    %c0_i32 = arith.constant 0 : i32
    %c0_i32_0 = arith.constant 0 : i32
    return %arg0, %c0_i32 : i32, i32
  }
  func.func @transform_6(%arg0: i32) -> (i32, i32) {
    %c0_i32 = arith.constant 0 : i32
    %c0_i32_0 = arith.constant 0 : i32
    %c0_i32_1 = arith.constant 0 : i32
    return %c0_i32, %c0_i32_0 : i32, i32
  }
  func.func @transform_7(%arg0: i32) -> (i32, i32) {
    %c0_i32 = arith.constant 0 : i32
    %c0_i32_0 = arith.constant 0 : i32
    %c0_i32_1 = arith.constant 0 : i32
    return %c0_i32, %c0_i32_0 : i32, i32
  }
  func.func @transform_8(%arg0: i32) -> (i32, i32) {
    %c0_i32 = arith.constant 0 : i32
    %c0_i32_0 = arith.constant 0 : i32
    %c0_i32_1 = arith.constant 0 : i32
    return %c0_i32, %c0_i32_0 : i32, i32
  }
  func.func @transform_9(%arg0: i32) -> (i32, i32) {
    %c0_i32 = arith.constant 0 : i32
    %c0_i32_0 = arith.constant 0 : i32
    %c0_i32_1 = arith.constant 0 : i32
    return %c0_i32, %c0_i32_0 : i32, i32
  }
  func.func @transform_10(%arg0: i32) -> (i32, i32) {
    %c0_i32 = arith.constant 0 : i32
    %c0_i32_0 = arith.constant 0 : i32
    %c0_i32_1 = arith.constant 0 : i32
    return %c0_i32, %c0_i32_0 : i32, i32
  }
  func.func @transform_11(%arg0: i32) -> (i32, i32) {
    %c0_i32 = arith.constant 0 : i32
    %c0_i32_0 = arith.constant 0 : i32
    %c0_i32_1 = arith.constant 0 : i32
    return %c0_i32, %c0_i32_0 : i32, i32
  }
  func.func @transform_12(%arg0: i32) -> (i32, i32) {
    %c0_i32 = arith.constant 0 : i32
    %c0_i32_0 = arith.constant 0 : i32
    %c0_i32_1 = arith.constant 0 : i32
    return %c0_i32, %c0_i32_0 : i32, i32
  }
  func.func @transform_13(%arg0: i32) -> (i32, i32) {
    %c0_i32 = arith.constant 0 : i32
    %c0_i32_0 = arith.constant 0 : i32
    %c0_i32_1 = arith.constant 0 : i32
    return %c0_i32, %c0_i32_0 : i32, i32
  }
  func.func @transform_14(%arg0: i32) -> (i32, i32) {
    %c0_i32 = arith.constant 0 : i32
    %c0_i32_0 = arith.constant 0 : i32
    %c0_i32_1 = arith.constant 0 : i32
    return %c0_i32, %c0_i32_0 : i32, i32
  }
  func.func @transform_15(%arg0: i32) -> (i32, i32) {
    %c0_i32 = arith.constant 0 : i32
    %c0_i32_0 = arith.constant 0 : i32
    %c0_i32_1 = arith.constant 0 : i32
    return %c0_i32, %c0_i32_0 : i32, i32
  }
  func.func @transform_16(%arg0: i32) -> (i32, i32) {
    %c0_i32 = arith.constant 0 : i32
    %c0_i32_0 = arith.constant 0 : i32
    %c0_i32_1 = arith.constant 0 : i32
    return %c0_i32, %c0_i32_0 : i32, i32
  }
  func.func @transform_17(%arg0: i32) -> (i32, i32) {
    %c0_i32 = arith.constant 0 : i32
    %c0_i32_0 = arith.constant 0 : i32
    return %arg0, %c0_i32 : i32, i32
  }
}

module attributes {stable_mosaic.version = 11 : i64} {
  func.func @_edge_update_kernel(%arg0: i32, %arg1: memref<16x128xf32, #tpu.memory_space<vmem>>, %arg2: memref<16x16x128xbf16, #tpu.memory_space<vmem>>, %arg3: memref<16x16x128xbf16, #tpu.memory_space<vmem>>, %arg4: memref<128x128xbf16, #tpu.memory_space<vmem>>, %arg5: memref<256x128xbf16, #tpu.memory_space<vmem>>, %arg6: memref<1x128xf32, #tpu.memory_space<vmem>>, %arg7: memref<128x128xbf16, #tpu.memory_space<vmem>>, %arg8: memref<1x128xf32, #tpu.memory_space<vmem>>, %arg9: memref<128x128xbf16, #tpu.memory_space<vmem>>, %arg10: memref<1x128xf32, #tpu.memory_space<vmem>>, %arg11: memref<16x16x128xf32, #tpu.memory_space<vmem>>) attributes {dimension_semantics = [#tpu.dimension_semantics<parallel>], iteration_bounds = array<i64: 2>, scalar_prefetch = 0 : i64, scratch_operands = 0 : i64, tpu.core_type = #tpu.core_type<tc>, window_params = [{transform_indices = @transform_0, window_bounds = array<i64: 16, 128>}, {transform_indices = @transform_1, window_bounds = array<i64: 16, 16, 128>}, {transform_indices = @transform_2, window_bounds = array<i64: 16, 16, 128>}, {pipeline_mode = #tpu.pipeline_mode<synchronous>, transform_indices = @transform_3, window_bounds = array<i64: 128, 128>}, {pipeline_mode = #tpu.pipeline_mode<synchronous>, transform_indices = @transform_4, window_bounds = array<i64: 256, 128>}, {pipeline_mode = #tpu.pipeline_mode<synchronous>, transform_indices = @transform_5, window_bounds = array<i64: 1, 128>}, {pipeline_mode = #tpu.pipeline_mode<synchronous>, transform_indices = @transform_6, window_bounds = array<i64: 128, 128>}, {pipeline_mode = #tpu.pipeline_mode<synchronous>, transform_indices = @transform_7, window_bounds = array<i64: 1, 128>}, {pipeline_mode = #tpu.pipeline_mode<synchronous>, transform_indices = @transform_8, window_bounds = array<i64: 128, 128>}, {pipeline_mode = #tpu.pipeline_mode<synchronous>, transform_indices = @transform_9, window_bounds = array<i64: 1, 128>}, {transform_indices = @transform_10, window_bounds = array<i64: 16, 16, 128>}]} {
    %c0 = arith.constant 0 : index
    %c0_0 = arith.constant 0 : index
    %0 = vector.load %arg1[%c0, %c0_0] : memref<16x128xf32, #tpu.memory_space<vmem>>, vector<16x128xf32>
    %c0_1 = arith.constant 0 : index
    %c0_2 = arith.constant 0 : index
    %c0_3 = arith.constant 0 : index
    %1 = vector.load %arg2[%c0_1, %c0_2, %c0_3] : memref<16x16x128xbf16, #tpu.memory_space<vmem>>, vector<16x16x128xbf16>
    %2 = arith.extf %1 : vector<16x16x128xbf16> to vector<16x16x128xf32>
    %3 = vector.shape_cast %2 : vector<16x16x128xf32> to vector<256x128xf32>
    %cst = arith.constant dense<0.000000e+00> : vector<256xf32>
    %4 = vector.multi_reduction <add>, %3, %cst [1] : vector<256x128xf32> to vector<256xf32>
    %5 = vector.shape_cast %4 : vector<256xf32> to vector<256x1xf32>
    %cst_4 = arith.constant 1.280000e+02 : f32
    %6 = vector.broadcast %cst_4 : f32 to vector<256x1xf32>
    %7 = arith.divf %5, %6 : vector<256x1xf32>
    %8 = vector.broadcast %7 : vector<256x1xf32> to vector<256x128xf32>
    %9 = arith.subf %3, %8 : vector<256x128xf32>
    %10 = arith.mulf %9, %9 : vector<256x128xf32>
    %cst_5 = arith.constant dense<0.000000e+00> : vector<256xf32>
    %11 = vector.multi_reduction <add>, %10, %cst_5 [1] : vector<256x128xf32> to vector<256xf32>
    %12 = vector.shape_cast %11 : vector<256xf32> to vector<256x1xf32>
    %cst_6 = arith.constant 1.280000e+02 : f32
    %13 = vector.broadcast %cst_6 : f32 to vector<256x1xf32>
    %14 = arith.divf %12, %13 : vector<256x1xf32>
    %cst_7 = arith.constant 9.99999974E-6 : f32
    %15 = vector.broadcast %cst_7 : f32 to vector<256x1xf32>
    %16 = arith.addf %14, %15 : vector<256x1xf32>
    %17 = math.rsqrt %16 : vector<256x1xf32>
    %18 = vector.broadcast %17 : vector<256x1xf32> to vector<256x128xf32>
    %19 = arith.mulf %9, %18 : vector<256x128xf32>
    %c0_8 = arith.constant 0 : index
    %c0_9 = arith.constant 0 : index
    %c0_10 = arith.constant 0 : index
    %20 = vector.load %arg3[%c0_8, %c0_9, %c0_10] : memref<16x16x128xbf16, #tpu.memory_space<vmem>>, vector<16x16x128xbf16>
    %21 = vector.shape_cast %20 : vector<16x16x128xbf16> to vector<256x128xbf16>
    %22 = arith.truncf %0 : vector<16x128xf32> to vector<16x128xbf16>
    %c0_11 = arith.constant 0 : index
    %c0_12 = arith.constant 0 : index
    %23 = vector.load %arg4[%c0_11, %c0_12] : memref<128x128xbf16, #tpu.memory_space<vmem>>, vector<128x128xbf16>
    %cst_13 = arith.constant dense<0.000000e+00> : vector<16x128xf32>
    %24 = tpu.matmul %22, %23, %cst_13 {dimension_numbers = #tpu.dot_dimension_numbers<[1], [0], [0], [1], [0, 0, 1, 1], [], []>} : vector<16x128xbf16>, vector<128x128xbf16>, vector<16x128xf32> -> vector<16x128xf32>
    %25 = arith.truncf %19 : vector<256x128xf32> to vector<256x128xbf16>
    %26 = tpu.concatenate %25, %21 in 1 : vector<256x128xbf16>, vector<256x128xbf16> -> vector<256x256xbf16>
    %c0_14 = arith.constant 0 : index
    %c0_15 = arith.constant 0 : index
    %27 = vector.load %arg5[%c0_14, %c0_15] : memref<256x128xbf16, #tpu.memory_space<vmem>>, vector<256x128xbf16>
    %cst_16 = arith.constant dense<0.000000e+00> : vector<256x128xf32>
    %28 = tpu.matmul %26, %27, %cst_16 {dimension_numbers = #tpu.dot_dimension_numbers<[1], [0], [0], [1], [0, 0, 1, 1], [], []>} : vector<256x256xbf16>, vector<256x128xbf16>, vector<256x128xf32> -> vector<256x128xf32>
    %c0_17 = arith.constant 0 : index
    %c0_18 = arith.constant 0 : index
    %29 = vector.load %arg6[%c0_17, %c0_18] : memref<1x128xf32, #tpu.memory_space<vmem>>, vector<1x128xf32>
    %30 = vector.broadcast %29 : vector<1x128xf32> to vector<256x128xf32>
    %31 = arith.addf %28, %30 : vector<256x128xf32>
    %32 = vector.shape_cast %31 : vector<256x128xf32> to vector<16x16x128xf32>
    %33 = vector.shape_cast %24 : vector<16x128xf32> to vector<16x1x128xf32>
    %34 = vector.broadcast %33 : vector<16x1x128xf32> to vector<16x16x128xf32>
    %35 = arith.addf %32, %34 : vector<16x16x128xf32>
    %cst_19 = arith.constant 0.000000e+00 : f32
    %36 = vector.broadcast %cst_19 : f32 to vector<16x16x128xf32>
    %37 = arith.subf %36, %35 : vector<16x16x128xf32>
    %38 = math.exp %37 : vector<16x16x128xf32>
    %cst_20 = arith.constant 1.000000e+00 : f32
    %39 = vector.broadcast %cst_20 : f32 to vector<16x16x128xf32>
    %40 = arith.addf %39, %38 : vector<16x16x128xf32>
    %41 = tpu.reciprocal %40 {approx = true} : vector<16x16x128xf32> -> vector<16x16x128xf32>
    %42 = arith.mulf %35, %41 : vector<16x16x128xf32>
    %43 = vector.shape_cast %42 : vector<16x16x128xf32> to vector<256x128xf32>
    %44 = arith.truncf %43 : vector<256x128xf32> to vector<256x128xbf16>
    %c0_21 = arith.constant 0 : index
    %c0_22 = arith.constant 0 : index
    %45 = vector.load %arg7[%c0_21, %c0_22] : memref<128x128xbf16, #tpu.memory_space<vmem>>, vector<128x128xbf16>
    %cst_23 = arith.constant dense<0.000000e+00> : vector<256x128xf32>
    %46 = tpu.matmul %44, %45, %cst_23 {dimension_numbers = #tpu.dot_dimension_numbers<[1], [0], [0], [1], [0, 0, 1, 1], [], []>} : vector<256x128xbf16>, vector<128x128xbf16>, vector<256x128xf32> -> vector<256x128xf32>
    %c0_24 = arith.constant 0 : index
    %c0_25 = arith.constant 0 : index
    %47 = vector.load %arg8[%c0_24, %c0_25] : memref<1x128xf32, #tpu.memory_space<vmem>>, vector<1x128xf32>
    %48 = vector.broadcast %47 : vector<1x128xf32> to vector<256x128xf32>
    %49 = arith.addf %46, %48 : vector<256x128xf32>
    %cst_26 = arith.constant 0.000000e+00 : f32
    %50 = vector.broadcast %cst_26 : f32 to vector<256x128xf32>
    %51 = arith.subf %50, %49 : vector<256x128xf32>
    %52 = math.exp %51 : vector<256x128xf32>
    %cst_27 = arith.constant 1.000000e+00 : f32
    %53 = vector.broadcast %cst_27 : f32 to vector<256x128xf32>
    %54 = arith.addf %53, %52 : vector<256x128xf32>
    %55 = tpu.reciprocal %54 {approx = true} : vector<256x128xf32> -> vector<256x128xf32>
    %56 = arith.mulf %49, %55 : vector<256x128xf32>
    %57 = arith.truncf %56 : vector<256x128xf32> to vector<256x128xbf16>
    %c0_28 = arith.constant 0 : index
    %c0_29 = arith.constant 0 : index
    %58 = vector.load %arg9[%c0_28, %c0_29] : memref<128x128xbf16, #tpu.memory_space<vmem>>, vector<128x128xbf16>
    %cst_30 = arith.constant dense<0.000000e+00> : vector<256x128xf32>
    %59 = tpu.matmul %57, %58, %cst_30 {dimension_numbers = #tpu.dot_dimension_numbers<[1], [0], [0], [1], [0, 0, 1, 1], [], []>} : vector<256x128xbf16>, vector<128x128xbf16>, vector<256x128xf32> -> vector<256x128xf32>
    %c0_31 = arith.constant 0 : index
    %c0_32 = arith.constant 0 : index
    %60 = vector.load %arg10[%c0_31, %c0_32] : memref<1x128xf32, #tpu.memory_space<vmem>>, vector<1x128xf32>
    %61 = vector.broadcast %60 : vector<1x128xf32> to vector<256x128xf32>
    %62 = arith.addf %59, %61 : vector<256x128xf32>
    %63 = vector.shape_cast %62 : vector<256x128xf32> to vector<16x16x128xf32>
    %64 = arith.addf %2, %63 : vector<16x16x128xf32>
    %c0_33 = arith.constant 0 : index
    %c0_34 = arith.constant 0 : index
    %c0_35 = arith.constant 0 : index
    %65 = vector.load %arg11[%c0_33, %c0_34, %c0_35] : memref<16x16x128xf32, #tpu.memory_space<vmem>>, vector<16x16x128xf32>
    tpu.vector_store %arg11[%c0_33, %c0_34, %c0_35], %64 {strides = array<i32>} : memref<16x16x128xf32, #tpu.memory_space<vmem>>, vector<16x16x128xf32>,
    return
  }
  func.func @transform_0(%arg0: i32) -> (i32, i32) {
    %c0_i32 = arith.constant 0 : i32
    %c0_i32_0 = arith.constant 0 : i32
    return %arg0, %c0_i32 : i32, i32
  }
  func.func @transform_1(%arg0: i32) -> (i32, i32, i32) {
    %c0_i32 = arith.constant 0 : i32
    %c0_i32_0 = arith.constant 0 : i32
    %c0_i32_1 = arith.constant 0 : i32
    return %arg0, %c0_i32, %c0_i32_0 : i32, i32, i32
  }
  func.func @transform_2(%arg0: i32) -> (i32, i32, i32) {
    %c0_i32 = arith.constant 0 : i32
    %c0_i32_0 = arith.constant 0 : i32
    %c0_i32_1 = arith.constant 0 : i32
    return %arg0, %c0_i32, %c0_i32_0 : i32, i32, i32
  }
  func.func @transform_3(%arg0: i32) -> (i32, i32) {
    %c0_i32 = arith.constant 0 : i32
    %c0_i32_0 = arith.constant 0 : i32
    %c0_i32_1 = arith.constant 0 : i32
    return %c0_i32, %c0_i32_0 : i32, i32
  }
  func.func @transform_4(%arg0: i32) -> (i32, i32) {
    %c0_i32 = arith.constant 0 : i32
    %c0_i32_0 = arith.constant 0 : i32
    %c0_i32_1 = arith.constant 0 : i32
    return %c0_i32, %c0_i32_0 : i32, i32
  }
  func.func @transform_5(%arg0: i32) -> (i32, i32) {
    %c0_i32 = arith.constant 0 : i32
    %c0_i32_0 = arith.constant 0 : i32
    %c0_i32_1 = arith.constant 0 : i32
    return %c0_i32, %c0_i32_0 : i32, i32
  }
  func.func @transform_6(%arg0: i32) -> (i32, i32) {
    %c0_i32 = arith.constant 0 : i32
    %c0_i32_0 = arith.constant 0 : i32
    %c0_i32_1 = arith.constant 0 : i32
    return %c0_i32, %c0_i32_0 : i32, i32
  }
  func.func @transform_7(%arg0: i32) -> (i32, i32) {
    %c0_i32 = arith.constant 0 : i32
    %c0_i32_0 = arith.constant 0 : i32
    %c0_i32_1 = arith.constant 0 : i32
    return %c0_i32, %c0_i32_0 : i32, i32
  }
  func.func @transform_8(%arg0: i32) -> (i32, i32) {
    %c0_i32 = arith.constant 0 : i32
    %c0_i32_0 = arith.constant 0 : i32
    %c0_i32_1 = arith.constant 0 : i32
    return %c0_i32, %c0_i32_0 : i32, i32
  }
  func.func @transform_9(%arg0: i32) -> (i32, i32) {
    %c0_i32 = arith.constant 0 : i32
    %c0_i32_0 = arith.constant 0 : i32
    %c0_i32_1 = arith.constant 0 : i32
    return %c0_i32, %c0_i32_0 : i32, i32
  }
  func.func @transform_10(%arg0: i32) -> (i32, i32, i32) {
    %c0_i32 = arith.constant 0 : i32
    %c0_i32_0 = arith.constant 0 : i32
    %c0_i32_1 = arith.constant 0 : i32
    return %arg0, %c0_i32, %c0_i32_0 : i32, i32, i32
  }
}

</mosaic_0001>

<bundles_post_ra>
// kernel: enc_layer_forward.3
= control target key start
LH: loop header
LB: loop body
LE: loop exit
PB: predicated region body
PF: predicated region fallthrough
CT: control target
= control target key end

     0   :  { %s3532_s13 = smov 0   ;;  %s4453_s0 = inlined_call_operand.vmem [shape: f32[32,128], index: 0, kind: input, shape index: {}]   ;;  %s4454_s1 = inlined_call_operand.vmem [shape: bf16[32,16,128], index: 1, kind: input, shape index: {}]   ;;  %s4455_s2 = inlined_call_operand.vmem [shape: bf16[32,16,128], index: 2, kind: input, shape index: {}]   ;;  %s4456_s3 = inlined_call_operand.vmem [shape: bf16[128,128], index: 3, kind: input, shape index: {}]   ;;  %s4457_s4 = inlined_call_operand.vmem [shape: bf16[256,128], index: 4, kind: input, shape index: {}]   ;;  %s4458_s5 = inlined_call_operand.vmem [shape: f32[1,128], index: 5, kind: input, shape index: {}]   ;;  %s4459_s6 = inlined_call_operand.vmem [shape: bf16[128,128], index: 6, kind: input, shape index: {}]   ;;  %s4460_s7 = inlined_call_operand.vmem [shape: f32[1,128], index: 7, kind: input, shape index: {}]   ;;  %s4461_s8 = inlined_call_operand.vmem [shape: bf16[128,128], index: 8, kind: input, shape index: {}]   ;;  %s4462_s9 = inlined_call_operand.vmem [shape: f32[1,128], index: 9, kind: input, shape index: {}]   ;;  %s4463_s10 = inlined_call_operand.vmem [shape: f32[32,16,128], index: 10, kind: output, shape index: {}]  }
   0x1 LB: > { %s2619_s14 = sadd.s32 4294967295, %s3472_s13   ;;  %p2623_p0 = scmp.ge.s32.totalorder %s3472_s13, 1  ;;  %s3472_s13 = sphi %s3532_s13, %s20_s13  }
   0x2   : > { %p337_p1 = scmp.lt.s32.totalorder %s3472_s13, 3 }
   0x4   : > { %p338_p2 = pnand %p2623_p0, %p337_p1 }
   0x6   : > { %341 = sbr.rel (%p338_p2) target bundleno = 1252 (0x4e4), region = 60 }
   0xd   : > { %s2626_s15 = sshll.u32 %s2619_s14, 4  ;;  %v3090_v30 = vld [vmem:[%s4456_s3] sm:$0xff]   ;;  %v3474_v33 = vmov 0.0   ;;  %v3094_v34 = vld [vmem:[%s4457_s4 + $0x48] sm:$0xff]   ;;  %v3097_v37 = vld [vmem:[%s4457_s4 + $0x50] sm:$0xff]   ;;  %s2624_s29 = sshll.u32 %s2619_s14, 1 }
   0xe   : > { %p395_p3 = scmp.lt.s32.totalorder %s2626_s15, 31  ;;  %v3091_v31 = vld [vmem:[%s4457_s4 + $0x40] sm:$0xff]   ;;  %2947 = vmatprep.subr.bf16.mxu0 %v3474_v33  ;;  %v3093_v35 = vld [vmem:[%s4456_s3 + $0x8] sm:$0xff]   ;;  %v3096_v38 = vld [vmem:[%s4456_s3 + $0x10] sm:$0xff]   ;;  %p389_p4 = scmp.lt.s32.totalorder %s2624_s29, 3  ;;  %vm3475_vm0 = vmmov 0  }
   0xf   : > { %v3092_v32 = vld [vmem:[%s4457_s4] sm:$0xff]   ;;  %2948 = vmatpush3.bf16.msra.mxu0 %v3090_v30  ;;  %2787 = vmatprep.subr.bf16.mxu1 %v3091_v31  ;;  %v3095_v36 = vld [vmem:[%s4457_s4 + $0x8] sm:$0xff]   ;;  %v3100_v30 = vld [vmem:[%s4457_s4 + $0x58] sm:$0xff]  }
  0x10   : > { %s4492_s15 = smov (!%p395_p3, %s2626_s15), 31  ;;  %2788 = vmatpush3.bf16.msra.mxu1 %v3092_v32  ;;  %2949 = vmatprep.subr.bf16.mxu0 %v3474_v33  ;;  %s4494_s29 = smov (!%p389_p4, %s2624_s29), 3 }
  0x11   : > { %s2696_s16 = sshll.u32 %s4492_s15, 3  ;;  %2789 = vmatprep.subr.bf16.mxu1 %v3094_v34  ;;  %s2625_s24 = sshll.u32 %s4494_s29, 3  ;;  %2963 = vmatprep.mubr.msk.bf16.mxu0 %vm3475_vm0, %v3474_v33 }
  0x12   : > { %s3548_s19 = scalar_lea.vmem %s4454_s1, %s2696_s16  ;;  %s3580_s22 = scalar_lea.vmem %s4455_s2, %s2696_s16 }
  0x13   : > { %v2700_v0 = vld [vmem:[%s3548_s19] sm:$0xff]   ;;  %v2763_v1 = vld [vmem:[%s3548_s19 + $0x8] sm:$0xff]   ;;  %v2764_v6 = vld [vmem:[%s3548_s19 + $0x10] sm:$0xff]   ;;  %2950 = vmatpush3.bf16.msra.mxu0 %v3093_v35  ;;  %s392_s29 = scalar_lea.vmem %s4453_s0, %s2625_s24  ;;  %s2698_s11 = sshll.u32 %s4492_s15, 4 }
  0x14   : > { %v3552_v2 = vunpack.c.l.bf16 %v2700_v0  ;;  %v3554_v3 = vunpack.c.l.bf16 %v2763_v1  ;;  %v3557_v4 = vunpack.c.h.bf16 %v2700_v0  ;;  %v3560_v5 = vunpack.c.h.bf16 %v2763_v1  ;;  %v2765_v7 = vld [vmem:[%s3548_s19 + $0x18] sm:$0xff]   ;;  %v2766_v10 = vld [vmem:[%s3548_s19 + $0x20] sm:$0xff]   ;;  %v2767_v13 = vld [vmem:[%s3548_s19 + $0x28] sm:$0xff]   ;;  %2790 = vmatpush3.bf16.msra.mxu1 %v3095_v36  ;;  %2951 = vmatprep.subr.bf16.mxu0 %v3474_v33  ;;  %s4353_s14 = scalar_lea.vmem %s4463_s10, %s2698_s11 }
  0x15   : > { %v3566_v8 = vunpack.c.l.bf16 %v2764_v6  ;;  %v3568_v9 = vunpack.c.h.bf16 %v2764_v6  ;;  %v3573_v11 = vunpack.c.l.bf16 %v2765_v7  ;;  %v3575_v12 = vunpack.c.h.bf16 %v2765_v7  ;;  %v2768_v16 = vld [vmem:[%s3548_s19 + $0x30] sm:$0xff]   ;;  %v2769_v21 = vld [vmem:[%s3548_s19 + $0x38] sm:$0xff]   ;;  %v2770_v22 = vld [vmem:[%s3548_s19 + $0x40] sm:$0xff]   ;;  %2791 = vmatprep.subr.bf16.mxu1 %v3097_v37 }
  0x16   : > { %482 = vadd.xlane.f32.xlu0 %v3552_v2  ;;  %486 = vadd.xlane.f32.xlu1 %v3554_v3  ;;  %v3585_v14 = vunpack.c.l.bf16 %v2766_v10  ;;  %v3587_v15 = vunpack.c.h.bf16 %v2766_v10  ;;  %v3592_v17 = vunpack.c.l.bf16 %v2767_v13  ;;  %v3594_v18 = vunpack.c.h.bf16 %v2767_v13  ;;  %v2771_v27 = vld [vmem:[%s3548_s19 + $0x48] sm:$0xff]   ;;  %v2772_v45 = vld [vmem:[%s3548_s19 + $0x50] sm:$0xff]   ;;  %v2773_v59 = vld [vmem:[%s3548_s19 + $0x58] sm:$0xff]  }
  0x17   : > { %v3598_v19 = vunpack.c.l.bf16 %v2768_v16  ;;  %v3600_v20 = vunpack.c.h.bf16 %v2768_v16  ;;  %v3606_v23 = vunpack.c.l.bf16 %v2769_v21  ;;  %v3608_v24 = vunpack.c.h.bf16 %v2769_v21  ;;  %2952 = vmatpush3.bf16.msra.mxu0 %v3096_v38  ;;  %v3098_v16 = vld [vmem:[%s4457_s4 + $0x10] sm:$0xff]   ;;  %v2774_v21 = vld [vmem:[%s3548_s19 + $0x60] sm:$0xff]   ;;  %v3101_v36 = vld [vmem:[%s4457_s4 + $0x18] sm:$0xff]  }
  0x18   : > { %v3612_v25 = vunpack.c.l.bf16 %v2770_v22  ;;  %v3614_v26 = vunpack.c.h.bf16 %v2770_v22  ;;  %v3619_v28 = vunpack.c.l.bf16 %v2771_v27  ;;  %v3621_v29 = vunpack.c.h.bf16 %v2771_v27  ;;  %2953 = vmatprep.subr.bf16.mxu0 %v3474_v33  ;;  %2792 = vmatpush3.bf16.msra.mxu1 %v3098_v16  ;;  %v3099_v27 = vld [vmem:[%s4456_s3 + $0x18] sm:$0xff]   ;;  %v3102_v38 = vld [vmem:[%s4456_s3 + $0x20] sm:$0xff]  }
  0x19   : > { %4473 = vst [vmem:[#allocation2_spill] sm:$0xff] %v3600_v20  ;;  %v3665_v51 = vunpack.c.l.bf16 %v2772_v45  ;;  %v3675_v57 = vunpack.c.h.bf16 %v2772_v45  ;;  %v3682_v62 = vunpack.c.l.bf16 %v2773_v59  ;;  %v3690_v7 = vunpack.c.h.bf16 %v2773_v59  ;;  %2793 = vmatprep.subr.bf16.mxu1 %v3100_v30  ;;  %v3104_v45 = vld [vmem:[%s4457_s4 + $0x20] sm:$0xff]   ;;  %v2776_v30 = vld [vmem:[%s3548_s19 + $0x70] sm:$0xff]  }
  0x1a   : > { %484 = vadd.xlane.f32.xlu0 %v3557_v4  ;;  %488 = vadd.xlane.f32.xlu1 %v3560_v5  ;;  %4474 = vst [vmem:[#allocation3_spill] sm:$0xff] %v3612_v25  ;;  %4475 = vst [vmem:[#allocation4_spill] sm:$0xff] %v3614_v26  ;;  %v3710_v34 = vunpack.c.l.bf16 %v2774_v21 }
  0x1b   : > { %4476 = vst [vmem:[#allocation5_spill] sm:$0xff] %v3619_v28  ;;  %4477 = vst [vmem:[#allocation6_spill] sm:$0xff] %v3621_v29  ;;  %2954 = vmatpush3.bf16.msra.mxu0 %v3099_v27  ;;  %v3110_v27 = vld [vmem:[%s4457_s4 + $0x30] sm:$0xff]  }
  0x1c   : > { %4478 = vst [vmem:[#allocation7_spill] sm:$0xff] %v3665_v51  ;;  %4479 = vst [vmem:[#allocation8_spill] sm:$0xff] %v3675_v57  ;;  %2794 = vmatpush3.bf16.msra.mxu1 %v3101_v36  ;;  %2955 = vmatprep.subr.bf16.mxu0 %v3474_v33  ;;  %v3112_v36 = vld [vmem:[%s4457_s4 + $0x78] sm:$0xff]  }
  0x1d   : > { %4480 = vst [vmem:[#allocation9_spill] sm:$0xff] %v3682_v62  ;;  %4481 = vst [vmem:[#allocation10_spill] sm:$0xff] %v3690_v7 }
  0x1e   : > { %490 = vadd.xlane.f32.xlu0 %v3566_v8  ;;  %492 = vadd.xlane.f32.xlu1 %v3568_v9 }
  0x1f   : > { %2956 = vmatpush3.bf16.msra.mxu0 %v3102_v38 }
  0x20   : > { %2957 = vmatprep.subr.bf16.mxu0 %v3474_v33 }
  0x22   : > { %494 = vadd.xlane.f32.xlu0 %v3573_v11  ;;  %496 = vadd.xlane.f32.xlu1 %v3575_v12 }
  0x26   : > { %498 = vadd.xlane.f32.xlu0 %v3585_v14  ;;  %500 = vadd.xlane.f32.xlu1 %v3587_v15 }
  0x2a   : > { %502 = vadd.xlane.f32.xlu0 %v3592_v17  ;;  %504 = vadd.xlane.f32.xlu1 %v3594_v18 }
  0x2e   : > { %506 = vadd.xlane.f32.xlu0 %v3598_v19  ;;  %508 = vadd.xlane.f32.xlu1 %v3600_v20 }
  0x32   : > { %510 = vadd.xlane.f32.xlu0 %v3606_v23  ;;  %512 = vadd.xlane.f32.xlu1 %v3608_v24 }
  0x36   : > { %514 = vadd.xlane.f32.xlu0 %v3612_v25  ;;  %516 = vadd.xlane.f32.xlu1 %v3614_v26 }
  0x3a   : > { %518 = vadd.xlane.f32.xlu0 %v3619_v28  ;;  %520 = vadd.xlane.f32.xlu1 %v3621_v29 }
  0xa3   : > { %v483_v39 = vpop.xlane.xlu0 %482  ;;  %v487_v40 = vpop.xlane.xlu1 %486 }
  0xa4   : > { %v547_v41 = vmul.f32 0.0078125, %v483_v39  ;;  %v549_v43 = vmul.f32 0.0078125, %v487_v40  ;;  %v3103_v39 = vld [vmem:[%s4457_s4 + $0x60] sm:$0xff]  }
  0xa5   : > { %2795 = vmatprep.subr.bf16.mxu1 %v3103_v39  ;;  %v3786_v39 = vunpack.c.l.bf16 %v2776_v30 }
  0xa6   : > { %v3654_v42 = vsub.f32 %v3552_v2, %v547_v41  ;;  %v3663_v50 = vsub.f32 %v3554_v3, %v549_v43  ;;  %v3726_v41 = vunpack.c.h.bf16 %v2774_v21  ;;  %2796 = vmatpush3.bf16.msra.mxu1 %v3104_v45 }
  0xa7   : > { %v485_v44 = vpop.xlane.xlu0 %484  ;;  %v489_v46 = vpop.xlane.xlu1 %488 }
  0xa8   : > { %v548_v47 = vmul.f32 0.0078125, %v485_v44  ;;  %v611_v48 = vmul.f32 %v3654_v42, %v3654_v42  ;;  %v550_v52 = vmul.f32 0.0078125, %v489_v46  ;;  %v613_v56 = vmul.f32 %v3663_v50, %v3663_v50  ;;  %v2775_v46 = vld [vmem:[%s3548_s19 + $0x68] sm:$0xff]  }
  0xa9   : > { %v3765_v16 = vunpack.c.h.bf16 %v2775_v46 }
  0xaa   : > { %v3660_v49 = vsub.f32 %v3557_v4, %v548_v47  ;;  %643 = vadd.xlane.f32.xlu0 %v611_v48  ;;  %v3671_v55 = vsub.f32 %v3560_v5, %v550_v52  ;;  %v3105_v52 = vld [vmem:[%s4456_s3 + $0x28] sm:$0xff]  }
  0xab   : > { %v491_v53 = vpop.xlane.xlu0 %490  ;;  %v493_v60 = vpop.xlane.xlu1 %492  ;;  %2958 = vmatpush3.bf16.msra.mxu0 %v3105_v52 }
  0xac   : > { %v612_v54 = vmul.f32 %v3660_v49, %v3660_v49  ;;  %v551_v58 = vmul.f32 0.0078125, %v491_v53  ;;  %v614_v63 = vmul.f32 %v3671_v55, %v3671_v55  ;;  %v552_v0 = vmul.f32 0.0078125, %v493_v60  ;;  %v3106_v53 = vld [vmem:[%s4457_s4 + $0x68] sm:$0xff]   ;;  %2959 = vmatprep.subr.bf16.mxu0 %v3474_v33 }
  0xad   : > { %v3107_v60 = vld [vmem:[%s4457_s4 + $0x28] sm:$0xff]   ;;  %2797 = vmatprep.subr.bf16.mxu1 %v3106_v53 }
  0xae   : > { %522 = vadd.xlane.f32.xlu0 %v3665_v51  ;;  %645 = vadd.xlane.f32.xlu1 %v612_v54  ;;  %v3680_v61 = vsub.f32 %v3566_v8, %v551_v58  ;;  %v3688_v6 = vsub.f32 %v3568_v9, %v552_v0  ;;  %v3747_v58 = vunpack.c.l.bf16 %v2775_v46  ;;  %v416_v46 = vld [vmem:[%s392_s29] sm:$0xff] }
  0xaf   : > { %v495_v1 = vpop.xlane.xlu0 %494  ;;  %v497_v22 = vpop.xlane.xlu1 %496  ;;  %2798 = vmatpush3.bf16.msra.mxu1 %v3107_v60 }
  0xb0   : > { %v615_v10 = vmul.f32 %v3680_v61, %v3680_v61  ;;  %v553_v13 = vmul.f32 0.0078125, %v495_v1  ;;  %v616_v32 = vmul.f32 %v3688_v6, %v3688_v6  ;;  %v554_v35 = vmul.f32 0.0078125, %v497_v22  ;;  %v3108_v1 = vld [vmem:[%s4456_s3 + $0x30] sm:$0xff]  }
  0xb1   : > { %2960 = vmatpush3.bf16.msra.mxu0 %v3108_v1 }
  0xb2   : > { %647 = vadd.xlane.f32.xlu0 %v613_v56  ;;  %524 = vadd.xlane.f32.xlu1 %v3675_v57  ;;  %v3706_v31 = vsub.f32 %v3573_v11, %v553_v13  ;;  %v3724_v40 = vsub.f32 %v3575_v12, %v554_v35  ;;  %v3111_v35 = vld [vmem:[%s4456_s3 + $0x38] sm:$0xff]  }
  0xb3   : > { %v499_v37 = vpop.xlane.xlu0 %498  ;;  %v501_v47 = vpop.xlane.xlu1 %500  ;;  %2961 = vmatprep.subr.bf16.mxu0 %v3474_v33 }
  0xb4   : > { %v617_v43 = vmul.f32 %v3706_v31, %v3706_v31  ;;  %v555_v44 = vmul.f32 0.0078125, %v499_v37  ;;  %v618_v56 = vmul.f32 %v3724_v40, %v3724_v40  ;;  %v556_v59 = vmul.f32 0.0078125, %v501_v47  ;;  %v417_v47 = vld [vmem:[%s392_s29 + $0x8] sm:$0xff] }
  0xb5   : > { %2962 = vmatpush3.bf16.msra.mxu0 %v3111_v35  ;;  %v867_v52 = vpack.c.bf16 %v417_v47, %v416_v46 }
  0xb6   : > { %526 = vadd.xlane.f32.xlu0 %v3682_v62  ;;  %649 = vadd.xlane.f32.xlu1 %v614_v63  ;;  %v3743_v54 = vsub.f32 %v3585_v14, %v555_v44  ;;  %v3763_v13 = vsub.f32 %v3587_v15, %v556_v59  ;;  %v3113_v44 = vld [vmem:[%s4457_s4 + $0x38] sm:$0xff]  }
  0xb7   : > { %v503_v48 = vpop.xlane.xlu0 %502  ;;  %v505_v63 = vpop.xlane.xlu1 %504 }
  0xb8   : > { %v619_v21 = vmul.f32 %v3743_v54, %v3743_v54  ;;  %v557_v22 = vmul.f32 0.0078125, %v503_v48  ;;  %v620_v38 = vmul.f32 %v3763_v13, %v3763_v13  ;;  %v3114_v48 = vld [vmem:[%s3580_s22] sm:$0xff]   ;;  %2964 = vmatmul.mubr.bf16.vlgmr.msra.gmra.mrb[0].mxu0 %v867_v52 }
  0xb9   : > { %1252 = vmatprep.mubr.bf16.mxu1 %v3114_v48 }
  0xba   : > { %528 = vadd.xlane.f32.xlu1 %v3690_v7  ;;  %651 = vadd.xlane.f32.xlu0 %v615_v10  ;;  %v3109_v10 = vld [vmem:[%s4457_s4 + $0x70] sm:$0xff]   ;;  %v3782_v37 = vsub.f32 %v3592_v17, %v557_v22 }
  0xbb   : > { %v507_v0 = vpop.xlane.xlu0 %506  ;;  %2799 = vmatprep.subr.bf16.mxu1 %v3109_v10 }
  0xbc   : > { %2800 = vmatpush3.bf16.msra.mxu1 %v3110_v27  ;;  %v621_v59 = vmul.f32 %v3782_v37, %v3782_v37  ;;  %v559_v60 = vmul.f32 0.0078125, %v507_v0 }
  0xbd   : > { %2801 = vmatprep.subr.bf16.mxu1 %v3112_v36 }
  0xbe   : > { %653 = vadd.xlane.f32.xlu1 %v616_v32  ;;  %530 = vadd.xlane.f32.xlu0 %v3710_v34  ;;  %v509_v32 = vpop.xlane.xlu1 %508  ;;  %v3807_v33 = vsub.f32 %v3598_v19, %v559_v60 }
  0xbf   : > { %v511_v45 = vpop.xlane.xlu0 %510  ;;  %v560_v10 = vmul.f32 0.0078125, %v509_v32 }
  0xc0   : > { %2802 = vmatpush3.bf16.msra.mxu1 %v3113_v44 }
  0xc1   : > { %v3814_v0 = vsub.f32 %v3600_v20, %v560_v10 }
  0xc2   : > { %532 = vadd.xlane.f32.xlu1 %v3726_v41  ;;  %655 = vadd.xlane.f32.xlu0 %v617_v43  ;;  %v558_v43 = vmul.f32 0.0078125, %v505_v63  ;;  %v2777_v63 = vld [vmem:[%s3548_s19 + $0x78] sm:$0xff]   ;;  %v513_v1 = vpop.xlane.xlu1 %512 }
  0xc3   : > { %v3811_v27 = vunpack.c.l.bf16 %v2777_v63  ;;  %v562_v35 = vmul.f32 0.0078125, %v513_v1  ;;  %v624_v47 = vmul.f32 %v3814_v0, %v3814_v0 }
  0xc4   : > { %v3798_v53 = vsub.f32 %v3594_v18, %v558_v43  ;;  %v623_v43 = vmul.f32 %v3807_v33, %v3807_v33 }
  0xc6   : > { %657 = vadd.xlane.f32.xlu1 %v618_v56  ;;  %534 = vadd.xlane.f32.xlu0 %v3747_v58  ;;  %v3800_v56 = vunpack.c.h.bf16 %v2776_v30  ;;  %v622_v22 = vmul.f32 %v3798_v53, %v3798_v53  ;;  %v561_v30 = vmul.f32 0.0078125, %v511_v45  ;;  %v517_v36 = vpop.xlane.xlu1 %516  ;;  %v3825_v45 = vsub.f32 %v3608_v24, %v562_v35 }
  0xc8   : > { %v3818_v32 = vsub.f32 %v3606_v23, %v561_v30  ;;  %v626_v1 = vmul.f32 %v3825_v45, %v3825_v45 }
  0xca   : > { %536 = vadd.xlane.f32.xlu1 %v3765_v16  ;;  %659 = vadd.xlane.f32.xlu0 %v619_v21  ;;  %v515_v21 = vpop.xlane.xlu0 %514  ;;  %v625_v52 = vmul.f32 %v3818_v32, %v3818_v32 }
  0xcb   : > { %v563_v44 = vmul.f32 0.0078125, %v515_v21 }
  0xcd   : > { %v3831_v48 = vsub.f32 %v3612_v25, %v563_v44 }
  0xce   : > { %661 = vadd.xlane.f32.xlu1 %v620_v38  ;;  %538 = vadd.xlane.f32.xlu0 %v3786_v39  ;;  %v3820_v38 = vunpack.c.h.bf16 %v2777_v63  ;;  %v519_v46 = vpop.xlane.xlu0 %518  ;;  %v521_v63 = vpop.xlane.xlu1 %520 }
  0xcf   : > { %v565_v60 = vmul.f32 0.0078125, %v519_v46  ;;  %v566_v30 = vmul.f32 0.0078125, %v521_v63 }
  0xd1   : > { %v3841_v21 = vsub.f32 %v3619_v28, %v565_v60  ;;  %v3846_v35 = vsub.f32 %v3621_v29, %v566_v30 }
  0xd2   : > { %540 = vadd.xlane.f32.xlu1 %v3800_v56  ;;  %663 = vadd.xlane.f32.xlu0 %v621_v59  ;;  %v564_v59 = vmul.f32 0.0078125, %v517_v36 }
  0xd3   : > { %v630_v44 = vmul.f32 %v3846_v35, %v3846_v35 }
  0xd4   : > { %v3838_v10 = vsub.f32 %v3614_v26, %v564_v59 }
  0xd6   : > { %665 = vadd.xlane.f32.xlu1 %v622_v22  ;;  %542 = vadd.xlane.f32.xlu0 %v3811_v27  ;;  %v627_v22 = vmul.f32 %v3831_v48, %v3831_v48  ;;  %v628_v36 = vmul.f32 %v3838_v10, %v3838_v10 }
  0xda   : > { %544 = vadd.xlane.f32.xlu1 %v3820_v38  ;;  %667 = vadd.xlane.f32.xlu0 %v623_v43  ;;  %v629_v43 = vmul.f32 %v3841_v21, %v3841_v21 }
  0xde   : > { %669 = vadd.xlane.f32.xlu1 %v624_v47  ;;  %671 = vadd.xlane.f32.xlu0 %v625_v52 }
  0xe2   : > { %673 = vadd.xlane.f32.xlu1 %v626_v1  ;;  %675 = vadd.xlane.f32.xlu0 %v627_v22 }
  0xe6   : > { %677 = vadd.xlane.f32.xlu1 %v628_v36  ;;  %679 = vadd.xlane.f32.xlu0 %v629_v43 }
  0xea   : > { %681 = vadd.xlane.f32.xlu1 %v630_v44 }
 0x137   : > { %v644_v46 = vpop.xlane.xlu0 %643 }
 0x138   : > { %v707_v47 = vmul.f32 0.0078125, %v644_v46 }
 0x13a   : > { %v739_v52 = vadd.f32 1e-05, %v707_v47 }
 0x13b   : > { %v646_v59 = vpop.xlane.xlu1 %645  ;;  %v523_v60 = vpop.xlane.xlu0 %522 }
 0x13c   : > { %v708_v63 = vmul.f32 0.0078125, %v646_v59  ;;  %v567_v1 = vmul.f32 0.0078125, %v523_v60  ;;  %3146 = vrsqrt.f32 %v739_v52 }
 0x13e   : > { %v740_v22 = vadd.f32 1e-05, %v708_v63  ;;  %v3855_v30 = vsub.f32 %v3665_v51, %v567_v1 }
 0x13f   : > { %v525_v26 = vpop.xlane.xlu1 %524  ;;  %v648_v29 = vpop.xlane.xlu0 %647 }
 0x140   : > { %3148 = vrsqrt.f32 %v740_v22  ;;  %v568_v36 = vmul.f32 0.0078125, %v525_v26  ;;  %v709_v43 = vmul.f32 0.0078125, %v648_v29  ;;  %v631_v44 = vmul.f32 %v3855_v30, %v3855_v30 }
 0x142   : > { %v3860_v46 = vsub.f32 %v3675_v57, %v568_v36  ;;  %v741_v47 = vadd.f32 1e-05, %v709_v43  ;;  %683 = vadd.xlane.f32.xlu0 %v631_v44 }
 0x143   : > { %v650_v59 = vpop.xlane.xlu1 %649  ;;  %v527_v60 = vpop.xlane.xlu0 %526 }
 0x144   : > { %v710_v52 = vmul.f32 0.0078125, %v650_v59  ;;  %v569_v63 = vmul.f32 0.0078125, %v527_v60  ;;  %v632_v1 = vmul.f32 %v3860_v46, %v3860_v46  ;;  %3150 = vrsqrt.f32 %v741_v47 }
 0x146   : > { %v742_v51 = vadd.f32 1e-05, %v710_v52  ;;  %v3865_v26 = vsub.f32 %v3682_v62, %v569_v63  ;;  %685 = vadd.xlane.f32.xlu1 %v632_v1  ;;  %v3147_v25 = vpop.eup %3146 }
 0x147   : > { %v529_v29 = vpop.xlane.xlu1 %528  ;;  %v652_v22 = vpop.xlane.xlu0 %651  ;;  %v803_v1 = vmul.f32 %v3147_v25, %v3654_v42 }
 0x148   : > { %3152 = vrsqrt.f32 %v742_v51  ;;  %v570_v36 = vmul.f32 0.0078125, %v529_v29  ;;  %v711_v43 = vmul.f32 0.0078125, %v652_v22  ;;  %v633_v44 = vmul.f32 %v3865_v26, %v3865_v26  ;;  %v3115_v29 = vld [vmem:[%s3580_s22 + $0x8] sm:$0xff]  }
 0x14a   : > { %v3149_v59 = vpop.eup %3148  ;;  %v3870_v60 = vsub.f32 %v3690_v7, %v570_v36  ;;  %v743_v47 = vadd.f32 1e-05, %v711_v43  ;;  %687 = vadd.xlane.f32.xlu0 %v633_v44 }
 0x14b   : > { %v654_v52 = vpop.xlane.xlu1 %653  ;;  %v531_v63 = vpop.xlane.xlu0 %530  ;;  %v804_v57 = vmul.f32 %v3149_v59, %v3660_v49 }
 0x14c   : > { %v712_v62 = vmul.f32 0.0078125, %v654_v52  ;;  %v571_v28 = vmul.f32 0.0078125, %v531_v63  ;;  %v634_v51 = vmul.f32 %v3870_v60, %v3870_v60  ;;  %3154 = vrsqrt.f32 %v743_v47 }
 0x14d   : > { %v973_v22 = vpack.c.bf16 %v804_v57, %v803_v1 }
 0x14e   : > { %v744_v20 = vadd.f32 1e-05, %v712_v62  ;;  %v3878_v36 = vsub.f32 %v3710_v34, %v571_v28  ;;  %689 = vadd.xlane.f32.xlu1 %v634_v51  ;;  %v3151_v7 = vpop.eup %3150 }
 0x14f   : > { %v533_v43 = vpop.xlane.xlu1 %532  ;;  %1253 = vmatmul.mubr.bf16.vlgmr.msra.gmra.mrb[0].mxu1 %v973_v22  ;;  %v656_v44 = vpop.xlane.xlu0 %655  ;;  %v805_v52 = vmul.f32 %v3151_v7, %v3663_v50  ;;  %v3116_v22 = vld [vmem:[%s3580_s22 + $0x10] sm:$0xff]  }
 0x150   : > { %3156 = vrsqrt.f32 %v744_v20  ;;  %v572_v25 = vmul.f32 0.0078125, %v533_v43  ;;  %v713_v42 = vmul.f32 0.0078125, %v656_v44  ;;  %v635_v49 = vmul.f32 %v3878_v36, %v3878_v36  ;;  %1260 = vmatprep.mubr.bf16.mxu1 %v3115_v29 }
 0x152   : > { %v3153_v59 = vpop.eup %3152  ;;  %v3883_v57 = vsub.f32 %v3726_v41, %v572_v25  ;;  %v745_v62 = vadd.f32 1e-05, %v713_v42  ;;  %691 = vadd.xlane.f32.xlu0 %v635_v49 }
 0x153   : > { %v658_v28 = vpop.xlane.xlu1 %657  ;;  %v535_v47 = vpop.xlane.xlu0 %534  ;;  %v806_v63 = vmul.f32 %v3153_v59, %v3671_v55 }
 0x154   : > { %v714_v20 = vmul.f32 0.0078125, %v658_v28  ;;  %v573_v1 = vmul.f32 0.0078125, %v535_v47  ;;  %v636_v51 = vmul.f32 %v3883_v57, %v3883_v57  ;;  %3158 = vrsqrt.f32 %v745_v62 }
 0x155   : > { %v974_v43 = vpack.c.bf16 %v806_v63, %v805_v52 }
 0x156   : > { %v746_v29 = vadd.f32 1e-05, %v714_v20  ;;  %v3891_v44 = vsub.f32 %v3747_v58, %v573_v1  ;;  %693 = vadd.xlane.f32.xlu1 %v636_v51  ;;  %v3155_v49 = vpop.eup %3154 }
 0x157   : > { %v537_v25 = vpop.xlane.xlu1 %536  ;;  %1261 = vmatmul.mubr.bf16.gmra.mrb[4].mxu1 %v974_v43  ;;  %v660_v42 = vpop.xlane.xlu0 %659  ;;  %v807_v63 = vmul.f32 %v3155_v49, %v3680_v61 }
 0x158   : > { %3160 = vrsqrt.f32 %v746_v29  ;;  %v574_v50 = vmul.f32 0.0078125, %v537_v25  ;;  %v715_v55 = vmul.f32 0.0078125, %v660_v42  ;;  %v637_v7 = vmul.f32 %v3891_v44, %v3891_v44  ;;  %1268 = vmatprep.mubr.bf16.mxu1 %v3116_v22  ;;  %v3117_v29 = vld [vmem:[%s3580_s22 + $0x18] sm:$0xff]  }
 0x15a   : > { %v3157_v59 = vpop.eup %3156  ;;  %v3896_v62 = vsub.f32 %v3765_v16, %v574_v50  ;;  %v747_v28 = vadd.f32 1e-05, %v715_v55  ;;  %695 = vadd.xlane.f32.xlu0 %v637_v7 }
 0x15b   : > { %v662_v47 = vpop.xlane.xlu1 %661  ;;  %v539_v52 = vpop.xlane.xlu0 %538  ;;  %v808_v20 = vmul.f32 %v3157_v59, %v3688_v6 }
 0x15c   : > { %v716_v1 = vmul.f32 0.0078125, %v662_v47  ;;  %v575_v51 = vmul.f32 0.0078125, %v539_v52  ;;  %v638_v43 = vmul.f32 %v3896_v62, %v3896_v62  ;;  %3162 = vrsqrt.f32 %v747_v28 }
 0x15d   : > { %v975_v25 = vpack.c.bf16 %v808_v20, %v807_v63 }
 0x15e   : > { %v748_v22 = vadd.f32 1e-05, %v716_v1  ;;  %v3904_v42 = vsub.f32 %v3786_v39, %v575_v51  ;;  %697 = vadd.xlane.f32.xlu1 %v638_v43  ;;  %v3159_v7 = vpop.eup %3158 }
 0x15f   : > { %v541_v50 = vpop.xlane.xlu1 %540  ;;  %1269 = vmatmul.mubr.bf16.gmra.mrb[8].mxu1 %v975_v25  ;;  %v664_v55 = vpop.xlane.xlu0 %663  ;;  %v809_v20 = vmul.f32 %v3159_v7, %v3706_v31 }
 0x160   : > { %3164 = vrsqrt.f32 %v748_v22  ;;  %v576_v61 = vmul.f32 0.0078125, %v541_v50  ;;  %v717_v6 = vmul.f32 0.0078125, %v664_v55  ;;  %v639_v49 = vmul.f32 %v3904_v42, %v3904_v42  ;;  %1276 = vmatprep.mubr.bf16.mxu1 %v3117_v29  ;;  %v3118_v22 = vld [vmem:[%s3580_s22 + $0x20] sm:$0xff]  }
 0x162   : > { %v3161_v59 = vpop.eup %3160  ;;  %v3909_v28 = vsub.f32 %v3800_v56, %v576_v61  ;;  %v749_v47 = vadd.f32 1e-05, %v717_v6  ;;  %699 = vadd.xlane.f32.xlu0 %v639_v49 }
 0x163   : > { %v666_v52 = vpop.xlane.xlu1 %665  ;;  %v543_v63 = vpop.xlane.xlu0 %542  ;;  %v810_v1 = vmul.f32 %v3161_v59, %v3724_v40 }
 0x164   : > { %v718_v51 = vmul.f32 0.0078125, %v666_v52  ;;  %v577_v43 = vmul.f32 0.0078125, %v543_v63  ;;  %v640_v25 = vmul.f32 %v3909_v28, %v3909_v28  ;;  %3166 = vrsqrt.f32 %v749_v47 }
 0x165   : > { %v976_v50 = vpack.c.bf16 %v810_v1, %v809_v20 }
 0x166   : > { %v750_v29 = vadd.f32 1e-05, %v718_v51  ;;  %v3917_v55 = vsub.f32 %v3811_v27, %v577_v43  ;;  %701 = vadd.xlane.f32.xlu1 %v640_v25  ;;  %v3163_v49 = vpop.eup %3162 }
 0x167   : > { %v545_v61 = vpop.xlane.xlu1 %544  ;;  %1277 = vmatmul.mubr.bf16.gmra.mrb[12].mxu1 %v976_v50  ;;  %v668_v6 = vpop.xlane.xlu0 %667  ;;  %v811_v1 = vmul.f32 %v3163_v49, %v3743_v54  ;;  %v3119_v50 = vld [vmem:[%s3580_s22 + $0x28] sm:$0xff]  }
 0x168   : > { %3168 = vrsqrt.f32 %v750_v29  ;;  %v578_v31 = vmul.f32 0.0078125, %v545_v61  ;;  %v719_v40 = vmul.f32 0.0078125, %v668_v6  ;;  %v641_v7 = vmul.f32 %v3917_v55, %v3917_v55  ;;  %1284 = vmatprep.mubr.bf16.mxu1 %v3118_v22 }
 0x16a   : > { %v3165_v59 = vpop.eup %3164  ;;  %v3922_v47 = vsub.f32 %v3820_v38, %v578_v31  ;;  %v751_v52 = vadd.f32 1e-05, %v719_v40  ;;  %703 = vadd.xlane.f32.xlu0 %v641_v7 }
 0x16b   : > { %v670_v63 = vpop.xlane.xlu1 %669  ;;  %v672_v20 = vpop.xlane.xlu0 %671  ;;  %v812_v51 = vmul.f32 %v3165_v59, %v3763_v13 }
 0x16c   : > { %v720_v43 = vmul.f32 0.0078125, %v670_v63  ;;  %v642_v25 = vmul.f32 %v3922_v47, %v3922_v47  ;;  %3170 = vrsqrt.f32 %v751_v52  ;;  %v721_v61 = vmul.f32 0.0078125, %v672_v20  ;;  %v3120_v20 = vld [vmem:[%s3580_s22 + $0x30] sm:$0xff]  }
 0x16d   : > { %v977_v29 = vpack.c.bf16 %v812_v51, %v811_v1 }
 0x16e   : > { %v752_v22 = vadd.f32 1e-05, %v720_v43  ;;  %705 = vadd.xlane.f32.xlu1 %v642_v25  ;;  %v3167_v31 = vpop.eup %3166  ;;  %v753_v49 = vadd.f32 1e-05, %v721_v61 }
 0x16f   : > { %v674_v6 = vpop.xlane.xlu1 %673  ;;  %1285 = vmatmul.mubr.bf16.gmra.mrb[16].mxu1 %v977_v29  ;;  %v676_v7 = vpop.xlane.xlu0 %675  ;;  %v813_v63 = vmul.f32 %v3167_v31, %v3782_v37  ;;  %v3121_v31 = vld [vmem:[%s3580_s22 + $0x38] sm:$0xff]  }
 0x170   : > { %3172 = vrsqrt.f32 %v752_v22  ;;  %v722_v40 = vmul.f32 0.0078125, %v674_v6  ;;  %1292 = vmatprep.mubr.bf16.mxu1 %v3119_v50  ;;  %v723_v43 = vmul.f32 0.0078125, %v676_v7 }
 0x172   : > { %v3169_v54 = vpop.eup %3168  ;;  %v754_v13 = vadd.f32 1e-05, %v722_v40  ;;  %v755_v61 = vadd.f32 1e-05, %v723_v43 }
 0x173   : > { %v678_v59 = vpop.xlane.xlu1 %677  ;;  %v814_v1 = vmul.f32 %v3169_v54, %v3798_v53  ;;  %v680_v6 = vpop.xlane.xlu0 %679 }
 0x174   : > { %3174 = vrsqrt.f32 %v754_v13  ;;  %v724_v52 = vmul.f32 0.0078125, %v678_v59 }
 0x175   : > { %v978_v51 = vpack.c.bf16 %v814_v1, %v813_v63  ;;  %3176 = vrsqrt.f32 %v753_v49  ;;  %v725_v49 = vmul.f32 0.0078125, %v680_v6  ;;  %v3124_v6 = vld [vmem:[%s3580_s22 + $0x50] sm:$0xff]  }
 0x176   : > { %v3171_v25 = vpop.eup %3170  ;;  %v756_v29 = vadd.f32 1e-05, %v724_v52 }
 0x177   : > { %1293 = vmatmul.mubr.bf16.gmra.mrb[20].mxu1 %v978_v51  ;;  %v682_v50 = vpop.xlane.xlu1 %681  ;;  %v815_v40 = vmul.f32 %v3171_v25, %v3807_v33  ;;  %v757_v1 = vadd.f32 1e-05, %v725_v49 }
 0x178   : > { %1300 = vmatprep.mubr.bf16.mxu1 %v3120_v20  ;;  %3178 = vrsqrt.f32 %v756_v29  ;;  %v726_v53 = vmul.f32 0.0078125, %v682_v50  ;;  %v3123_v29 = vld [vmem:[%s3580_s22 + $0x48] sm:$0xff]  }
 0x179   : > { %3180 = vrsqrt.f32 %v755_v61 }
 0x17a   : > { %v3173_v22 = vpop.eup %3172  ;;  %v758_v59 = vadd.f32 1e-05, %v726_v53 }
 0x17b   : > { %v816_v37 = vmul.f32 %v3173_v22, %v3814_v0  ;;  %v3122_v0 = vld [vmem:[%s3580_s22 + $0x40] sm:$0xff]  }
 0x17c   : > { %3182 = vrsqrt.f32 %v758_v59 }
 0x17d   : > { %v979_v54 = vpack.c.bf16 %v816_v37, %v815_v40  ;;  %3184 = vrsqrt.f32 %v757_v1 }
 0x17e   : > { %v3175_v13 = vpop.eup %3174 }
 0x17f   : > { %1301 = vmatmul.mubr.bf16.gmra.mrb[24].mxu1 %v979_v54  ;;  %v3177_v7 = vpop.eup %3176  ;;  %v818_v63 = vmul.f32 %v3175_v13, %v3825_v45  ;;  %v3135_v54 = vld [vmem:[%s4459_s6 + $0x28] sm:$0xff]   ;;  %v3136_v13 = vld [vmem:[%s4459_s6 + $0x30] sm:$0xff]  }
 0x180   : > { %1308 = vmatprep.mubr.bf16.mxu1 %v3121_v31  ;;  %v817_v33 = vmul.f32 %v3177_v7, %v3818_v32  ;;  %v3134_v31 = vld [vmem:[%s4459_s6 + $0x20] sm:$0xff]   ;;  %v3137_v7 = vld [vmem:[%s4459_s6 + $0x38] sm:$0xff]  }
 0x182   : > { %v980_v52 = vpack.c.bf16 %v818_v63, %v817_v33  ;;  %v3179_v20 = vpop.eup %3178 }
 0x183   : > { %v3181_v51 = vpop.eup %3180  ;;  %v820_v43 = vmul.f32 %v3179_v20, %v3838_v10  ;;  %v3131_v10 = vld [vmem:[%s4459_s6 + $0x8] sm:$0xff]  }
 0x184   : > { %v819_v25 = vmul.f32 %v3181_v51, %v3831_v48  ;;  %v3130_v48 = vld [vmem:[%s4459_s6] sm:$0xff]  }
 0x185   : > { %2967 = vmatprep.subr.bf16.mxu0 %v3130_v48  ;;  %3063 = vmatprep.subr.bf16.mxu1 %v3130_v48 }
 0x186   : > { %v981_v50 = vpack.c.bf16 %v820_v43, %v819_v25  ;;  %v3183_v22 = vpop.eup %3182  ;;  %2968 = vmatpush3.bf16.msra.mxu0 %v3130_v48  ;;  %3071 = vmatpush3.bf16.msra.mxu1 %v3130_v48 }
 0x187   : > { %1309 = vmatmul.mubr.bf16.gmra.mrb[28].mxu1 %v980_v52  ;;  %v3185_v45 = vpop.eup %3184  ;;  %v822_v32 = vmul.f32 %v3183_v22, %v3846_v35  ;;  %2969 = vmatprep.subr.bf16.mxu0 %v3131_v10  ;;  %v3133_v35 = vld [vmem:[%s4459_s6 + $0x18] sm:$0xff]  }
 0x188   : > { %1316 = vmatprep.mubr.bf16.mxu1 %v3122_v0  ;;  %v821_v61 = vmul.f32 %v3185_v45, %v3841_v21  ;;  %3064 = vmatprep.subr.bf16.mxu1 %v3131_v10  ;;  %v3132_v21 = vld [vmem:[%s4459_s6 + $0x10] sm:$0xff]  }
 0x18a   : > { %v982_v40 = vpack.c.bf16 %v822_v32, %v821_v61  ;;  %2970 = vmatpush3.bf16.msra.mxu0 %v3131_v10  ;;  %3072 = vmatpush3.bf16.msra.mxu1 %v3131_v10 }
 0x18b   : > { %v3944_v37 = vpop.f32.mrb[0].mxu0  ;;  %2971 = vmatprep.subr.bf16.mxu0 %v3132_v21  ;;  %3065 = vmatprep.subr.bf16.mxu1 %v3132_v21 }
 0x18c   : > { %v2965_v53 = vpop.f32.mrb[1].mxu0 }
 0x18e   : > { %2972 = vmatpush3.bf16.msra.mxu0 %v3132_v21  ;;  %3073 = vmatpush3.bf16.msra.mxu1 %v3132_v21 }
 0x18f   : > { %1317 = vmatmul.mubr.bf16.gmra.mrb[32].mxu1 %v981_v50  ;;  %2973 = vmatprep.subr.bf16.mxu0 %v3133_v35 }
 0x190   : > { %1324 = vmatprep.mubr.bf16.mxu1 %v3123_v29  ;;  %3066 = vmatprep.subr.bf16.mxu1 %v3133_v35 }
 0x192   : > { %2974 = vmatpush3.bf16.msra.mxu0 %v3133_v35  ;;  %3074 = vmatpush3.bf16.msra.mxu1 %v3133_v35  ;;  %v3125_v35 = vld [vmem:[%s3580_s22 + $0x58] sm:$0xff]  }
 0x193   : > { %2975 = vmatprep.subr.bf16.mxu0 %v3134_v31  ;;  %3067 = vmatprep.subr.bf16.mxu1 %v3134_v31 }
 0x196   : > { %2976 = vmatpush3.bf16.msra.mxu0 %v3134_v31  ;;  %3075 = vmatpush3.bf16.msra.mxu1 %v3134_v31 }
 0x197   : > { %1325 = vmatmul.mubr.bf16.gmra.mrb[36].mxu1 %v982_v40  ;;  %2977 = vmatprep.subr.bf16.mxu0 %v3135_v54 }
 0x198   : > { %1332 = vmatprep.mubr.bf16.mxu1 %v3124_v6  ;;  %3068 = vmatprep.subr.bf16.mxu1 %v3135_v54  ;;  %v3970_v6 = vpop.f32.mrb[2].mxu0 }
 0x199   : > { %v2966_v10 = vpop.f32.mrb[3].mxu0 }
 0x19a   : > { %2978 = vmatpush3.bf16.msra.mxu0 %v3135_v54  ;;  %3076 = vmatpush3.bf16.msra.mxu1 %v3135_v54 }
 0x19b   : > { %2979 = vmatprep.subr.bf16.mxu0 %v3136_v13  ;;  %3069 = vmatprep.subr.bf16.mxu1 %v3136_v13 }
 0x19e   : > { %2980 = vmatpush3.bf16.msra.mxu0 %v3136_v13  ;;  %3077 = vmatpush3.bf16.msra.mxu1 %v3136_v13 }
 0x19f   : > { %2981 = vmatprep.subr.bf16.mxu0 %v3137_v7  ;;  %3070 = vmatprep.subr.bf16.mxu1 %v3137_v7 }
 0x1a2   : > { %2982 = vmatpush3.bf16.msra.mxu0 %v3137_v7  ;;  %3078 = vmatpush3.bf16.msra.mxu1 %v3137_v7 }
 0x1cf   : > { %v684_v49 = vpop.xlane.xlu0 %683 }
 0x1d0   : > { %v727_v59 = vmul.f32 0.0078125, %v684_v49 }
 0x1d2   : > { %v759_v63 = vadd.f32 1e-05, %v727_v59 }
 0x1d3   : > { %v686_v1 = vpop.xlane.xlu1 %685 }
 0x1d4   : > { %v728_v33 = vmul.f32 0.0078125, %v686_v1  ;;  %3186 = vrsqrt.f32 %v759_v63 }
 0x1d6   : > { %v760_v0 = vadd.f32 1e-05, %v728_v33 }
 0x1d7   : > { %v688_v52 = vpop.xlane.xlu0 %687 }
 0x1d8   : > { %3188 = vrsqrt.f32 %v760_v0  ;;  %v729_v20 = vmul.f32 0.0078125, %v688_v52  ;;  %v3126_v0 = vld [vmem:[%s3580_s22 + $0x60] sm:$0xff]  }
 0x1da   : > { %v761_v51 = vadd.f32 1e-05, %v729_v20 }
 0x1db   : > { %v690_v43 = vpop.xlane.xlu1 %689 }
 0x1dc   : > { %v730_v25 = vmul.f32 0.0078125, %v690_v43  ;;  %3190 = vrsqrt.f32 %v761_v51 }
 0x1de   : > { %v762_v29 = vadd.f32 1e-05, %v730_v25  ;;  %v3187_v22 = vpop.eup %3186 }
 0x1df   : > { %v692_v50 = vpop.xlane.xlu0 %691  ;;  %v823_v53 = vmul.f32 %v3187_v22, %v3855_v30 }
 0x1e0   : > { %3192 = vrsqrt.f32 %v762_v29  ;;  %v731_v45 = vmul.f32 0.0078125, %v692_v50 }
 0x1e2   : > { %v3189_v32 = vpop.eup %3188  ;;  %v763_v61 = vadd.f32 1e-05, %v731_v45 }
 0x1e3   : > { %v694_v40 = vpop.xlane.xlu1 %693  ;;  %v824_v48 = vmul.f32 %v3189_v32, %v3860_v46  ;;  %v3127_v32 = vld [vmem:[%s3580_s22 + $0x68] sm:$0xff]  }
 0x1e4   : > { %v732_v21 = vmul.f32 0.0078125, %v694_v40  ;;  %3194 = vrsqrt.f32 %v763_v61 }
 0x1e5   : > { %v983_v31 = vpack.c.bf16 %v824_v48, %v823_v53 }
 0x1e6   : > { %v764_v54 = vadd.f32 1e-05, %v732_v21  ;;  %v3191_v49 = vpop.eup %3190 }
 0x1e7   : > { %1333 = vmatmul.mubr.bf16.gmra.mrb[40].mxu1 %v983_v31  ;;  %v696_v13 = vpop.xlane.xlu0 %695  ;;  %v825_v30 = vmul.f32 %v3191_v49, %v3865_v26 }
 0x1e8   : > { %3196 = vrsqrt.f32 %v764_v54  ;;  %v733_v7 = vmul.f32 0.0078125, %v696_v13  ;;  %1340 = vmatprep.mubr.bf16.mxu1 %v3125_v35  ;;  %v3128_v13 = vld [vmem:[%s3580_s22 + $0x70] sm:$0xff]  }
 0x1ea   : > { %v3193_v59 = vpop.eup %3192  ;;  %v765_v63 = vadd.f32 1e-05, %v733_v7 }
 0x1eb   : > { %v698_v1 = vpop.xlane.xlu1 %697  ;;  %v826_v46 = vmul.f32 %v3193_v59, %v3870_v60 }
 0x1ec   : > { %v734_v33 = vmul.f32 0.0078125, %v698_v1  ;;  %3198 = vrsqrt.f32 %v765_v63 }
 0x1ed   : > { %v984_v52 = vpack.c.bf16 %v826_v46, %v825_v30  ;;  %v3129_v46 = vld [vmem:[%s3580_s22 + $0x78] sm:$0xff]  }
 0x1ee   : > { %v766_v20 = vadd.f32 1e-05, %v734_v33  ;;  %v3195_v43 = vpop.eup %3194 }
 0x1ef   : > { %1341 = vmatmul.mubr.bf16.gmra.mrb[44].mxu1 %v984_v52  ;;  %v700_v51 = vpop.xlane.xlu0 %699  ;;  %v827_v45 = vmul.f32 %v3195_v43, %v3878_v36 }
 0x1f0   : > { %3200 = vrsqrt.f32 %v766_v20  ;;  %v735_v25 = vmul.f32 0.0078125, %v700_v51  ;;  %1348 = vmatprep.mubr.bf16.mxu1 %v3126_v0  ;;  %v3476_v51 = vmov 1966171168  }
 0x1f1   : > { %v1385_v43 = vunpack.c.l.s4 %v3476_v51 }
 0x1f2   : > { %v3197_v29 = vpop.eup %3196  ;;  %v767_v50 = vadd.f32 1e-05, %v735_v25  ;;  %v1387_v25 = vlaneseq }
 0x1f3   : > { %v702_v22 = vpop.xlane.xlu1 %701  ;;  %v828_v26 = vmul.f32 %v3197_v29, %v3883_v57  ;;  %v1386_v29 = vunpack.c.0.s8 %v1385_v43 }
 0x1f4   : > { %v736_v60 = vmul.f32 0.0078125, %v702_v22  ;;  %3202 = vrsqrt.f32 %v767_v50  ;;  %v1388_v50 = vshrl.u32 %v1387_v25, 7 }
 0x1f5   : > { %v985_v61 = vpack.c.bf16 %v828_v26, %v827_v45 }
 0x1f6   : > { %v768_v40 = vadd.f32 1e-05, %v736_v60  ;;  %v3199_v48 = vpop.eup %3198  ;;  %v3994_v45 = vsub.s32 0, %v1388_v50 }
 0x1f7   : > { %1349 = vmatmul.mubr.bf16.gmra.mrb[48].mxu1 %v985_v61  ;;  %v704_v53 = vpop.xlane.xlu0 %703  ;;  %v829_v36 = vmul.f32 %v3199_v48, %v3891_v44 }
 0x1f8   : > { %3204 = vrsqrt.f32 %v768_v40  ;;  %v737_v10 = vmul.f32 0.0078125, %v704_v53  ;;  %1356 = vmatprep.mubr.bf16.mxu1 %v3127_v32 }
 0x1fa   : > { %v3201_v21 = vpop.eup %3200  ;;  %v769_v35 = vadd.f32 1e-05, %v737_v10 }
 0x1fb   : > { %v706_v31 = vpop.xlane.xlu1 %705  ;;  %v830_v57 = vmul.f32 %v3201_v21, %v3896_v62 }
 0x1fc   : > { %v738_v54 = vmul.f32 0.0078125, %v706_v31  ;;  %3206 = vrsqrt.f32 %v769_v35 }
 0x1fd   : > { %v986_v49 = vpack.c.bf16 %v830_v57, %v829_v36 }
 0x1fe   : > { %v770_v7 = vadd.f32 1e-05, %v738_v54  ;;  %v3203_v59 = vpop.eup %3202 }
 0x1ff   : > { %1357 = vmatmul.mubr.bf16.gmra.mrb[52].mxu1 %v986_v49  ;;  %v831_v1 = vmul.f32 %v3203_v59, %v3904_v42  ;;  %v3989_v42 = vsub.s32 %v1386_v29, %v1388_v50 }
 0x200   : > { %3208 = vrsqrt.f32 %v770_v7  ;;  %1364 = vmatprep.mubr.bf16.mxu1 %v3128_v13 }
 0x202   : > { %v3205_v63 = vpop.eup %3204 }
 0x203   : > { %v832_v30 = vmul.f32 %v3205_v63, %v3909_v28  ;;  %v1390_v28 = vrot.slane %v3944_v37, %v3989_v42 }
 0x205   : > { %v987_v33 = vpack.c.bf16 %v832_v30, %v831_v1  ;;  %v1406_v22 = vrot.slane %v1390_v28, %v3989_v42  ;;  %v1398_v60 = vcombine.high %v1390_v28, %v1390_v28 }
 0x206   : > { %v3207_v44 = vpop.eup %3206 }
 0x207   : > { %1365 = vmatmul.mubr.bf16.gmra.mrb[56].mxu1 %v987_v33  ;;  %v833_v0 = vmul.f32 %v3207_v44, %v3917_v55  ;;  %v3999_v55 = vld [vmem:[%s4458_s5] ss:$0 sm:$0xff]  ;;  %v1484_v32 = vrot.slane %v1406_v22, %v3994_v45  ;;  %v1420_v21 = vrot.slane %v1398_v60, %v3989_v42 }
 0x208   : > { %1372 = vmatprep.mubr.bf16.mxu1 %v3129_v46 }
 0x209   : > { %v1488_v63 = vrot.slane %v1420_v21, %v3994_v45 }
 0x20a   : > { %v3209_v62 = vpop.eup %3208 }
 0x20b   : > { %v834_v52 = vmul.f32 %v3209_v62, %v3922_v47  ;;  %v1428_v62 = vcombine.high %v1406_v22, %v1406_v22 }
 0x20d   : > { %v988_v20 = vpack.c.bf16 %v834_v52, %v833_v0 }
 0x20f   : > { %1373 = vmatmul.mubr.bf16.gmra.mrb[60].mxu1 %v988_v20 }
 0x222   : > { %v2803_v26 = vpop.f32.mrb[0].mxu1 }
 0x223   : > { %v2804_v47 = vpop.f32.mrb[1].mxu1 }
 0x224   : > { %v2805_v61 = vadd.f32 %v2804_v47, %v2803_v26  ;;  %v2806_v40 = vpop.f32.mrb[2].mxu1  ;;  %v1492_v26 = vrot.slane %v1428_v62, %v3994_v45 }
 0x225   : > { %v2807_v53 = vpop.f32.mrb[3].mxu1 }
 0x226   : > { %v1255_v48 = vadd.f32 %v2805_v61, %v3999_v55  ;;  %v2808_v10 = vadd.f32 %v2807_v53, %v2806_v40  ;;  %v1383_v40 = vcombine.high %v3944_v37, %v3944_v37 }
 0x228   : > { %v4004_v35 = vadd.f32 %v1484_v32, %v1255_v48  ;;  %v1258_v31 = vadd.f32 %v2808_v10, %v3999_v55  ;;  %v1430_v48 = vcombine.high %v1420_v21, %v1420_v21 }
 0x22a   : > { %v1593_v36 = vsub.f32 0.0, %v4004_v35  ;;  %v4008_v57 = vadd.f32 %v1484_v32, %v1258_v31  ;;  %v2809_v54 = vpop.f32.mrb[4].mxu1 }
 0x22b   : > { %v2810_v13 = vpop.f32.mrb[5].mxu1 }
 0x22c   : > { %v1625_v49 = vmul.f32 1.442695, %v1593_v36  ;;  %v1594_v7 = vsub.f32 0.0, %v4008_v57  ;;  %v2811_v59 = vadd.f32 %v2810_v13, %v2809_v54  ;;  %v2812_v1 = vpop.f32.mrb[6].mxu1 }
 0x22d   : > { %v2813_v30 = vpop.f32.mrb[7].mxu1 }
 0x22e   : > { %3210 = vpow2.f32 %v1625_v49  ;;  %v1627_v46 = vmul.f32 1.442695, %v1594_v7  ;;  %v1263_v33 = vadd.f32 %v2811_v59, %v3999_v55  ;;  %v2814_v44 = vadd.f32 %v2813_v30, %v2812_v1 }
 0x22f   : > { %v1397_v59 = vrot.slane %v1383_v40, %v3989_v42 }
 0x230   : > { %3212 = vpow2.f32 %v1627_v46  ;;  %v4013_v0 = vadd.f32 %v1488_v63, %v1263_v33  ;;  %v1266_v52 = vadd.f32 %v2814_v44, %v3999_v55  ;;  %v1496_v46 = vrot.slane %v1430_v48, %v3994_v45 }
 0x232   : > { %v1595_v20 = vsub.f32 0.0, %v4013_v0  ;;  %v4017_v51 = vadd.f32 %v1488_v63, %v1266_v52  ;;  %v2815_v43 = vpop.f32.mrb[8].mxu1 }
 0x233   : > { %v2816_v25 = vpop.f32.mrb[9].mxu1 }
 0x234   : > { %v1629_v29 = vmul.f32 1.442695, %v1595_v20  ;;  %v1596_v50 = vsub.f32 0.0, %v4017_v51  ;;  %v2817_v28 = vadd.f32 %v2816_v25, %v2815_v43  ;;  %v2818_v47 = vpop.f32.mrb[10].mxu1  ;;  %v4035_v25 = vrot.slane %v1397_v59, %v3989_v42 }
 0x235   : > { %v2819_v60 = vpop.f32.mrb[11].mxu1 }
 0x236   : > { %3214 = vpow2.f32 %v1629_v29  ;;  %v1631_v22 = vmul.f32 1.442695, %v1596_v50  ;;  %v1271_v32 = vadd.f32 %v2817_v28, %v3999_v55  ;;  %v2820_v61 = vadd.f32 %v2819_v60, %v2818_v47 }
 0x238   : > { %v3211_v53 = vpop.eup %3210  ;;  %3216 = vpow2.f32 %v1631_v22  ;;  %v4024_v10 = vadd.f32 %v1492_v26, %v1271_v32  ;;  %v1274_v31 = vadd.f32 %v2820_v61, %v3999_v55  ;;  %v1399_v32 = vcombine.high %v1397_v59, %v1397_v59 }
 0x239   : > { %v1689_v36 = vadd.f32 1.0, %v3211_v53 }
 0x23a   : > { %v3213_v54 = vpop.eup %3212  ;;  %v1597_v13 = vsub.f32 0.0, %v4024_v10  ;;  %v4028_v49 = vadd.f32 %v1492_v26, %v1274_v31  ;;  %v2821_v7 = vpop.f32.mrb[12].mxu1 }
 0x23b   : > { %3218 = vrcp.f32 %v1689_v36  ;;  %v1690_v63 = vadd.f32 1.0, %v3213_v54  ;;  %v2822_v1 = vpop.f32.mrb[13].mxu1  ;;  %v1500_v36 = vrot.slane %v4035_v25, %v3994_v45 }
 0x23c   : > { %v1633_v37 = vmul.f32 1.442695, %v1597_v13  ;;  %v1598_v21 = vsub.f32 0.0, %v4028_v49  ;;  %v2823_v30 = vadd.f32 %v2822_v1, %v2821_v7  ;;  %v2824_v33 = vpop.f32.mrb[14].mxu1 }
 0x23d   : > { %3220 = vrcp.f32 %v1690_v63  ;;  %v2825_v44 = vpop.f32.mrb[15].mxu1 }
 0x23e   : > { %3222 = vpow2.f32 %v1633_v37  ;;  %v1635_v62 = vmul.f32 1.442695, %v1598_v21  ;;  %v1279_v52 = vadd.f32 %v2823_v30, %v3999_v55  ;;  %v2826_v20 = vadd.f32 %v2825_v44, %v2824_v33 }
 0x23f   : > { %v4048_v21 = vrot.slane %v1399_v32, %v3989_v42 }
 0x240   : > { %v3215_v43 = vpop.eup %3214  ;;  %3224 = vpow2.f32 %v1635_v62  ;;  %v4037_v29 = vadd.f32 %v1496_v46, %v1279_v52  ;;  %v1282_v50 = vadd.f32 %v2826_v20, %v3999_v55 }
 0x241   : > { %v1691_v28 = vadd.f32 1.0, %v3215_v43 }
 0x242   : > { %v3217_v26 = vpop.eup %3216  ;;  %v1599_v47 = vsub.f32 0.0, %v4037_v29  ;;  %v4041_v60 = vadd.f32 %v1496_v46, %v1282_v50  ;;  %v2827_v22 = vpop.f32.mrb[16].mxu1 }
 0x243   : > { %3226 = vrcp.f32 %v1691_v28  ;;  %v1692_v61 = vadd.f32 1.0, %v3217_v26  ;;  %v2828_v40 = vpop.f32.mrb[17].mxu1 }
 0x244   : > { %v1637_v53 = vmul.f32 1.442695, %v1599_v47  ;;  %v1600_v48 = vsub.f32 0.0, %v4041_v60  ;;  %v2829_v31 = vadd.f32 %v2828_v40, %v2827_v22  ;;  %v2830_v54 = vpop.f32.mrb[18].mxu1  ;;  %v1504_v40 = vrot.slane %v4048_v21, %v3994_v45 }
 0x245   : > { %v3219_v13 = vpop.eup %3218  ;;  %3228 = vrcp.f32 %v1692_v61  ;;  %v2831_v7 = vpop.f32.mrb[19].mxu1 }
 0x246   : > { %3230 = vpow2.f32 %v1637_v53  ;;  %v1639_v63 = vmul.f32 1.442695, %v1600_v48  ;;  %v1287_v1 = vadd.f32 %v2829_v31, %v3999_v55  ;;  %v2832_v37 = vadd.f32 %v2831_v7, %v2830_v54 }
 0x247   : > { %v3221_v59 = vpop.eup %3220  ;;  %v1753_v30 = vmul.f32 %v3219_v13, %v4004_v35  ;;  %v1429_v13 = vcombine.high %v4035_v25, %v4035_v25 }
 0x248   : > { %v3223_v46 = vpop.eup %3222  ;;  %3232 = vpow2.f32 %v1639_v63  ;;  %v4051_v33 = vadd.f32 %v1500_v36, %v1287_v1  ;;  %v1290_v44 = vadd.f32 %v2832_v37, %v3999_v55  ;;  %v1754_v62 = vmul.f32 %v3221_v59, %v4008_v57 }
 0x249   : > { %v1693_v52 = vadd.f32 1.0, %v3223_v46 }
 0x24a   : > { %v3225_v20 = vpop.eup %3224  ;;  %v1601_v43 = vsub.f32 0.0, %v4051_v33  ;;  %v4056_v50 = vadd.f32 %v1500_v36, %v1290_v44  ;;  %v2833_v28 = vpop.f32.mrb[20].mxu1  ;;  %v1785_v26 = vpack.c.bf16 %v1754_v62, %v1753_v30 }
 0x24b   : > { %3234 = vrcp.f32 %v1693_v52  ;;  %v1694_v47 = vadd.f32 1.0, %v3225_v20  ;;  %v2834_v22 = vpop.f32.mrb[21].mxu1 }
 0x24c   : > { %v1641_v35 = vmul.f32 1.442695, %v1601_v43  ;;  %v1602_v32 = vsub.f32 0.0, %v4056_v50  ;;  %v2835_v61 = vadd.f32 %v2834_v22, %v2833_v28  ;;  %v2836_v53 = vpop.f32.mrb[22].mxu1  ;;  %2983 = vmatprep.mubr.bf16.mxu0 %v1785_v26 }
 0x24d   : > { %v3227_v57 = vpop.eup %3226  ;;  %3236 = vrcp.f32 %v1694_v47  ;;  %v2837_v48 = vpop.f32.mrb[23].mxu1 }
 0x24e   : > { %3238 = vpow2.f32 %v1641_v35  ;;  %v1643_v31 = vmul.f32 1.442695, %v1602_v32  ;;  %v1295_v36 = vadd.f32 %v2835_v61, %v3999_v55  ;;  %v2838_v7 = vadd.f32 %v2837_v48, %v2836_v53 }
 0x24f   : > { %v3229_v54 = vpop.eup %3228  ;;  %v1755_v1 = vmul.f32 %v3227_v57, %v4013_v0 }
 0x250   : > { %v3231_v63 = vpop.eup %3230  ;;  %v1756_v37 = vmul.f32 %v3229_v54, %v4017_v51  ;;  %3240 = vpow2.f32 %v1643_v31  ;;  %v4066_v59 = vadd.f32 %v1504_v40, %v1295_v36  ;;  %v1298_v46 = vadd.f32 %v2838_v7, %v3999_v55 }
 0x251   : > { %v1695_v30 = vadd.f32 1.0, %v3231_v63  ;;  %v1508_v51 = vrot.slane %v1429_v13, %v3994_v45 }
 0x252   : > { %v3233_v44 = vpop.eup %3232  ;;  %v1603_v62 = vsub.f32 0.0, %v4066_v59  ;;  %v2839_v52 = vpop.f32.mrb[24].mxu1  ;;  %v1786_v20 = vpack.c.bf16 %v1756_v37, %v1755_v1  ;;  %v4070_v25 = vadd.f32 %v1504_v40, %v1298_v46  ;;  %v1431_v40 = vcombine.high %v4048_v21, %v4048_v21 }
 0x253   : > { %3242 = vrcp.f32 %v1695_v30  ;;  %v1696_v43 = vadd.f32 1.0, %v3233_v44  ;;  %v2840_v28 = vpop.f32.mrb[25].mxu1 }
 0x254   : > { %v1645_v26 = vmul.f32 1.442695, %v1603_v62  ;;  %v2841_v0 = vadd.f32 %v2840_v28, %v2839_v52  ;;  %v2842_v47 = vpop.f32.mrb[26].mxu1  ;;  %2984 = vmatmul.mubr.bf16.vlgmr.msra.gmra.mrb[4].mxu0 %v1786_v20  ;;  %v1604_v35 = vsub.f32 0.0, %v4070_v25  ;;  %v1439_v52 = vrot.slane %v3970_v6, %v3989_v42 }
 0x255   : > { %v3235_v22 = vpop.eup %3234  ;;  %3244 = vrcp.f32 %v1696_v43  ;;  %v2843_v32 = vpop.f32.mrb[27].mxu1 }
 0x256   : > { %3246 = vpow2.f32 %v1645_v26  ;;  %v1303_v61 = vadd.f32 %v2841_v0, %v3999_v55  ;;  %v2844_v53 = vadd.f32 %v2843_v32, %v2842_v47  ;;  %v1647_v48 = vmul.f32 1.442695, %v1604_v35 }
 0x257   : > { %v3237_v57 = vpop.eup %3236  ;;  %v1757_v13 = vmul.f32 %v3235_v22, %v4024_v10  ;;  %v4091_v32 = vrot.slane %v1439_v52, %v3989_v42 }
 0x258   : > { %v3239_v31 = vpop.eup %3238  ;;  %v4077_v36 = vadd.f32 %v1508_v51, %v1303_v61  ;;  %v1306_v54 = vadd.f32 %v2844_v53, %v3999_v55  ;;  %v1758_v7 = vmul.f32 %v3237_v57, %v4028_v49  ;;  %3248 = vpow2.f32 %v1647_v48 }
 0x259   : > { %v1697_v63 = vadd.f32 1.0, %v3239_v31  ;;  %v1512_v49 = vrot.slane %v1431_v40, %v3994_v45 }
 0x25a   : > { %v3241_v1 = vpop.eup %3240  ;;  %v1605_v37 = vsub.f32 0.0, %v4077_v36  ;;  %v4083_v30 = vadd.f32 %v1508_v51, %v1306_v54  ;;  %v2845_v46 = vpop.f32.mrb[28].mxu1  ;;  %v1787_v44 = vpack.c.bf16 %v1758_v7, %v1757_v13 }
 0x25b   : > { %3250 = vrcp.f32 %v1697_v63  ;;  %v1698_v21 = vadd.f32 1.0, %v3241_v1  ;;  %v2846_v62 = vpop.f32.mrb[29].mxu1 }
 0x25c   : > { %v1649_v20 = vmul.f32 1.442695, %v1605_v37  ;;  %v1606_v10 = vsub.f32 0.0, %v4083_v30  ;;  %v2847_v43 = vadd.f32 %v2846_v62, %v2845_v46  ;;  %v2848_v28 = vpop.f32.mrb[30].mxu1  ;;  %2987 = vmatprep.mubr.bf16.mxu0 %v1787_v44  ;;  %v1447_v37 = vcombine.high %v1439_v52, %v1439_v52 }
 0x25d   : > { %v3243_v26 = vpop.eup %3242  ;;  %3252 = vrcp.f32 %v1698_v21  ;;  %v2849_v0 = vpop.f32.mrb[31].mxu1 }
 0x25e   : > { %3254 = vpow2.f32 %v1649_v20  ;;  %v1651_v51 = vmul.f32 1.442695, %v1606_v10  ;;  %v1311_v47 = vadd.f32 %v2847_v43, %v3999_v55  ;;  %v2850_v22 = vadd.f32 %v2849_v0, %v2848_v28 }
 0x25f   : > { %v3245_v35 = vpop.eup %3244  ;;  %v1759_v61 = vmul.f32 %v3243_v26, %v4037_v29  ;;  %v1516_v29 = vrot.slane %v4091_v32, %v3994_v45  ;;  %v4106_v52 = vrot.slane %v1447_v37, %v3989_v42 }
 0x260   : > { %v3247_v53 = vpop.eup %3246  ;;  %3256 = vpow2.f32 %v1651_v51  ;;  %v4094_v57 = vadd.f32 %v1512_v49, %v1311_v47  ;;  %v1314_v48 = vadd.f32 %v2850_v22, %v3999_v55  ;;  %v1760_v40 = vmul.f32 %v3245_v35, %v4041_v60 }
 0x261   : > { %v1699_v31 = vadd.f32 1.0, %v3247_v53 }
 0x262   : > { %v1607_v54 = vsub.f32 0.0, %v4094_v57  ;;  %v4099_v13 = vadd.f32 %v1512_v49, %v1314_v48  ;;  %v2851_v7 = vpop.f32.mrb[32].mxu1  ;;  %v1788_v63 = vpack.c.bf16 %v1760_v40, %v1759_v61  ;;  %v3249_v1 = vpop.eup %3248 }
 0x263   : > { %3258 = vrcp.f32 %v1699_v31  ;;  %v2852_v46 = vpop.f32.mrb[33].mxu1  ;;  %v1700_v44 = vadd.f32 1.0, %v3249_v1 }
 0x264   : > { %v1653_v21 = vmul.f32 1.442695, %v1607_v54  ;;  %v1608_v62 = vsub.f32 0.0, %v4099_v13  ;;  %v2853_v20 = vadd.f32 %v2852_v46, %v2851_v7  ;;  %v2854_v60 = vpop.f32.mrb[34].mxu1  ;;  %2988 = vmatmul.mubr.bf16.gmra.mrb[8].mxu0 %v1788_v63 }
 0x265   : > { %v3251_v10 = vpop.eup %3250  ;;  %v2855_v43 = vpop.f32.mrb[35].mxu1  ;;  %3260 = vrcp.f32 %v1700_v44  ;;  %v1520_v44 = vrot.slane %v4106_v52, %v3994_v45 }
 0x266   : > { %v1655_v49 = vmul.f32 1.442695, %v1608_v62  ;;  %v1319_v28 = vadd.f32 %v2853_v20, %v3999_v55  ;;  %v2856_v26 = vadd.f32 %v2855_v43, %v2854_v60  ;;  %3262 = vpow2.f32 %v1653_v21 }
 0x267   : > { %v3253_v0 = vpop.eup %3252  ;;  %v1761_v51 = vmul.f32 %v3251_v10, %v4051_v33 }
 0x268   : > { %v3255_v47 = vpop.eup %3254  ;;  %3264 = vpow2.f32 %v1655_v49  ;;  %v4109_v22 = vadd.f32 %v1516_v29, %v1319_v28  ;;  %v1322_v35 = vadd.f32 %v2856_v26, %v3999_v55  ;;  %v1762_v61 = vmul.f32 %v3253_v0, %v4056_v50 }
 0x269   : > { %v1701_v53 = vadd.f32 1.0, %v3255_v47 }
 0x26a   : > { %v3257_v48 = vpop.eup %3256  ;;  %v1609_v40 = vsub.f32 0.0, %v4109_v22  ;;  %v4114_v31 = vadd.f32 %v1516_v29, %v1322_v35  ;;  %v2857_v54 = vpop.f32.mrb[36].mxu1  ;;  %v1789_v7 = vpack.c.bf16 %v1762_v61, %v1761_v51 }
 0x26b   : > { %3266 = vrcp.f32 %v1701_v53  ;;  %v1702_v63 = vadd.f32 1.0, %v3257_v48  ;;  %v2858_v1 = vpop.f32.mrb[37].mxu1 }
 0x26c   : > { %v1657_v33 = vmul.f32 1.442695, %v1609_v40  ;;  %v1610_v37 = vsub.f32 0.0, %v4114_v31  ;;  %v2859_v46 = vadd.f32 %v2858_v1, %v2857_v54  ;;  %v2860_v21 = vpop.f32.mrb[38].mxu1  ;;  %2991 = vmatprep.mubr.bf16.mxu0 %v1789_v7 }
 0x26d   : > { %v3259_v50 = vpop.eup %3258  ;;  %3268 = vrcp.f32 %v1702_v63  ;;  %v2861_v62 = vpop.f32.mrb[39].mxu1 }
 0x26e   : > { %3270 = vpow2.f32 %v1657_v33  ;;  %v1659_v29 = vmul.f32 1.442695, %v1610_v37  ;;  %v1327_v20 = vadd.f32 %v2859_v46, %v3999_v55  ;;  %v2862_v60 = vadd.f32 %v2861_v62, %v2860_v21 }
 0x26f   : > { %v3261_v10 = vpop.eup %3260  ;;  %v1763_v26 = vmul.f32 %v3259_v50, %v4066_v59 }
 0x270   : > { %3272 = vpow2.f32 %v1659_v29  ;;  %v1579_v43 = vadd.f32 %v1520_v44, %v1327_v20  ;;  %v1330_v49 = vadd.f32 %v2862_v60, %v3999_v55  ;;  %v3263_v28 = vpop.eup %3262  ;;  %v1764_v0 = vmul.f32 %v3261_v10, %v4070_v25 }
 0x271   : > { %v1703_v47 = vadd.f32 1.0, %v3263_v28 }
 0x272   : > { %v3265_v51 = vpop.eup %3264  ;;  %v1611_v35 = vsub.f32 0.0, %v1579_v43  ;;  %v1580_v61 = vadd.f32 %v1520_v44, %v1330_v49  ;;  %v1790_v48 = vpack.c.bf16 %v1764_v0, %v1763_v26 }
 0x273   : > { %v1704_v53 = vadd.f32 1.0, %v3265_v51  ;;  %3274 = vrcp.f32 %v1703_v47 }
 0x274   : > { %v1661_v40 = vmul.f32 1.442695, %v1611_v35  ;;  %v1612_v54 = vsub.f32 0.0, %v1580_v61  ;;  %2992 = vmatmul.mubr.bf16.gmra.mrb[12].mxu0 %v1790_v48 }
 0x275   : > { %v3267_v7 = vpop.eup %3266  ;;  %3276 = vrcp.f32 %v1704_v53 }
 0x276   : > { %3278 = vpow2.f32 %v1661_v40  ;;  %v1663_v63 = vmul.f32 1.442695, %v1612_v54  ;;  %v1765_v59 = vmul.f32 %v3267_v7, %v4077_v36  ;;  %v3138_v40 = vld [vmem:[%s4461_s8] sm:$0xff]  }
 0x277   : > { %v3269_v1 = vpop.eup %3268  ;;  %3015 = vmatprep.subr.bf16.mxu0 %v3138_v40 }
 0x278   : > { %v3271_v33 = vpop.eup %3270  ;;  %3280 = vpow2.f32 %v1663_v63  ;;  %v1766_v25 = vmul.f32 %v3269_v1, %v4083_v30  ;;  %3016 = vmatpush3.bf16.msra.mxu0 %v3138_v40 }
 0x279   : > { %v1705_v37 = vadd.f32 1.0, %v3271_v33 }
 0x27a   : > { %v3273_v46 = vpop.eup %3272  ;;  %v1791_v44 = vpack.c.bf16 %v1766_v25, %v1765_v59  ;;  %v3142_v59 = vld [vmem:[%s4461_s8 + $0x20] sm:$0xff]  }
 0x27b   : > { %3282 = vrcp.f32 %v1705_v37  ;;  %v1706_v21 = vadd.f32 1.0, %v3273_v46 }
 0x27c   : > { %2995 = vmatprep.mubr.bf16.mxu0 %v1791_v44 }
 0x27d   : > { %3284 = vrcp.f32 %v1706_v21  ;;  %v3275_v50 = vpop.eup %3274  ;;  %v1432_v21 = vcombine.high %v3970_v6, %v3970_v6 }
 0x27e   : > { %v1767_v20 = vmul.f32 %v3275_v50, %v4094_v57  ;;  %v1479_v50 = vcombine.high %v4106_v52, %v4106_v52 }
 0x27f   : > { %v3277_v62 = vpop.eup %3276  ;;  %v1446_v6 = vrot.slane %v1432_v21, %v3989_v42 }
 0x280   : > { %v3279_v29 = vpop.eup %3278  ;;  %v1768_v60 = vmul.f32 %v3277_v62, %v4099_v13  ;;  %v3143_v62 = vld [vmem:[%s4461_s8 + $0x28] sm:$0xff]   ;;  %v1528_v52 = vrot.slane %v1479_v50, %v3994_v45 }
 0x281   : > { %v1707_v10 = vadd.f32 1.0, %v3279_v29 }
 0x282   : > { %v3281_v49 = vpop.eup %3280  ;;  %v1792_v28 = vpack.c.bf16 %v1768_v60, %v1767_v20 }
 0x283   : > { %3286 = vrcp.f32 %v1707_v10  ;;  %v1708_v36 = vadd.f32 1.0, %v3281_v49 }
 0x284   : > { %2996 = vmatmul.mubr.bf16.gmra.mrb[16].mxu0 %v1792_v28 }
 0x285   : > { %v3283_v30 = vpop.eup %3282  ;;  %3288 = vrcp.f32 %v1708_v36 }
 0x286   : > { %v1769_v0 = vmul.f32 %v3283_v30, %v4109_v22  ;;  %v3139_v22 = vld [vmem:[%s4461_s8 + $0x8] sm:$0xff]  }
 0x287   : > { %v3285_v26 = vpop.eup %3284  ;;  %3017 = vmatprep.subr.bf16.mxu0 %v3139_v22 }
 0x288   : > { %v1770_v51 = vmul.f32 %v3285_v26, %v4114_v31  ;;  %3018 = vmatpush3.bf16.msra.mxu0 %v3139_v22  ;;  %v3140_v31 = vld [vmem:[%s4461_s8 + $0x10] sm:$0xff]  }
 0x289   : > { %3019 = vmatprep.subr.bf16.mxu0 %v3140_v31 }
 0x28a   : > { %v1793_v47 = vpack.c.bf16 %v1770_v51, %v1769_v0  ;;  %v3144_v0 = vld [vmem:[%s4461_s8 + $0x30] sm:$0xff]  }
 0x28c   : > { %2999 = vmatprep.mubr.bf16.mxu0 %v1793_v47  ;;  %3020 = vmatpush3.bf16.msra.mxu0 %v3140_v31  ;;  %v3145_v31 = vld [vmem:[%s4461_s8 + $0x38] sm:$0xff]  }
 0x28d   : > { %v3287_v35 = vpop.eup %3286 }
 0x28e   : > { %v1771_v57 = vmul.f32 %v3287_v35, %v1579_v43  ;;  %v3141_v43 = vld [vmem:[%s4461_s8 + $0x18] sm:$0xff]  }
 0x28f   : > { %v3289_v53 = vpop.eup %3288  ;;  %3021 = vmatprep.subr.bf16.mxu0 %v3141_v43 }
 0x290   : > { %v1772_v48 = vmul.f32 %v3289_v53, %v1580_v61  ;;  %v1477_v61 = vcombine.high %v4091_v32, %v4091_v32  ;;  %3022 = vmatpush3.bf16.msra.mxu0 %v3141_v43 }
 0x291   : > { %3023 = vmatprep.subr.bf16.mxu0 %v3142_v59 }
 0x292   : > { %v1794_v13 = vpack.c.bf16 %v1772_v48, %v1771_v57  ;;  %v1524_v37 = vrot.slane %v1477_v61, %v3994_v45  ;;  %v4172_v48 = vrot.slane %v1446_v6, %v3989_v42 }
 0x294   : > { %3000 = vmatmul.mubr.bf16.gmra.mrb[20].mxu0 %v1794_v13 }
 0x295   : > { %3024 = vmatpush3.bf16.msra.mxu0 %v3142_v59 }
 0x296   : > { %3025 = vmatprep.subr.bf16.mxu0 %v3143_v62 }
 0x299   : > { %3026 = vmatpush3.bf16.msra.mxu0 %v3143_v62 }
 0x29a   : > { %3027 = vmatprep.subr.bf16.mxu0 %v3144_v0 }
 0x29d   : > { %3028 = vmatpush3.bf16.msra.mxu0 %v3144_v0 }
 0x29e   : > { %3029 = vmatprep.subr.bf16.mxu0 %v3145_v31 }
 0x2a1   : > { %3030 = vmatpush3.bf16.msra.mxu0 %v3145_v31 }
 0x2ba   : > { %v2863_v54 = vpop.f32.mrb[40].mxu1 }
 0x2bb   : > { %v2864_v7 = vpop.f32.mrb[41].mxu1 }
 0x2bc   : > { %v2865_v63 = vadd.f32 %v2864_v7, %v2863_v54  ;;  %v2866_v1 = vpop.f32.mrb[42].mxu1 }
 0x2bd   : > { %v2867_v33 = vpop.f32.mrb[43].mxu1 }
 0x2be   : > { %v1335_v25 = vadd.f32 %v2865_v63, %v3999_v55  ;;  %v2868_v46 = vadd.f32 %v2867_v33, %v2866_v1  ;;  %v1448_v1 = vcombine.high %v1446_v6, %v1446_v6  ;;  %v1532_v33 = vrot.slane %v4172_v48, %v3994_v45 }
 0x2c0   : > { %v4148_v44 = vadd.f32 %v1524_v37, %v1335_v25  ;;  %v1338_v32 = vadd.f32 %v2868_v46, %v3999_v55  ;;  %v4188_v62 = vrot.slane %v1448_v1, %v3989_v42 }
 0x2c2   : > { %v1613_v29 = vsub.f32 0.0, %v4148_v44  ;;  %v4159_v20 = vadd.f32 %v1524_v37, %v1338_v32  ;;  %v2869_v60 = vpop.f32.mrb[44].mxu1  ;;  %v1536_v42 = vrot.slane %v4188_v62, %v3994_v45 }
 0x2c3   : > { %v2870_v10 = vpop.f32.mrb[45].mxu1 }
 0x2c4   : > { %v1665_v49 = vmul.f32 1.442695, %v1613_v29  ;;  %v1614_v28 = vsub.f32 0.0, %v4159_v20  ;;  %v2871_v36 = vadd.f32 %v2870_v10, %v2869_v60  ;;  %v2872_v30 = vpop.f32.mrb[46].mxu1 }
 0x2c5   : > { %v2873_v26 = vpop.f32.mrb[47].mxu1 }
 0x2c6   : > { %3290 = vpow2.f32 %v1665_v49  ;;  %v1667_v51 = vmul.f32 1.442695, %v1614_v28  ;;  %v1343_v47 = vadd.f32 %v2871_v36, %v3999_v55  ;;  %v2874_v35 = vadd.f32 %v2873_v26, %v2872_v30 }
 0x2c8   : > { %3292 = vpow2.f32 %v1667_v51  ;;  %v4168_v53 = vadd.f32 %v1528_v52, %v1343_v47  ;;  %v1346_v57 = vadd.f32 %v2874_v35, %v3999_v55 }
 0x2ca   : > { %v1615_v13 = vsub.f32 0.0, %v4168_v53  ;;  %v4175_v40 = vadd.f32 %v1528_v52, %v1346_v57  ;;  %v2875_v22 = vpop.f32.mrb[48].mxu1 }
 0x2cb   : > { %v2876_v43 = vpop.f32.mrb[49].mxu1 }
 0x2cc   : > { %v1669_v61 = vmul.f32 1.442695, %v1615_v13  ;;  %v1616_v54 = vsub.f32 0.0, %v4175_v40  ;;  %v2877_v7 = vadd.f32 %v2876_v43, %v2875_v22  ;;  %v2878_v63 = vpop.f32.mrb[50].mxu1  ;;  %v1478_v43 = vcombine.high %v4172_v48, %v4172_v48 }
 0x2cd   : > { %v2879_v59 = vpop.f32.mrb[51].mxu1 }
 0x2ce   : > { %3294 = vpow2.f32 %v1669_v61  ;;  %v1671_v25 = vmul.f32 1.442695, %v1616_v54  ;;  %v1351_v37 = vadd.f32 %v2877_v7, %v3999_v55  ;;  %v2880_v46 = vadd.f32 %v2879_v59, %v2878_v63 }
 0x2d0   : > { %v3291_v32 = vpop.eup %3290  ;;  %3296 = vpow2.f32 %v1671_v25  ;;  %v4184_v21 = vadd.f32 %v1532_v33, %v1351_v37  ;;  %v1354_v50 = vadd.f32 %v2880_v46, %v3999_v55 }
 0x2d1   : > { %v1709_v29 = vadd.f32 1.0, %v3291_v32 }
 0x2d2   : > { %v3293_v60 = vpop.eup %3292  ;;  %v1617_v10 = vsub.f32 0.0, %v4184_v21  ;;  %v4191_v49 = vadd.f32 %v1532_v33, %v1354_v50  ;;  %v2881_v28 = vpop.f32.mrb[52].mxu1 }
 0x2d3   : > { %3298 = vrcp.f32 %v1709_v29  ;;  %v1710_v36 = vadd.f32 1.0, %v3293_v60  ;;  %v2882_v30 = vpop.f32.mrb[53].mxu1  ;;  %v1540_v29 = vrot.slane %v1478_v43, %v3994_v45 }
 0x2d4   : > { %v1673_v6 = vmul.f32 1.442695, %v1617_v10  ;;  %v1618_v52 = vsub.f32 0.0, %v4191_v49  ;;  %v2883_v26 = vadd.f32 %v2882_v30, %v2881_v28  ;;  %v2884_v0 = vpop.f32.mrb[54].mxu1 }
 0x2d5   : > { %3300 = vrcp.f32 %v1710_v36  ;;  %v2885_v51 = vpop.f32.mrb[55].mxu1 }
 0x2d6   : > { %3302 = vpow2.f32 %v1673_v6  ;;  %v1675_v47 = vmul.f32 1.442695, %v1618_v52  ;;  %v1359_v35 = vadd.f32 %v2883_v26, %v3999_v55  ;;  %v2886_v57 = vadd.f32 %v2885_v51, %v2884_v0 }
 0x2d7   : > { %v1480_v51 = vcombine.high %v4188_v62, %v4188_v62 }
 0x2d8   : > { %v3295_v13 = vpop.eup %3294  ;;  %3304 = vpow2.f32 %v1675_v47  ;;  %v4197_v22 = vadd.f32 %v1536_v42, %v1359_v35  ;;  %v1362_v31 = vadd.f32 %v2886_v57, %v3999_v55 }
 0x2d9   : > { %v1711_v61 = vadd.f32 1.0, %v3295_v13  ;;  %v1544_v62 = vrot.slane %v1480_v51, %v3994_v45 }
 0x2da   : > { %v3297_v54 = vpop.eup %3296  ;;  %v1619_v7 = vsub.f32 0.0, %v4197_v22  ;;  %v4203_v63 = vadd.f32 %v1536_v42, %v1362_v31  ;;  %v2887_v1 = vpop.f32.mrb[56].mxu1 }
 0x2db   : > { %3306 = vrcp.f32 %v1711_v61  ;;  %v1712_v33 = vadd.f32 1.0, %v3297_v54  ;;  %v2888_v59 = vpop.f32.mrb[57].mxu1 }
 0x2dc   : > { %v1677_v25 = vmul.f32 1.442695, %v1619_v7  ;;  %v1620_v37 = vsub.f32 0.0, %v4203_v63  ;;  %v2889_v46 = vadd.f32 %v2888_v59, %v2887_v1  ;;  %v2890_v32 = vpop.f32.mrb[58].mxu1 }
 0x2dd   : > { %v3299_v50 = vpop.eup %3298  ;;  %3308 = vrcp.f32 %v1712_v33  ;;  %v2891_v48 = vpop.f32.mrb[59].mxu1 }
 0x2de   : > { %3310 = vpow2.f32 %v1677_v25  ;;  %v1679_v60 = vmul.f32 1.442695, %v1620_v37  ;;  %v1367_v10 = vadd.f32 %v2889_v46, %v3999_v55  ;;  %v2892_v28 = vadd.f32 %v2891_v48, %v2890_v32 }
 0x2df   : > { %v3301_v36 = vpop.eup %3300  ;;  %v1773_v30 = vmul.f32 %v3299_v50, %v4148_v44 }
 0x2e0   : > { %v3303_v6 = vpop.eup %3302  ;;  %3312 = vpow2.f32 %v1679_v60  ;;  %v4209_v52 = vadd.f32 %v1540_v29, %v1367_v10  ;;  %v1370_v26 = vadd.f32 %v2892_v28, %v3999_v55  ;;  %v1774_v0 = vmul.f32 %v3301_v36, %v4159_v20 }
 0x2e1   : > { %v1713_v42 = vadd.f32 1.0, %v3303_v6 }
 0x2e2   : > { %v3305_v47 = vpop.eup %3304  ;;  %v1621_v35 = vsub.f32 0.0, %v4209_v52  ;;  %v4216_v57 = vadd.f32 %v1540_v29, %v1370_v26  ;;  %v2893_v13 = vpop.f32.mrb[60].mxu1  ;;  %v1795_v31 = vpack.c.bf16 %v1774_v0, %v1773_v30 }
 0x2e3   : > { %3314 = vrcp.f32 %v1713_v42  ;;  %v1714_v44 = vadd.f32 1.0, %v3305_v47  ;;  %v2894_v43 = vpop.f32.mrb[61].mxu1 }
 0x2e4   : > { %v1681_v61 = vmul.f32 1.442695, %v1621_v35  ;;  %v1622_v54 = vsub.f32 0.0, %v4216_v57  ;;  %v2895_v7 = vadd.f32 %v2894_v43, %v2893_v13  ;;  %v2896_v1 = vpop.f32.mrb[62].mxu1  ;;  %3003 = vmatprep.mubr.bf16.mxu0 %v1795_v31 }
 0x2e5   : > { %v3307_v20 = vpop.eup %3306  ;;  %3316 = vrcp.f32 %v1714_v44  ;;  %v2897_v33 = vpop.f32.mrb[63].mxu1 }
 0x2e6   : > { %3318 = vpow2.f32 %v1681_v61  ;;  %v1683_v59 = vmul.f32 1.442695, %v1622_v54  ;;  %v1375_v25 = vadd.f32 %v2895_v7, %v3999_v55  ;;  %v2898_v37 = vadd.f32 %v2897_v33, %v2896_v1 }
 0x2e7   : > { %v3309_v46 = vpop.eup %3308  ;;  %v1775_v32 = vmul.f32 %v3307_v20, %v4168_v53 }
 0x2e8   : > { %v3311_v50 = vpop.eup %3310  ;;  %3320 = vpow2.f32 %v1683_v59  ;;  %v1591_v29 = vadd.f32 %v1544_v62, %v1375_v25  ;;  %v1378_v48 = vadd.f32 %v2898_v37, %v3999_v55  ;;  %v1776_v60 = vmul.f32 %v3309_v46, %v4175_v40 }
 0x2e9   : > { %v1715_v10 = vadd.f32 1.0, %v3311_v50 }
 0x2ea   : > { %v3313_v28 = vpop.eup %3312  ;;  %v1623_v36 = vsub.f32 0.0, %v1591_v29  ;;  %v1592_v45 = vadd.f32 %v1544_v62, %v1378_v48  ;;  %v1796_v30 = vpack.c.bf16 %v1776_v60, %v1775_v32  ;;  %v4233_v60 = vld [vmem:[%s4460_s7] ss:$0 sm:$0xff] }
 0x2eb   : > { %3322 = vrcp.f32 %v1715_v10  ;;  %v1716_v6 = vadd.f32 1.0, %v3313_v28 }
 0x2ec   : > { %v1685_v26 = vmul.f32 1.442695, %v1623_v36  ;;  %v1624_v0 = vsub.f32 0.0, %v1592_v45  ;;  %3004 = vmatmul.mubr.bf16.gmra.mrb[24].mxu0 %v1796_v30 }
 0x2ed   : > { %v3315_v42 = vpop.eup %3314  ;;  %3324 = vrcp.f32 %v1716_v6 }
 0x2ee   : > { %3326 = vpow2.f32 %v1685_v26  ;;  %v1687_v53 = vmul.f32 1.442695, %v1624_v0  ;;  %v1777_v55 = vmul.f32 %v3315_v42, %v4184_v21 }
 0x2ef   : > { %v3317_v51 = vpop.eup %3316 }
 0x2f0   : > { %v3319_v47 = vpop.eup %3318  ;;  %3328 = vpow2.f32 %v1687_v53  ;;  %v1778_v40 = vmul.f32 %v3317_v51, %v4191_v49 }
 0x2f1   : > { %v1717_v35 = vadd.f32 1.0, %v3319_v47 }
 0x2f2   : > { %v3321_v13 = vpop.eup %3320  ;;  %v1797_v31 = vpack.c.bf16 %v1778_v40, %v1777_v55 }
 0x2f3   : > { %3330 = vrcp.f32 %v1717_v35  ;;  %v1718_v44 = vadd.f32 1.0, %v3321_v13 }
 0x2f4   : > { %3007 = vmatprep.mubr.bf16.mxu1 %v1797_v31 }
 0x2f5   : > { %v3323_v43 = vpop.eup %3322  ;;  %3332 = vrcp.f32 %v1718_v44 }
 0x2f6   : > { %v1779_v7 = vmul.f32 %v3323_v43, %v4197_v22 }
 0x2f7   : > { %v3325_v61 = vpop.eup %3324 }
 0x2f8   : > { %v3327_v54 = vpop.eup %3326  ;;  %v1780_v1 = vmul.f32 %v3325_v61, %v4203_v63 }
 0x2f9   : > { %v1719_v20 = vadd.f32 1.0, %v3327_v54 }
 0x2fa   : > { %v3329_v62 = vpop.eup %3328  ;;  %v1798_v33 = vpack.c.bf16 %v1780_v1, %v1779_v7 }
 0x2fb   : > { %3334 = vrcp.f32 %v1719_v20  ;;  %v1720_v21 = vadd.f32 1.0, %v3329_v62 }
 0x2fc   : > { %3008 = vmatmul.mubr.bf16.vlgmr.msra.gmra.mrb[64].mxu1 %v1798_v33 }
 0x2fd   : > { %v3331_v49 = vpop.eup %3330  ;;  %3336 = vrcp.f32 %v1720_v21 }
 0x2fe   : > { %v1781_v25 = vmul.f32 %v3331_v49, %v4209_v52 }
 0x2ff   : > { %v3333_v59 = vpop.eup %3332 }
 0x300   : > { %v1782_v37 = vmul.f32 %v3333_v59, %v4216_v57 }
 0x302   : > { %v1799_v46 = vpack.c.bf16 %v1782_v37, %v1781_v25 }
 0x304   : > { %3011 = vmatprep.mubr.bf16.mxu1 %v1799_v46 }
 0x305   : > { %v3335_v32 = vpop.eup %3334 }
 0x306   : > { %v1783_v22 = vmul.f32 %v3335_v32, %v1591_v29 }
 0x307   : > { %v3337_v50 = vpop.eup %3336 }
 0x308   : > { %v1784_v48 = vmul.f32 %v3337_v50, %v1592_v45 }
 0x30a   : > { %v1800_v63 = vpack.c.bf16 %v1784_v48, %v1783_v22 }
 0x30c   : > { %3012 = vmatmul.mubr.bf16.gmra.mrb[68].mxu1 %v1800_v63 }
 0x327   : > { %v2985_v10 = vpop.f32.mrb[4].mxu0 }
 0x328   : > { %v1915_v28 = vadd.f32 %v2985_v10, %v4233_v60  ;;  %v1906_v36 = vpop.f32.mrb[5].mxu0 }
 0x329   : > { %v1907_v52 = vadd.f32 %v4233_v60, %v1906_v36  ;;  %v2986_v57 = vpop.f32.mrb[6].mxu0 }
 0x32a   : > { %v2035_v30 = vsub.f32 0.0, %v1915_v28  ;;  %v1918_v6 = vadd.f32 %v2986_v57, %v4233_v60  ;;  %v1909_v26 = vpop.f32.mrb[7].mxu0 }
 0x32b   : > { %v2033_v29 = vsub.f32 0.0, %v1907_v52  ;;  %v1910_v45 = vadd.f32 %v4233_v60, %v1909_v26 }
 0x32c   : > { %v2069_v0 = vmul.f32 1.442695, %v2035_v30  ;;  %v2036_v42 = vsub.f32 0.0, %v1918_v6 }
 0x32d   : > { %v2065_v53 = vmul.f32 1.442695, %v2033_v29  ;;  %v2034_v51 = vsub.f32 0.0, %v1910_v45 }
 0x32e   : > { %3338 = vpow2.f32 %v2069_v0  ;;  %v2071_v47 = vmul.f32 1.442695, %v2036_v42 }
 0x32f   : > { %3340 = vpow2.f32 %v2065_v53  ;;  %v2067_v55 = vmul.f32 1.442695, %v2034_v51 }
 0x330   : > { %3342 = vpow2.f32 %v2071_v47 }
 0x331   : > { %3344 = vpow2.f32 %v2067_v55 }
 0x337   : > { %v2989_v40 = vpop.f32.mrb[8].mxu0 }
 0x338   : > { %v3339_v35 = vpop.eup %3338  ;;  %v4240_v13 = vadd.f32 %v2989_v40, %v4233_v60  ;;  %v1922_v31 = vpop.f32.mrb[9].mxu0 }
 0x339   : > { %v3341_v44 = vpop.eup %3340  ;;  %v2131_v43 = vadd.f32 1.0, %v3339_v35  ;;  %v4243_v61 = vadd.f32 %v4233_v60, %v1922_v31  ;;  %v2990_v54 = vpop.f32.mrb[10].mxu0 }
 0x33a   : > { %v3343_v7 = vpop.eup %3342  ;;  %v2129_v1 = vadd.f32 1.0, %v3341_v44  ;;  %v2039_v20 = vsub.f32 0.0, %v4240_v13  ;;  %v4247_v62 = vadd.f32 %v2990_v54, %v4233_v60  ;;  %v1925_v33 = vpop.f32.mrb[11].mxu0 }
 0x33b   : > { %v3345_v21 = vpop.eup %3344  ;;  %3346 = vrcp.f32 %v2131_v43  ;;  %v2132_v49 = vadd.f32 1.0, %v3343_v7  ;;  %v2037_v59 = vsub.f32 0.0, %v4243_v61  ;;  %v4251_v25 = vadd.f32 %v4233_v60, %v1925_v33 }
 0x33c   : > { %3348 = vrcp.f32 %v2129_v1  ;;  %v2130_v37 = vadd.f32 1.0, %v3345_v21  ;;  %v2077_v46 = vmul.f32 1.442695, %v2039_v20  ;;  %v2040_v32 = vsub.f32 0.0, %v4247_v62 }
 0x33d   : > { %3350 = vrcp.f32 %v2132_v49  ;;  %v2073_v50 = vmul.f32 1.442695, %v2037_v59  ;;  %v2038_v22 = vsub.f32 0.0, %v4251_v25 }
 0x33e   : > { %3352 = vrcp.f32 %v2130_v37  ;;  %v2079_v48 = vmul.f32 1.442695, %v2040_v32 }
 0x33f   : > { %3354 = vpow2.f32 %v2077_v46  ;;  %v2075_v63 = vmul.f32 1.442695, %v2038_v22 }
 0x340   : > { %3356 = vpow2.f32 %v2073_v50 }
 0x341   : > { %3358 = vpow2.f32 %v2079_v48 }
 0x342   : > { %3360 = vpow2.f32 %v2075_v63 }
 0x345   : > { %v3347_v10 = vpop.eup %3346 }
 0x346   : > { %v3349_v36 = vpop.eup %3348  ;;  %v2195_v26 = vmul.f32 %v3347_v10, %v1915_v28 }
 0x347   : > { %v3351_v57 = vpop.eup %3350  ;;  %v2993_v0 = vpop.f32.mrb[12].mxu0  ;;  %v2193_v53 = vmul.f32 %v3349_v36, %v1907_v52 }
 0x348   : > { %v3353_v30 = vpop.eup %3352  ;;  %v2196_v29 = vmul.f32 %v3351_v57, %v1918_v6  ;;  %v4256_v47 = vadd.f32 %v2993_v0, %v4233_v60  ;;  %v1938_v55 = vpop.f32.mrb[13].mxu0 }
 0x349   : > { %v3355_v42 = vpop.eup %3354  ;;  %v2194_v51 = vmul.f32 %v3353_v30, %v1910_v45  ;;  %v4259_v44 = vadd.f32 %v4233_v60, %v1938_v55  ;;  %v2994_v43 = vpop.f32.mrb[14].mxu0 }
 0x34a   : > { %v3357_v40 = vpop.eup %3356  ;;  %v2226_v35 = vpack.c.bf16 %v2196_v29, %v2195_v26  ;;  %v2135_v31 = vadd.f32 1.0, %v3355_v42  ;;  %v2043_v28 = vsub.f32 0.0, %v4256_v47  ;;  %v4263_v6 = vadd.f32 %v2994_v43, %v4233_v60  ;;  %v1941_v52 = vpop.f32.mrb[15].mxu0 }
 0x34b   : > { %v3359_v54 = vpop.eup %3358  ;;  %v2133_v7 = vadd.f32 1.0, %v3357_v40  ;;  %v2225_v45 = vpack.c.bf16 %v2194_v51, %v2193_v53  ;;  %v2041_v33 = vsub.f32 0.0, %v4259_v44  ;;  %v4267_v21 = vadd.f32 %v4233_v60, %v1941_v52 }
 0x34c   : > { %v3361_v1 = vpop.eup %3360  ;;  %3362 = vrcp.f32 %v2135_v31  ;;  %v2136_v20 = vadd.f32 1.0, %v3359_v54  ;;  %v2085_v59 = vmul.f32 1.442695, %v2043_v28  ;;  %v2044_v37 = vsub.f32 0.0, %v4263_v6 }
 0x34d   : > { %3364 = vrcp.f32 %v2133_v7  ;;  %v2134_v49 = vadd.f32 1.0, %v3361_v1  ;;  %3031 = vmatprep.mubr.bf16.mxu0 %v2225_v45  ;;  %v2081_v46 = vmul.f32 1.442695, %v2041_v33  ;;  %v2042_v32 = vsub.f32 0.0, %v4267_v21 }
 0x34e   : > { %3366 = vrcp.f32 %v2136_v20  ;;  %3032 = vmatmul.mubr.bf16.vlgmr.msra.gmra.mrb[28].mxu0 %v2226_v35  ;;  %v2087_v50 = vmul.f32 1.442695, %v2044_v37 }
 0x34f   : > { %3368 = vrcp.f32 %v2134_v49  ;;  %v2083_v22 = vmul.f32 1.442695, %v2042_v32 }
 0x350   : > { %3370 = vpow2.f32 %v2085_v59 }
 0x351   : > { %3372 = vpow2.f32 %v2081_v46 }
 0x352   : > { %3374 = vpow2.f32 %v2087_v50 }
 0x353   : > { %3376 = vpow2.f32 %v2083_v22 }
 0x356   : > { %v3363_v48 = vpop.eup %3362 }
 0x357   : > { %v3365_v63 = vpop.eup %3364  ;;  %v2997_v10 = vpop.f32.mrb[16].mxu0  ;;  %v2199_v29 = vmul.f32 %v3363_v48, %v4240_v13 }
 0x358   : > { %v3367_v36 = vpop.eup %3366  ;;  %v4272_v57 = vadd.f32 %v2997_v10, %v4233_v60  ;;  %v1954_v30 = vpop.f32.mrb[17].mxu0  ;;  %v2197_v55 = vmul.f32 %v3365_v63, %v4243_v61 }
 0x359   : > { %v3369_v26 = vpop.eup %3368  ;;  %v2200_v0 = vmul.f32 %v3367_v36, %v4247_v62  ;;  %v4277_v42 = vadd.f32 %v4233_v60, %v1954_v30  ;;  %v2998_v53 = vpop.f32.mrb[18].mxu0 }
 0x35a   : > { %v3371_v51 = vpop.eup %3370  ;;  %v2198_v40 = vmul.f32 %v3369_v26, %v4251_v25  ;;  %v2047_v35 = vsub.f32 0.0, %v4272_v57  ;;  %v4283_v31 = vadd.f32 %v2998_v53, %v4233_v60  ;;  %v1957_v43 = vpop.f32.mrb[19].mxu0 }
 0x35b   : > { %v3373_v54 = vpop.eup %3372  ;;  %v2139_v7 = vadd.f32 1.0, %v3371_v51  ;;  %v2045_v13 = vsub.f32 0.0, %v4277_v42  ;;  %v4287_v62 = vadd.f32 %v4233_v60, %v1957_v43  ;;  %v2228_v28 = vpack.c.bf16 %v2200_v0, %v2199_v29 }
 0x35c   : > { %v3375_v52 = vpop.eup %3374  ;;  %v2137_v45 = vadd.f32 1.0, %v3373_v54  ;;  %v2048_v61 = vsub.f32 0.0, %v4283_v31  ;;  %v2227_v1 = vpack.c.bf16 %v2198_v40, %v2197_v55  ;;  %v2093_v33 = vmul.f32 1.442695, %v2047_v35 }
 0x35d   : > { %v3377_v25 = vpop.eup %3376  ;;  %3378 = vrcp.f32 %v2139_v7  ;;  %v2140_v20 = vadd.f32 1.0, %v3375_v52  ;;  %v2046_v49 = vsub.f32 0.0, %v4287_v62  ;;  %v2089_v37 = vmul.f32 1.442695, %v2045_v13 }
 0x35e   : > { %3380 = vrcp.f32 %v2137_v45  ;;  %v2138_v59 = vadd.f32 1.0, %v3377_v25  ;;  %3035 = vmatprep.mubr.bf16.mxu0 %v2227_v1  ;;  %v2095_v46 = vmul.f32 1.442695, %v2048_v61 }
 0x35f   : > { %3382 = vrcp.f32 %v2140_v20  ;;  %3036 = vmatmul.mubr.bf16.gmra.mrb[32].mxu0 %v2228_v28  ;;  %v2091_v32 = vmul.f32 1.442695, %v2046_v49 }
 0x360   : > { %3384 = vrcp.f32 %v2138_v59 }
 0x361   : > { %3386 = vpow2.f32 %v2093_v33 }
 0x362   : > { %3388 = vpow2.f32 %v2089_v37 }
 0x363   : > { %3390 = vpow2.f32 %v2095_v46 }
 0x364   : > { %3392 = vpow2.f32 %v2091_v32 }
 0x367   : > { %v3379_v50 = vpop.eup %3378  ;;  %v3001_v22 = vpop.f32.mrb[20].mxu0 }
 0x368   : > { %v3381_v48 = vpop.eup %3380  ;;  %v4292_v63 = vadd.f32 %v3001_v22, %v4233_v60  ;;  %v1970_v10 = vpop.f32.mrb[21].mxu0  ;;  %v2203_v0 = vmul.f32 %v3379_v50, %v4256_v47 }
 0x369   : > { %v3383_v36 = vpop.eup %3382  ;;  %v4295_v30 = vadd.f32 %v4233_v60, %v1970_v10  ;;  %v3002_v26 = vpop.f32.mrb[22].mxu0  ;;  %v2201_v43 = vmul.f32 %v3381_v48, %v4259_v44 }
 0x36a   : > { %v3385_v29 = vpop.eup %3384  ;;  %v2204_v53 = vmul.f32 %v3383_v36, %v4263_v6  ;;  %v2051_v51 = vsub.f32 0.0, %v4292_v63  ;;  %v1982_v55 = vadd.f32 %v3002_v26, %v4233_v60  ;;  %v1973_v40 = vpop.f32.mrb[23].mxu0 }
 0x36b   : > { %v3387_v35 = vpop.eup %3386  ;;  %v2202_v54 = vmul.f32 %v3385_v29, %v4267_v21  ;;  %v2049_v7 = vsub.f32 0.0, %v4295_v30  ;;  %v1974_v13 = vadd.f32 %v4233_v60, %v1973_v40 }
 0x36c   : > { %v3389_v28 = vpop.eup %3388  ;;  %v2143_v52 = vadd.f32 1.0, %v3387_v35  ;;  %v2052_v45 = vsub.f32 0.0, %v1982_v55  ;;  %v2230_v47 = vpack.c.bf16 %v2204_v53, %v2203_v0  ;;  %v2101_v49 = vmul.f32 1.442695, %v2051_v51 }
 0x36d   : > { %v3391_v61 = vpop.eup %3390  ;;  %v2141_v6 = vadd.f32 1.0, %v3389_v28  ;;  %v2050_v1 = vsub.f32 0.0, %v1974_v13  ;;  %v2229_v25 = vpack.c.bf16 %v2202_v54, %v2201_v43  ;;  %v2097_v59 = vmul.f32 1.442695, %v2049_v7 }
 0x36e   : > { %v3393_v20 = vpop.eup %3392  ;;  %3394 = vrcp.f32 %v2143_v52  ;;  %v2144_v33 = vadd.f32 1.0, %v3391_v61  ;;  %v2103_v21 = vmul.f32 1.442695, %v2052_v45 }
 0x36f   : > { %3396 = vrcp.f32 %v2141_v6  ;;  %v2142_v44 = vadd.f32 1.0, %v3393_v20  ;;  %3039 = vmatprep.mubr.bf16.mxu0 %v2229_v25  ;;  %v2099_v37 = vmul.f32 1.442695, %v2050_v1 }
 0x370   : > { %3398 = vrcp.f32 %v2144_v33  ;;  %3040 = vmatmul.mubr.bf16.gmra.mrb[36].mxu0 %v2230_v47 }
 0x371   : > { %3400 = vrcp.f32 %v2142_v44 }
 0x372   : > { %3402 = vpow2.f32 %v2101_v49 }
 0x373   : > { %3404 = vpow2.f32 %v2097_v59 }
 0x374   : > { %3406 = vpow2.f32 %v2103_v21 }
 0x375   : > { %3408 = vpow2.f32 %v2099_v37 }
 0x378   : > { %v3395_v46 = vpop.eup %3394 }
 0x379   : > { %v3397_v32 = vpop.eup %3396  ;;  %v2207_v48 = vmul.f32 %v3395_v46, %v4272_v57 }
 0x37a   : > { %v3399_v50 = vpop.eup %3398  ;;  %v2205_v26 = vmul.f32 %v3397_v32, %v4277_v42 }
 0x37b   : > { %v3401_v22 = vpop.eup %3400  ;;  %v2208_v10 = vmul.f32 %v3399_v50, %v4283_v31 }
 0x37c   : > { %v3403_v36 = vpop.eup %3402  ;;  %v2206_v29 = vmul.f32 %v3401_v22, %v4287_v62 }
 0x37d   : > { %v3405_v0 = vpop.eup %3404  ;;  %v2147_v53 = vadd.f32 1.0, %v3403_v36  ;;  %v2232_v51 = vpack.c.bf16 %v2208_v10, %v2207_v48 }
 0x37e   : > { %v3407_v40 = vpop.eup %3406  ;;  %v2145_v35 = vadd.f32 1.0, %v3405_v0  ;;  %v2231_v43 = vpack.c.bf16 %v2206_v29, %v2205_v26 }
 0x37f   : > { %v3409_v54 = vpop.eup %3408  ;;  %3410 = vrcp.f32 %v2147_v53  ;;  %v2148_v7 = vadd.f32 1.0, %v3407_v40 }
 0x380   : > { %3412 = vrcp.f32 %v2145_v35  ;;  %v2146_v28 = vadd.f32 1.0, %v3409_v54  ;;  %3043 = vmatprep.mubr.bf16.mxu0 %v2231_v43 }
 0x381   : > { %3414 = vrcp.f32 %v2148_v7  ;;  %3044 = vmatmul.mubr.bf16.gmra.mrb[40].mxu0 %v2232_v51 }
 0x382   : > { %3416 = vrcp.f32 %v2146_v28 }
 0x389   : > { %v3411_v57 = vpop.eup %3410 }
 0x38a   : > { %v3413_v31 = vpop.eup %3412  ;;  %v2211_v62 = vmul.f32 %v3411_v57, %v4292_v63 }
 0x38b   : > { %v3415_v42 = vpop.eup %3414  ;;  %v2209_v47 = vmul.f32 %v3413_v31, %v4295_v30 }
 0x38c   : > { %v3417_v52 = vpop.eup %3416  ;;  %v2212_v45 = vmul.f32 %v3415_v42, %v1982_v55 }
 0x38d   : > { %v2210_v61 = vmul.f32 %v3417_v52, %v1974_v13 }
 0x38e   : > { %v2234_v6 = vpack.c.bf16 %v2212_v45, %v2211_v62 }
 0x38f   : > { %v2233_v1 = vpack.c.bf16 %v2210_v61, %v2209_v47 }
 0x391   : > { %3047 = vmatprep.mubr.bf16.mxu0 %v2233_v1 }
 0x392   : > { %3048 = vmatmul.mubr.bf16.gmra.mrb[44].mxu0 %v2234_v6 }
 0x3bf   : > { %v3005_v25 = vpop.f32.mrb[24].mxu0 }
 0x3c0   : > { %v1995_v20 = vadd.f32 %v3005_v25, %v4233_v60  ;;  %v1986_v33 = vpop.f32.mrb[25].mxu0 }
 0x3c1   : > { %v1987_v49 = vadd.f32 %v4233_v60, %v1986_v33  ;;  %v3006_v44 = vpop.f32.mrb[26].mxu0 }
 0x3c2   : > { %v2055_v59 = vsub.f32 0.0, %v1995_v20  ;;  %v1998_v21 = vadd.f32 %v3006_v44, %v4233_v60  ;;  %v1989_v37 = vpop.f32.mrb[27].mxu0 }
 0x3c3   : > { %v2053_v63 = vsub.f32 0.0, %v1987_v49  ;;  %v1990_v55 = vadd.f32 %v4233_v60, %v1989_v37 }
 0x3c4   : > { %v2109_v30 = vmul.f32 1.442695, %v2055_v59  ;;  %v2056_v13 = vsub.f32 0.0, %v1998_v21 }
 0x3c5   : > { %v2105_v46 = vmul.f32 1.442695, %v2053_v63  ;;  %v2054_v32 = vsub.f32 0.0, %v1990_v55 }
 0x3c6   : > { %3418 = vpow2.f32 %v2109_v30  ;;  %v2111_v50 = vmul.f32 1.442695, %v2056_v13 }
 0x3c7   : > { %3420 = vpow2.f32 %v2105_v46  ;;  %v2107_v22 = vmul.f32 1.442695, %v2054_v32 }
 0x3c8   : > { %3422 = vpow2.f32 %v2111_v50 }
 0x3c9   : > { %3424 = vpow2.f32 %v2107_v22 }
 0x3cf   : > { %v3009_v48 = vpop.f32.mrb[64].mxu1 }
 0x3d0   : > { %v3419_v10 = vpop.eup %3418  ;;  %v4316_v36 = vadd.f32 %v3009_v48, %v4233_v60  ;;  %v2002_v26 = vpop.f32.mrb[65].mxu1 }
 0x3d1   : > { %v3421_v29 = vpop.eup %3420  ;;  %v2151_v0 = vadd.f32 1.0, %v3419_v10  ;;  %v4319_v53 = vadd.f32 %v4233_v60, %v2002_v26  ;;  %v3010_v51 = vpop.f32.mrb[66].mxu1 }
 0x3d2   : > { %v3423_v40 = vpop.eup %3422  ;;  %v2149_v35 = vadd.f32 1.0, %v3421_v29  ;;  %v2059_v43 = vsub.f32 0.0, %v4316_v36  ;;  %v4323_v54 = vadd.f32 %v3010_v51, %v4233_v60  ;;  %v2005_v7 = vpop.f32.mrb[67].mxu1 }
 0x3d3   : > { %v3425_v28 = vpop.eup %3424  ;;  %3426 = vrcp.f32 %v2151_v0  ;;  %v2152_v57 = vadd.f32 1.0, %v3423_v40  ;;  %v2057_v31 = vsub.f32 0.0, %v4319_v53  ;;  %v4327_v42 = vadd.f32 %v4233_v60, %v2005_v7 }
 0x3d4   : > { %3428 = vrcp.f32 %v2149_v35  ;;  %v2150_v52 = vadd.f32 1.0, %v3425_v28  ;;  %v2117_v62 = vmul.f32 1.442695, %v2059_v43  ;;  %v2060_v45 = vsub.f32 0.0, %v4323_v54 }
 0x3d5   : > { %3430 = vrcp.f32 %v2152_v57  ;;  %v2113_v47 = vmul.f32 1.442695, %v2057_v31  ;;  %v2058_v61 = vsub.f32 0.0, %v4327_v42 }
 0x3d6   : > { %3432 = vrcp.f32 %v2150_v52  ;;  %v2119_v6 = vmul.f32 1.442695, %v2060_v45 }
 0x3d7   : > { %3434 = vpow2.f32 %v2117_v62  ;;  %v2115_v1 = vmul.f32 1.442695, %v2058_v61 }
 0x3d8   : > { %3436 = vpow2.f32 %v2113_v47 }
 0x3d9   : > { %3438 = vpow2.f32 %v2119_v6 }
 0x3da   : > { %3440 = vpow2.f32 %v2115_v1 }
 0x3dd   : > { %v3427_v25 = vpop.eup %3426 }
 0x3de   : > { %v3429_v33 = vpop.eup %3428  ;;  %v2215_v63 = vmul.f32 %v3427_v25, %v1995_v20 }
 0x3df   : > { %v3431_v44 = vpop.eup %3430  ;;  %v3013_v59 = vpop.f32.mrb[68].mxu1  ;;  %v2213_v50 = vmul.f32 %v3429_v33, %v1987_v49 }
 0x3e0   : > { %v3433_v37 = vpop.eup %3432  ;;  %v2216_v30 = vmul.f32 %v3431_v44, %v1998_v21  ;;  %v4332_v13 = vadd.f32 %v3013_v59, %v4233_v60  ;;  %v2018_v46 = vpop.f32.mrb[69].mxu1 }
 0x3e1   : > { %v3435_v32 = vpop.eup %3434  ;;  %v2214_v22 = vmul.f32 %v3433_v37, %v1990_v55  ;;  %v2019_v48 = vadd.f32 %v4233_v60, %v2018_v46  ;;  %v3014_v10 = vpop.f32.mrb[70].mxu1 }
 0x3e2   : > { %v3437_v26 = vpop.eup %3436  ;;  %v2155_v29 = vadd.f32 1.0, %v3435_v32  ;;  %v2063_v0 = vsub.f32 0.0, %v4332_v13  ;;  %v2030_v51 = vadd.f32 %v3014_v10, %v4233_v60  ;;  %v2021_v40 = vpop.f32.mrb[71].mxu1  ;;  %v2236_v35 = vpack.c.bf16 %v2216_v30, %v2215_v63 }
 0x3e3   : > { %v3439_v20 = vpop.eup %3438  ;;  %v2153_v21 = vadd.f32 1.0, %v3437_v26  ;;  %v2061_v43 = vsub.f32 0.0, %v2019_v48  ;;  %v2022_v7 = vadd.f32 %v4233_v60, %v2021_v40  ;;  %v2235_v28 = vpack.c.bf16 %v2214_v22, %v2213_v50 }
 0x3e4   : > { %v3441_v57 = vpop.eup %3440  ;;  %3442 = vrcp.f32 %v2155_v29  ;;  %v2156_v49 = vadd.f32 1.0, %v3439_v20  ;;  %v2125_v55 = vmul.f32 1.442695, %v2063_v0  ;;  %v2064_v31 = vsub.f32 0.0, %v2030_v51 }
 0x3e5   : > { %3444 = vrcp.f32 %v2153_v21  ;;  %v2154_v52 = vadd.f32 1.0, %v3441_v57  ;;  %v2121_v62 = vmul.f32 1.442695, %v2061_v43  ;;  %v2062_v45 = vsub.f32 0.0, %v2022_v7  ;;  %3051 = vmatprep.mubr.bf16.mxu0 %v2235_v28  ;;  %v4346_v57 = vld [vmem:[%s4462_s9] ss:$0 sm:$0xff] }
 0x3e6   : > { %3446 = vrcp.f32 %v2156_v49  ;;  %v2127_v47 = vmul.f32 1.442695, %v2064_v31  ;;  %3052 = vmatmul.mubr.bf16.gmra.mrb[48].mxu0 %v2236_v35 }
 0x3e7   : > { %3448 = vrcp.f32 %v2154_v52  ;;  %v2123_v61 = vmul.f32 1.442695, %v2062_v45 }
 0x3e8   : > { %3450 = vpow2.f32 %v2125_v55 }
 0x3e9   : > { %3452 = vpow2.f32 %v2121_v62 }
 0x3ea   : > { %3454 = vpow2.f32 %v2127_v47 }
 0x3eb   : > { %3456 = vpow2.f32 %v2123_v61 }
 0x3ee   : > { %v3443_v60 = vpop.eup %3442 }
 0x3ef   : > { %v3445_v6 = vpop.eup %3444  ;;  %v2219_v33 = vmul.f32 %v3443_v60, %v4316_v36 }
 0x3f0   : > { %v3447_v1 = vpop.eup %3446  ;;  %v2217_v37 = vmul.f32 %v3445_v6, %v4319_v53 }
 0x3f1   : > { %v3449_v25 = vpop.eup %3448  ;;  %v2220_v44 = vmul.f32 %v3447_v1, %v4323_v54 }
 0x3f2   : > { %v3451_v59 = vpop.eup %3450  ;;  %v2218_v63 = vmul.f32 %v3449_v25, %v4327_v42 }
 0x3f3   : > { %v3453_v30 = vpop.eup %3452  ;;  %v2159_v46 = vadd.f32 1.0, %v3451_v59  ;;  %v2238_v32 = vpack.c.bf16 %v2220_v44, %v2219_v33 }
 0x3f4   : > { %v3455_v50 = vpop.eup %3454  ;;  %v2157_v22 = vadd.f32 1.0, %v3453_v30  ;;  %v2237_v10 = vpack.c.bf16 %v2218_v63, %v2217_v37 }
 0x3f5   : > { %v3457_v26 = vpop.eup %3456  ;;  %3458 = vrcp.f32 %v2159_v46  ;;  %v2160_v29 = vadd.f32 1.0, %v3455_v50 }
 0x3f6   : > { %3460 = vrcp.f32 %v2157_v22  ;;  %v2158_v0 = vadd.f32 1.0, %v3457_v26  ;;  %3055 = vmatprep.mubr.bf16.mxu0 %v2237_v10 }
 0x3f7   : > { %3462 = vrcp.f32 %v2160_v29  ;;  %3056 = vmatmul.mubr.bf16.gmra.mrb[52].mxu0 %v2238_v32 }
 0x3f8   : > { %3464 = vrcp.f32 %v2158_v0 }
 0x3ff   : > { %v3459_v36 = vpop.eup %3458 }
 0x400   : > { %v3461_v53 = vpop.eup %3460  ;;  %v2223_v40 = vmul.f32 %v3459_v36, %v4332_v13 }
 0x401   : > { %v3463_v54 = vpop.eup %3462  ;;  %v2221_v20 = vmul.f32 %v3461_v53, %v2019_v48 }
 0x402   : > { %v3465_v42 = vpop.eup %3464  ;;  %v2224_v35 = vmul.f32 %v3463_v54, %v2030_v51 }
 0x403   : > { %v2222_v21 = vmul.f32 %v3465_v42, %v2022_v7 }
 0x404   : > { %v2240_v43 = vpack.c.bf16 %v2224_v35, %v2223_v40  ;;  %v4482_v35 = vld [vmem:[#allocation2_spill] sm:$0xff] }
 0x405   : > { %v2239_v28 = vpack.c.bf16 %v2222_v21, %v2221_v20 }
 0x407   : > { %3059 = vmatprep.mubr.bf16.mxu0 %v2239_v28 }
 0x408   : > { %3060 = vmatmul.mubr.bf16.gmra.mrb[56].mxu0 %v2240_v43 }
 0x421   : > { %v3033_v49 = vpop.f32.mrb[28].mxu0 }
 0x422   : > { %v2355_v55 = vadd.f32 %v3033_v49, %v4346_v57  ;;  %v2346_v31 = vpop.f32.mrb[29].mxu0  ;;  %v4483_v49 = vld [vmem:[#allocation5_spill] sm:$0xff] }
 0x423   : > { %v2347_v13 = vadd.f32 %v4346_v57, %v2346_v31  ;;  %v3034_v48 = vpop.f32.mrb[30].mxu0 }
 0x424   : > { %v2475_v51 = vadd.f32 %v3554_v3, %v2355_v55  ;;  %v2358_v7 = vadd.f32 %v3034_v48, %v4346_v57  ;;  %v2349_v52 = vpop.f32.mrb[31].mxu0 }
 0x425   : > { %v2473_v62 = vadd.f32 %v3552_v2, %v2347_v13  ;;  %v2350_v45 = vadd.f32 %v4346_v57, %v2349_v52  ;;  %v4484_v13 = vld [vmem:[#allocation3_spill] sm:$0xff] }
 0x426   : > { %2507 = vst [vmem:[%s4353_s14 + $0x10] sm:$0xff] %v2475_v51  ;;  %v2476_v47 = vadd.f32 %v3560_v5, %v2358_v7  ;;  %v4485_v7 = vld [vmem:[#allocation6_spill] sm:$0xff] }
 0x427   : > { %2505 = vst [vmem:[%s4353_s14] sm:$0xff] %v2473_v62  ;;  %v2474_v61 = vadd.f32 %v3557_v4, %v2350_v45  ;;  %v4486_v62 = vld [vmem:[#allocation4_spill] sm:$0xff] }
 0x428   : > { %2508 = vst [vmem:[%s4353_s14 + $0x18] sm:$0xff] %v2476_v47 }
 0x429   : > { %2506 = vst [vmem:[%s4353_s14 + $0x8] sm:$0xff] %v2474_v61 }
 0x432   : > { %v3037_v3 = vpop.f32.mrb[32].mxu0 }
 0x433   : > { %v2371_v60 = vadd.f32 %v3037_v3, %v4346_v57  ;;  %v2362_v6 = vpop.f32.mrb[33].mxu0 }
 0x434   : > { %v2363_v2 = vadd.f32 %v4346_v57, %v2362_v6  ;;  %v3038_v1 = vpop.f32.mrb[34].mxu0 }
 0x435   : > { %v2479_v25 = vadd.f32 %v3573_v11, %v2371_v60  ;;  %v2374_v33 = vadd.f32 %v3038_v1, %v4346_v57  ;;  %v2365_v5 = vpop.f32.mrb[35].mxu0 }
 0x436   : > { %v2477_v44 = vadd.f32 %v3566_v8, %v2363_v2  ;;  %v2366_v4 = vadd.f32 %v4346_v57, %v2365_v5  ;;  %v4487_v2 = vld [vmem:[#allocation9_spill] sm:$0xff]  ;;  %v4488_v5 = vld [vmem:[#allocation7_spill] sm:$0xff] }
 0x437   : > { %2511 = vst [vmem:[%s4353_s14 + $0x30] sm:$0xff] %v2479_v25  ;;  %v2480_v59 = vadd.f32 %v3575_v12, %v2374_v33 }
 0x438   : > { %2509 = vst [vmem:[%s4353_s14 + $0x20] sm:$0xff] %v2477_v44  ;;  %v2478_v37 = vadd.f32 %v3568_v9, %v2366_v4 }
 0x439   : > { %2512 = vst [vmem:[%s4353_s14 + $0x38] sm:$0xff] %v2480_v59  ;;  %v4489_v59 = vld [vmem:[#allocation10_spill] sm:$0xff] }
 0x43a   : > { %2510 = vst [vmem:[%s4353_s14 + $0x28] sm:$0xff] %v2478_v37 }
 0x443   : > { %v3041_v11 = vpop.f32.mrb[36].mxu0 }
 0x444   : > { %v2387_v63 = vadd.f32 %v3041_v11, %v4346_v57  ;;  %v2378_v30 = vpop.f32.mrb[37].mxu0  ;;  %v4490_v11 = vld [vmem:[#allocation8_spill] sm:$0xff] }
 0x445   : > { %v2379_v8 = vadd.f32 %v4346_v57, %v2378_v30  ;;  %v3042_v46 = vpop.f32.mrb[38].mxu0 }
 0x446   : > { %v2483_v32 = vadd.f32 %v3592_v17, %v2387_v63  ;;  %v2390_v50 = vadd.f32 %v3042_v46, %v4346_v57  ;;  %v2381_v12 = vpop.f32.mrb[39].mxu0 }
 0x447   : > { %v2481_v22 = vadd.f32 %v3585_v14, %v2379_v8  ;;  %v2382_v9 = vadd.f32 %v4346_v57, %v2381_v12 }
 0x448   : > { %2515 = vst [vmem:[%s4353_s14 + $0x50] sm:$0xff] %v2483_v32  ;;  %v2484_v10 = vadd.f32 %v3594_v18, %v2390_v50 }
 0x449   : > { %2513 = vst [vmem:[%s4353_s14 + $0x40] sm:$0xff] %v2481_v22  ;;  %v2482_v26 = vadd.f32 %v3587_v15, %v2382_v9 }
 0x44a   : > { %2516 = vst [vmem:[%s4353_s14 + $0x58] sm:$0xff] %v2484_v10 }
 0x44b   : > { %2514 = vst [vmem:[%s4353_s14 + $0x48] sm:$0xff] %v2482_v26 }
 0x454   : > { %v3045_v17 = vpop.f32.mrb[40].mxu0 }
 0x455   : > { %v2403_v29 = vadd.f32 %v3045_v17, %v4346_v57  ;;  %v2394_v0 = vpop.f32.mrb[41].mxu0 }
 0x456   : > { %v2395_v14 = vadd.f32 %v4346_v57, %v2394_v0  ;;  %v3046_v36 = vpop.f32.mrb[42].mxu0 }
 0x457   : > { %v2487_v53 = vadd.f32 %v3606_v23, %v2403_v29  ;;  %v2406_v54 = vadd.f32 %v3046_v36, %v4346_v57  ;;  %v2397_v18 = vpop.f32.mrb[43].mxu0 }
 0x458   : > { %v2485_v42 = vadd.f32 %v3598_v19, %v2395_v14  ;;  %v2398_v15 = vadd.f32 %v4346_v57, %v2397_v18 }
 0x459   : > { %2519 = vst [vmem:[%s4353_s14 + $0x70] sm:$0xff] %v2487_v53  ;;  %v2488_v40 = vadd.f32 %v3608_v24, %v2406_v54 }
 0x45a   : > { %2517 = vst [vmem:[%s4353_s14 + $0x60] sm:$0xff] %v2485_v42  ;;  %v2486_v20 = vadd.f32 %v4482_v35, %v2398_v15 }
 0x45b   : > { %2520 = vst [vmem:[%s4353_s14 + $0x78] sm:$0xff] %v2488_v40 }
 0x45c   : > { %2518 = vst [vmem:[%s4353_s14 + $0x68] sm:$0xff] %v2486_v20 }
 0x465   : > { %v3049_v23 = vpop.f32.mrb[44].mxu0 }
 0x466   : > { %v2419_v21 = vadd.f32 %v3049_v23, %v4346_v57  ;;  %v2410_v43 = vpop.f32.mrb[45].mxu0 }
 0x467   : > { %v2411_v19 = vadd.f32 %v4346_v57, %v2410_v43  ;;  %v3050_v28 = vpop.f32.mrb[46].mxu0 }
 0x468   : > { %v2491_v55 = vadd.f32 %v4483_v49, %v2419_v21  ;;  %v2422_v31 = vadd.f32 %v3050_v28, %v4346_v57  ;;  %v2413_v24 = vpop.f32.mrb[47].mxu0 }
 0x469   : > { %v2489_v48 = vadd.f32 %v4484_v13, %v2411_v19  ;;  %v2414_v51 = vadd.f32 %v4346_v57, %v2413_v24 }
 0x46a   : > { %2523 = vst [vmem:[%s4353_s14 + $0x90] sm:$0xff] %v2491_v55  ;;  %v2492_v52 = vadd.f32 %v4485_v7, %v2422_v31 }
 0x46b   : > { %2521 = vst [vmem:[%s4353_s14 + $0x80] sm:$0xff] %v2489_v48  ;;  %v2490_v45 = vadd.f32 %v4486_v62, %v2414_v51 }
 0x46c   : > { %2524 = vst [vmem:[%s4353_s14 + $0x98] sm:$0xff] %v2492_v52 }
 0x46d   : > { %2522 = vst [vmem:[%s4353_s14 + $0x88] sm:$0xff] %v2490_v45 }
 0x4b9   : > { %v3053_v47 = vpop.f32.mrb[48].mxu0 }
 0x4ba   : > { %v2435_v61 = vadd.f32 %v3053_v47, %v4346_v57  ;;  %v2426_v3 = vpop.f32.mrb[49].mxu0 }
 0x4bb   : > { %v2427_v60 = vadd.f32 %v4346_v57, %v2426_v3  ;;  %v3054_v6 = vpop.f32.mrb[50].mxu0 }
 0x4bc   : > { %v2495_v1 = vadd.f32 %v4487_v2, %v2435_v61  ;;  %v2438_v25 = vadd.f32 %v3054_v6, %v4346_v57  ;;  %v2429_v33 = vpop.f32.mrb[51].mxu0 }
 0x4bd   : > { %v2493_v44 = vadd.f32 %v4488_v5, %v2427_v60  ;;  %v2430_v4 = vadd.f32 %v4346_v57, %v2429_v33 }
 0x4be   : > { %2527 = vst [vmem:[%s4353_s14 + $0xb0] sm:$0xff] %v2495_v1  ;;  %v2496_v37 = vadd.f32 %v4489_v59, %v2438_v25 }
 0x4bf   : > { %2525 = vst [vmem:[%s4353_s14 + $0xa0] sm:$0xff] %v2493_v44  ;;  %v2494_v63 = vadd.f32 %v4490_v11, %v2430_v4 }
 0x4c0   : > { %2528 = vst [vmem:[%s4353_s14 + $0xb8] sm:$0xff] %v2496_v37 }
 0x4c1   : > { %2526 = vst [vmem:[%s4353_s14 + $0xa8] sm:$0xff] %v2494_v63 }
 0x4ca   : > { %v3057_v30 = vpop.f32.mrb[52].mxu0 }
 0x4cb   : > { %v2451_v8 = vadd.f32 %v3057_v30, %v4346_v57  ;;  %v2442_v46 = vpop.f32.mrb[53].mxu0 }
 0x4cc   : > { %v2443_v32 = vadd.f32 %v4346_v57, %v2442_v46  ;;  %v3058_v50 = vpop.f32.mrb[54].mxu0 }
 0x4cd   : > { %v2499_v12 = vadd.f32 %v3747_v58, %v2451_v8  ;;  %v2454_v22 = vadd.f32 %v3058_v50, %v4346_v57  ;;  %v2445_v9 = vpop.f32.mrb[55].mxu0 }
 0x4ce   : > { %v2497_v10 = vadd.f32 %v3710_v34, %v2443_v32  ;;  %v2446_v26 = vadd.f32 %v4346_v57, %v2445_v9 }
 0x4cf   : > { %2531 = vst [vmem:[%s4353_s14 + $0xd0] sm:$0xff] %v2499_v12  ;;  %v2500_v17 = vadd.f32 %v3765_v16, %v2454_v22 }
 0x4d0   : > { %2529 = vst [vmem:[%s4353_s14 + $0xc0] sm:$0xff] %v2497_v10  ;;  %v2498_v29 = vadd.f32 %v3726_v41, %v2446_v26 }
 0x4d1   : > { %2532 = vst [vmem:[%s4353_s14 + $0xd8] sm:$0xff] %v2500_v17 }
 0x4d2   : > { %2530 = vst [vmem:[%s4353_s14 + $0xc8] sm:$0xff] %v2498_v29 }
 0x4db   : > { %v3061_v58 = vpop.f32.mrb[56].mxu0 }
 0x4dc   : > { %v2467_v0 = vadd.f32 %v3061_v58, %v4346_v57  ;;  %v2458_v14 = vpop.f32.mrb[57].mxu0 }
 0x4dd   : > { %v2459_v34 = vadd.f32 %v4346_v57, %v2458_v14  ;;  %v3062_v36 = vpop.f32.mrb[58].mxu0 }
 0x4de   : > { %v2503_v53 = vadd.f32 %v3811_v27, %v2467_v0  ;;  %v2470_v54 = vadd.f32 %v3062_v36, %v4346_v57  ;;  %v2461_v16 = vpop.f32.mrb[59].mxu0 }
 0x4df   : > { %v2501_v18 = vadd.f32 %v3786_v39, %v2459_v34  ;;  %v2462_v41 = vadd.f32 %v4346_v57, %v2461_v16 }
 0x4e0   : > { %2535 = vst [vmem:[%s4353_s14 + $0xf0] sm:$0xff] %v2503_v53  ;;  %v2504_v42 = vadd.f32 %v3820_v38, %v2470_v54 }
 0x4e1   : > { %2533 = vst [vmem:[%s4353_s14 + $0xe0] sm:$0xff] %v2501_v18  ;;  %v2502_v15 = vadd.f32 %v3800_v56, %v2462_v41 }
 0x4e2   : > { %2536 = vst [vmem:[%s4353_s14 + $0xf8] sm:$0xff] %v2504_v42 }
 0x4e3   : > { %2534 = vst [vmem:[%s4353_s14 + $0xe8] sm:$0xff] %v2502_v15 }
 0x4e4 PF: > { %s20_s13 = sadd.s32 1, %s3472_s13  }
 0x4e5   : > { %p17_p5 = scmp.ge.s32.totalorder %s20_s13, 4  }
 0x4e7   :  { %19 = sbr.rel (!%p17_p5) target bundleno = 1 (0x1), region = 96 }

// kernel: enc_layer_forward.2
= control target key start
LH: loop header
LB: loop body
LE: loop exit
PB: predicated region body
PF: predicated region fallthrough
CT: control target
= control target key end

     0   :  { %s6474_s0 = inlined_call_operand.vmem [shape: f32[2], index: 0, kind: input, shape index: {}]   ;;  %s6475_s1 = inlined_call_operand.vmem [shape: f32[32,128], index: 1, kind: input, shape index: {}]   ;;  %s6476_s2 = inlined_call_operand.vmem [shape: bf16[32,16,128], index: 2, kind: input, shape index: {}]   ;;  %s6477_s3 = inlined_call_operand.vmem [shape: bf16[32,16,128], index: 3, kind: input, shape index: {}]   ;;  %s6478_s4 = inlined_call_operand.vmem [shape: f32[32,16], index: 4, kind: input, shape index: {}]   ;;  %s6479_s5 = inlined_call_operand.vmem [shape: f32[32,1], index: 5, kind: input, shape index: {}]   ;;  %s6480_s6 = inlined_call_operand.vmem [shape: bf16[128,128], index: 6, kind: input, shape index: {}]   ;;  %s6481_s7 = inlined_call_operand.vmem [shape: bf16[256,128], index: 7, kind: input, shape index: {}]   ;;  %s6482_s8 = inlined_call_operand.vmem [shape: f32[1,128], index: 8, kind: input, shape index: {}]   ;;  %s6483_s9 = inlined_call_operand.vmem [shape: bf16[128,128], index: 9, kind: input, shape index: {}]   ;;  %s6484_s10 = inlined_call_operand.vmem [shape: f32[1,128], index: 10, kind: input, shape index: {}]   ;;  %s6485_s11 = inlined_call_operand.vmem [shape: bf16[128,128], index: 11, kind: input, shape index: {}]   ;;  %s6486_s12 = inlined_call_operand.vmem [shape: f32[1,128], index: 12, kind: input, shape index: {}]   ;;  %s6487_s13 = inlined_call_operand.vmem [shape: bf16[128,512], index: 13, kind: input, shape index: {}]   ;;  %s6488_s14 = inlined_call_operand.vmem [shape: f32[1,512], index: 14, kind: input, shape index: {}]   ;;  %s6489_s15 = inlined_call_operand.vmem [shape: bf16[512,128], index: 15, kind: input, shape index: {}]   ;;  %s6490_s16 = inlined_call_operand.vmem [shape: f32[1,128], index: 16, kind: input, shape index: {}]   ;;  %s6491_s17 = inlined_call_operand.vmem [shape: f32[32,128], index: 17, kind: output, shape index: {}]  }
   0x1   :  { %6492 = sst [smem:[#allocation5_spill]] %s6474_s0 }
   0x2   :  { %6493 = sst [smem:[#allocation6_spill]] %s6475_s1 }
   0x3   :  { %22 = vsyncpa [#allocation3], 0  ;;  %s5040_s24 = smov 0  }
   0x4 LB: > { %s5046_s25 = sadd.s32 4294967295, %s4943_s24   ;;  %p3896_p0 = scmp.ge.s32.totalorder %s4943_s24, 1  ;;  %s4943_s24 = sphi %s5040_s24, %s28_s24  }
   0x5   : > { %p441_p1 = scmp.lt.s32.totalorder %s4943_s24, 3  ;;  %s6494_s28 = sld [smem:[#allocation5_spill]] }
   0x6   : > { %p4417_p3 = scmp.eq.s32.totalorder %s5046_s25, 0 }
   0x7   : > { %p5053_p2 = pnand %p3896_p0, %p441_p1 }
   0x9   : > { %p4413_p4 = pneg %p5053_p2 }
   0xb   : > { %s454_s29 = sshll.u32 %s6494_s28, 4  ;;  %p4414_p5 = pnand %p4417_p3, %p4413_p4  ;;  %s455_s29 = int_to_ptr.vmem [resolvable:$true] %s454_s29 }
   0xc   : > { %s4918_s30 = scalar_lea.vmem %s455_s29, 16  ;;  %p4926_p10 = scmp.lt.s32.totalorder %s455_s29, %s455_s29 }
   0xd   : > { %p4919_p6 = scmp.ne.s32.totalorder %s455_s29, %s4918_s30  ;;  %p4920_p7 = pneg %p4414_p5 }
   0xe   : > { %p4927_p11 = scmp.lt.s32.totalorder %s4918_s30, %s4918_s30 }
   0xf   : > { %p4921_p8 = pnand %p4920_p7, %p4919_p6 }
  0x10   : > { %p4928_p12 = por %p4927_p11, %p4926_p10 }
  0x11   : > { %p4922_p9 = pneg %p4921_p8 }
  0x13   : > { %p4929_p13 = pnand %p4928_p12, %p4922_p9 }
  0x15   : > { %4932 = shalt.err (!%p4929_p13)
}
  0x16   : > { %s4945_s18 = smov [#allocation2]   ;;  %547 = sbr.rel (%p5053_p2) target bundleno = 2079 (0x81f), region = 88 }
  0x17   : > { %4416 = dma.vmem_to_smem (!%p4414_p5), %s455_s29, 16, %s4945_s18, [#allocation3]  }
  0x1d   : > { %4938 = dma.done.wait (%p4417_p3), [#allocation3], 16  }
  0x1e   : > { %4940 = vsyncadd (%p4417_p3), [#allocation3], 4294967280 }
  0x1f   : > { %553 = sfence }
  0x20   : > { %s3903_s19 = sshll.u32 %s5046_s25, 4  ;;  %s3901_s1 = sshll.u32 %s5046_s25, 1  ;;  %v4434_v32 = vld [vmem:[%s6481_s7 + $0x40] sm:$0xff]   ;;  %v4436_v34 = vld [vmem:[%s6481_s7 + $0x48] sm:$0xff]   ;;  %vm4947_vm0 = vmmov 0   ;;  %vm2896_vm1 = vcmask 1041409  }
  0x21   : > { %p629_p0 = scmp.lt.s32.totalorder %s3903_s19, 31  ;;  %p623_p1 = scmp.lt.s32.totalorder %s3901_s1, 3  ;;  %v4435_v33 = vld [vmem:[%s6481_s7] sm:$0xff]   ;;  %4132 = vmatprep.subr.bf16.mxu1 %v4434_v32  ;;  %v4437_v35 = vld [vmem:[%s6481_s7 + $0x8] sm:$0xff]   ;;  %vm2816_vm2 = vcmask 130048   ;;  %vm2898_vm3 = vcmask 1042434  }
  0x22   : > { %s6496_s30 = sld [smem:[#allocation6_spill]]  ;;  %4133 = vmatpush3.bf16.msra.mxu1 %v4435_v33  ;;  %vm2900_vm4 = vcmask 1043459   ;;  %vm2902_vm5 = vcmask 1044484   ;;  %vm2904_vm6 = vcmask 1045509   ;;  %vm2906_vm7 = vcmask 1046534  }
  0x23   : > { %s6498_s19 = smov (!%p629_p0, %s3903_s19), 31  ;;  %s6500_s1 = smov (!%p623_p1, %s3901_s1), 3  ;;  %4134 = vmatprep.subr.bf16.mxu1 %v4436_v34  ;;  %v4440_v34 = vld [vmem:[%s6481_s7 + $0x58] sm:$0xff]   ;;  %vm2908_vm8 = vcmask 1047559  }
  0x24   : > { %s4042_s20 = sshll.u32 %s6498_s19, 3  ;;  %s5142_s28 = sshll.u32 %s6500_s1, 3 }
  0x25   : > { %s5073_s23 = scalar_lea.vmem %s6477_s3, %s4042_s20  ;;  %s5104_s27 = scalar_lea.vmem %s6476_s2, %s4042_s20 }
  0x26   : > { %v5076_v0 = vld [vmem:[%s5073_s23] sm:$0xff]   ;;  %v5079_v1 = vld [vmem:[%s5073_s23 + $0x8] sm:$0xff]   ;;  %v5090_v6 = vld [vmem:[%s5073_s23 + $0x10] sm:$0xff]   ;;  %4135 = vmatpush3.bf16.msra.mxu1 %v4437_v35  ;;  %s5759_s21 = scalar_lea.vmem %s6478_s4, %s5142_s28  ;;  %s3915_s19 = sld [smem:[#allocation2 + $0x1]] }
  0x27   : > { %v4046_v2 = vunpack.c.l.bf16 %v5076_v0  ;;  %v4050_v3 = vunpack.c.l.bf16 %v5079_v1  ;;  %v4047_v4 = vunpack.c.h.bf16 %v5076_v0  ;;  %v4051_v5 = vunpack.c.h.bf16 %v5079_v1  ;;  %v5093_v7 = vld [vmem:[%s5073_s23 + $0x18] sm:$0xff]   ;;  %v5107_v10 = vld [vmem:[%s5073_s23 + $0x20] sm:$0xff]   ;;  %v5116_v13 = vld [vmem:[%s5073_s23 + $0x28] sm:$0xff]   ;;  %s658_s0 = scalar_lea.vmem %s6491_s17, %s5142_s28 }
  0x28   : > { %v4054_v8 = vunpack.c.l.bf16 %v5090_v6  ;;  %v4055_v9 = vunpack.c.h.bf16 %v5090_v6  ;;  %v4058_v11 = vunpack.c.l.bf16 %v5093_v7  ;;  %v4059_v12 = vunpack.c.h.bf16 %v5093_v7  ;;  %v5125_v16 = vld [vmem:[%s5073_s23 + $0x30] sm:$0xff]   ;;  %v5140_v21 = vld [vmem:[%s5073_s23 + $0x38] sm:$0xff]   ;;  %s5154_s18 = scalar_lea.vmem %s6496_s30, %s5142_s28  ;;  %v5167_v26 = vld [vmem:[%s5073_s23 + $0x40] sm:$0xff]  }
  0x29   : > { %890 = vadd.xlane.f32.xlu0 %v4046_v2  ;;  %894 = vadd.xlane.f32.xlu1 %v4050_v3  ;;  %v4062_v14 = vunpack.c.l.bf16 %v5107_v10  ;;  %v4063_v15 = vunpack.c.h.bf16 %v5107_v10  ;;  %v4066_v17 = vunpack.c.l.bf16 %v5116_v13  ;;  %v4067_v18 = vunpack.c.h.bf16 %v5116_v13  ;;  %v5157_v24 = vld [vmem:[%s5154_s18] sm:$0xff]  ;;  %v5160_v25 = vld [vmem:[%s5154_s18 + $0x8] sm:$0xff]  ;;  %v5203_v42 = vld [vmem:[%s5073_s23 + $0x50] sm:$0xff]  }
  0x2a   : > { %v4070_v19 = vunpack.c.l.bf16 %v5125_v16  ;;  %v4071_v20 = vunpack.c.h.bf16 %v5125_v16  ;;  %v4074_v22 = vunpack.c.l.bf16 %v5140_v21  ;;  %v4075_v23 = vunpack.c.h.bf16 %v5140_v21  ;;  %v5170_v27 = vld [vmem:[%s5073_s23 + $0x48] sm:$0xff]   ;;  %v5228_v56 = vld [vmem:[%s5073_s23 + $0x58] sm:$0xff]  }
  0x2b   : > { %v4078_v28 = vunpack.c.l.bf16 %v5167_v26  ;;  %v4079_v29 = vunpack.c.h.bf16 %v5167_v26  ;;  %v4082_v30 = vunpack.c.l.bf16 %v5170_v27  ;;  %v4083_v31 = vunpack.c.h.bf16 %v5170_v27 }
  0x2c   : > { %v4086_v47 = vunpack.c.l.bf16 %v5203_v42  ;;  %v4087_v52 = vunpack.c.h.bf16 %v5203_v42  ;;  %v4090_v59 = vunpack.c.l.bf16 %v5228_v56  ;;  %v4091_v63 = vunpack.c.h.bf16 %v5228_v56 }
  0x2d   : > { %892 = vadd.xlane.f32.xlu0 %v4047_v4  ;;  %896 = vadd.xlane.f32.xlu1 %v4051_v5 }
  0x31   : > { %898 = vadd.xlane.f32.xlu0 %v4054_v8  ;;  %900 = vadd.xlane.f32.xlu1 %v4055_v9 }
  0x35   : > { %902 = vadd.xlane.f32.xlu0 %v4058_v11  ;;  %904 = vadd.xlane.f32.xlu1 %v4059_v12 }
  0x39   : > { %906 = vadd.xlane.f32.xlu0 %v4062_v14  ;;  %908 = vadd.xlane.f32.xlu1 %v4063_v15 }
  0x3d   : > { %910 = vadd.xlane.f32.xlu0 %v4066_v17  ;;  %912 = vadd.xlane.f32.xlu1 %v4067_v18 }
  0x41   : > { %914 = vadd.xlane.f32.xlu0 %v4070_v19  ;;  %916 = vadd.xlane.f32.xlu1 %v4071_v20 }
  0x45   : > { %918 = vadd.xlane.f32.xlu0 %v4074_v22  ;;  %920 = vadd.xlane.f32.xlu1 %v4075_v23 }
  0x49   : > { %665 = vadd.xlane.f32.xlu0 %v5157_v24  ;;  %667 = vadd.xlane.f32.xlu1 %v5160_v25 }
  0x4d   : > { %922 = vadd.xlane.f32.xlu0 %v4078_v28  ;;  %924 = vadd.xlane.f32.xlu1 %v4079_v29 }
  0x51   : > { %926 = vadd.xlane.f32.xlu0 %v4082_v30  ;;  %928 = vadd.xlane.f32.xlu1 %v4083_v31 }
  0xb6   : > { %v891_v36 = vpop.xlane.xlu0 %890  ;;  %v895_v37 = vpop.xlane.xlu1 %894 }
  0xb7   : > { %v954_v38 = vmul.f32 0.0078125, %v891_v36  ;;  %v956_v40 = vmul.f32 0.0078125, %v895_v37  ;;  %v4441_v36 = vld [vmem:[%s6481_s7 + $0x18] sm:$0xff]  }
  0xb9   : > { %v5200_v39 = vsub.f32 %v4046_v2, %v954_v38  ;;  %v5214_v49 = vsub.f32 %v4050_v3, %v956_v40  ;;  %v4438_v3 = vld [vmem:[%s6481_s7 + $0x50] sm:$0xff]  }
  0xba   : > { %v893_v41 = vpop.xlane.xlu0 %892  ;;  %v897_v43 = vpop.xlane.xlu1 %896  ;;  %4136 = vmatprep.subr.bf16.mxu1 %v4438_v3  ;;  %v5318_v3 = vld [vmem:[%s5073_s23 + $0x70] sm:$0xff]  }
  0xbb   : > { %v955_v44 = vmul.f32 0.0078125, %v893_v41  ;;  %v1018_v45 = vmul.f32 %v5200_v39, %v5200_v39  ;;  %v957_v48 = vmul.f32 0.0078125, %v897_v43  ;;  %v1020_v53 = vmul.f32 %v5214_v49, %v5214_v49  ;;  %v4442_v41 = vld [vmem:[%s6481_s7 + $0x60] sm:$0xff]   ;;  %v5285_v43 = vld [vmem:[%s5073_s23 + $0x68] sm:$0xff]  }
  0xbd   : > { %1050 = vadd.xlane.f32.xlu0 %v1018_v45  ;;  %v5209_v46 = vsub.f32 %v4047_v4, %v955_v44  ;;  %v5225_v55 = vsub.f32 %v4051_v5, %v957_v48  ;;  %v5252_v4 = vld [vmem:[%s5073_s23 + $0x60] sm:$0xff]  }
  0xbe   : > { %v899_v50 = vpop.xlane.xlu0 %898  ;;  %v901_v57 = vpop.xlane.xlu1 %900  ;;  %v4095_v37 = vunpack.c.h.bf16 %v5252_v4  ;;  %v4443_v48 = vld [vmem:[%s6481_s7 + $0x20] sm:$0xff]  }
  0xbf   : > { %v1019_v51 = vmul.f32 %v5209_v46, %v5209_v46  ;;  %v958_v54 = vmul.f32 0.0078125, %v899_v50  ;;  %v1021_v58 = vmul.f32 %v5225_v55, %v5225_v55  ;;  %v959_v60 = vmul.f32 0.0078125, %v901_v57 }
  0xc1   : > { %1052 = vadd.xlane.f32.xlu1 %v1019_v51  ;;  %930 = vadd.xlane.f32.xlu0 %v4086_v47  ;;  %v5237_v61 = vsub.f32 %v4054_v8, %v958_v54  ;;  %v5246_v2 = vsub.f32 %v4055_v9, %v959_v60  ;;  %v4439_v8 = vld [vmem:[%s6481_s7 + $0x10] sm:$0xff]   ;;  %v4094_v9 = vunpack.c.l.bf16 %v5252_v4  ;;  %v4099_v60 = vunpack.c.h.bf16 %v5285_v43 }
  0xc2   : > { %v903_v62 = vpop.xlane.xlu0 %902  ;;  %v905_v5 = vpop.xlane.xlu1 %904  ;;  %4137 = vmatpush3.bf16.msra.mxu1 %v4439_v8  ;;  %v4447_v8 = vld [vmem:[%s6481_s7 + $0x30] sm:$0xff]  }
  0xc3   : > { %v1022_v0 = vmul.f32 %v5237_v61, %v5237_v61  ;;  %v960_v1 = vmul.f32 0.0078125, %v903_v62  ;;  %v1023_v6 = vmul.f32 %v5246_v2, %v5246_v2  ;;  %v961_v32 = vmul.f32 0.0078125, %v905_v5  ;;  %4138 = vmatprep.subr.bf16.mxu1 %v4440_v34 }
  0xc5   : > { %932 = vadd.xlane.f32.xlu1 %v4087_v52  ;;  %1054 = vadd.xlane.f32.xlu0 %v1020_v53  ;;  %v5264_v33 = vsub.f32 %v4058_v11, %v960_v1  ;;  %v5279_v40 = vsub.f32 %v4059_v12, %v961_v32  ;;  %v4098_v12 = vunpack.c.l.bf16 %v5285_v43  ;;  %v4444_v53 = vld [vmem:[%s6481_s7 + $0x68] sm:$0xff]   ;;  %v4446_v1 = vld [vmem:[%s6481_s7 + $0x70] sm:$0xff]   ;;  %v4102_v32 = vunpack.c.l.bf16 %v5318_v3 }
  0xc6   : > { %v907_v35 = vpop.xlane.xlu0 %906  ;;  %4139 = vmatpush3.bf16.msra.mxu1 %v4441_v36  ;;  %v909_v44 = vpop.xlane.xlu1 %908  ;;  %v4449_v36 = vld [vmem:[%s6481_s7 + $0x38] sm:$0xff]  }
  0xc7   : > { %v1024_v11 = vmul.f32 %v5264_v33, %v5264_v33  ;;  %v962_v38 = vmul.f32 0.0078125, %v907_v35  ;;  %4140 = vmatprep.subr.bf16.mxu1 %v4442_v41  ;;  %v1025_v7 = vmul.f32 %v5279_v40, %v5279_v40  ;;  %v963_v50 = vmul.f32 0.0078125, %v909_v44  ;;  %v4448_v35 = vld [vmem:[%s6481_s7 + $0x78] sm:$0xff]  }
  0xc9   : > { %1056 = vadd.xlane.f32.xlu1 %v1021_v58  ;;  %934 = vadd.xlane.f32.xlu0 %v4090_v59  ;;  %v5297_v51 = vsub.f32 %v4062_v14, %v962_v38  ;;  %v4445_v58 = vld [vmem:[%s6481_s7 + $0x28] sm:$0xff]   ;;  %v4103_v38 = vunpack.c.h.bf16 %v5318_v3 }
  0xca   : > { %v911_v45 = vpop.xlane.xlu0 %910  ;;  %4141 = vmatpush3.bf16.msra.mxu1 %v4443_v48  ;;  %v913_v54 = vpop.xlane.xlu1 %912 }
  0xcb   : > { %4142 = vmatprep.subr.bf16.mxu1 %v4444_v53  ;;  %v1026_v14 = vmul.f32 %v5297_v51, %v5297_v51  ;;  %v964_v62 = vmul.f32 0.0078125, %v911_v45  ;;  %v965_v34 = vmul.f32 0.0078125, %v913_v54  ;;  %v5348_v45 = vld [vmem:[%s5073_s23 + $0x78] sm:$0xff]  }
  0xcd   : > { %936 = vadd.xlane.f32.xlu1 %v4091_v63  ;;  %1058 = vadd.xlane.f32.xlu0 %v1022_v0  ;;  %v5312_v0 = vsub.f32 %v4063_v15, %v963_v50  ;;  %v5327_v10 = vsub.f32 %v4066_v17, %v964_v62  ;;  %v5342_v17 = vsub.f32 %v4067_v18, %v965_v34 }
  0xce   : > { %v915_v57 = vpop.xlane.xlu0 %914  ;;  %4143 = vmatpush3.bf16.msra.mxu1 %v4445_v58  ;;  %v917_v5 = vpop.xlane.xlu1 %916 }
  0xcf   : > { %4144 = vmatprep.subr.bf16.mxu1 %v4446_v1  ;;  %v1027_v15 = vmul.f32 %v5312_v0, %v5312_v0  ;;  %v1028_v41 = vmul.f32 %v5327_v10, %v5327_v10  ;;  %v966_v44 = vmul.f32 0.0078125, %v915_v57  ;;  %v1029_v18 = vmul.f32 %v5342_v17, %v5342_v17 }
  0xd0   : > { %v967_v50 = vmul.f32 0.0078125, %v917_v5  ;;  %v4107_v57 = vunpack.c.h.bf16 %v5348_v45 }
  0xd1   : > { %1060 = vadd.xlane.f32.xlu1 %v1023_v6  ;;  %938 = vadd.xlane.f32.xlu0 %v4094_v9  ;;  %v5355_v13 = vsub.f32 %v4070_v19, %v966_v44 }
  0xd2   : > { %v919_v6 = vpop.xlane.xlu0 %918  ;;  %4145 = vmatpush3.bf16.msra.mxu1 %v4447_v8  ;;  %v5364_v62 = vsub.f32 %v4071_v20, %v967_v50 }
  0xd3   : > { %4146 = vmatprep.subr.bf16.mxu1 %v4448_v35  ;;  %v968_v53 = vmul.f32 0.0078125, %v919_v6  ;;  %v1030_v1 = vmul.f32 %v5355_v13, %v5355_v13 }
  0xd4   : > { %v1031_v20 = vmul.f32 %v5364_v62, %v5364_v62 }
  0xd5   : > { %940 = vadd.xlane.f32.xlu1 %v4095_v37  ;;  %1062 = vadd.xlane.f32.xlu0 %v1024_v11  ;;  %v921_v11 = vpop.xlane.xlu1 %920  ;;  %v5368_v19 = vsub.f32 %v4074_v22, %v968_v53 }
  0xd6   : > { %4147 = vmatpush3.bf16.msra.mxu1 %v4449_v36  ;;  %v666_v48 = vpop.xlane.xlu0 %665  ;;  %v969_v58 = vmul.f32 0.0078125, %v921_v11 }
  0xd7   : > { %v670_v5 = vmul.f32 0.0078125, %v666_v48  ;;  %v1032_v22 = vmul.f32 %v5368_v19, %v5368_v19 }
  0xd8   : > { %v5374_v8 = vsub.f32 %v4075_v23, %v969_v58  ;;  %v4456_v58 = vld [vmem:[%s6480_s6 + $0x10] sm:$0xff]  }
  0xd9   : > { %1064 = vadd.xlane.f32.xlu1 %v1025_v7  ;;  %942 = vadd.xlane.f32.xlu0 %v4098_v12  ;;  %v4106_v7 = vunpack.c.l.bf16 %v5348_v45  ;;  %v668_v54 = vpop.xlane.xlu1 %667  ;;  %v5379_v16 = vsub.f32 %v5157_v24, %v670_v5  ;;  %v4461_v5 = vld [vmem:[%s6480_s6 + $0x28] sm:$0xff]  }
  0xda   : > { %v671_v6 = vmul.f32 0.0078125, %v668_v54  ;;  %v1033_v23 = vmul.f32 %v5374_v8, %v5374_v8 }
  0xdb   : > { %v674_v36 = vmul.f32 %v5379_v16, %v5379_v16 }
  0xdc   : > { %v5386_v21 = vsub.f32 %v5160_v25, %v671_v6  ;;  %v4462_v6 = vld [vmem:[%s6480_s6 + $0x30] sm:$0xff]  }
  0xdd   : > { %944 = vadd.xlane.f32.xlu1 %v4099_v60  ;;  %1066 = vadd.xlane.f32.xlu0 %v1026_v14  ;;  %v923_v14 = vpop.xlane.xlu0 %922 }
  0xde   : > { %v970_v34 = vmul.f32 0.0078125, %v923_v14  ;;  %v675_v48 = vmul.f32 %v5386_v21, %v5386_v21  ;;  %v4458_v14 = vld [vmem:[%s6480_s6 + $0x18] sm:$0xff]  }
  0xe0   : > { %v5392_v24 = vsub.f32 %v4078_v28, %v970_v34 }
  0xe1   : > { %1068 = vadd.xlane.f32.xlu1 %v1027_v15  ;;  %946 = vadd.xlane.f32.xlu0 %v4102_v32  ;;  %v925_v15 = vpop.xlane.xlu1 %924  ;;  %v927_v35 = vpop.xlane.xlu0 %926 }
  0xe2   : > { %v971_v11 = vmul.f32 0.0078125, %v925_v15  ;;  %v1034_v28 = vmul.f32 %v5392_v24, %v5392_v24  ;;  %v4464_v15 = vld [vmem:[%s6480_s6 + $0x38] sm:$0xff]  }
  0xe4   : > { %v5400_v25 = vsub.f32 %v4079_v29, %v971_v11  ;;  %v4453_v29 = vld [vmem:[%s6480_s6] sm:$0xff]  }
  0xe5   : > { %948 = vadd.xlane.f32.xlu1 %v4103_v38  ;;  %1070 = vadd.xlane.f32.xlu0 %v1028_v41  ;;  %v972_v41 = vmul.f32 0.0078125, %v927_v35  ;;  %v929_v44 = vpop.xlane.xlu1 %928 }
  0xe6   : > { %v973_v50 = vmul.f32 0.0078125, %v929_v44  ;;  %v1035_v54 = vmul.f32 %v5400_v25, %v5400_v25 }
  0xe8   : > { %v5410_v53 = vsub.f32 %v4083_v31, %v973_v50  ;;  %v4455_v31 = vld [vmem:[%s6480_s6 + $0x8] sm:$0xff]  }
  0xe9   : > { %1072 = vadd.xlane.f32.xlu1 %v1029_v18  ;;  %950 = vadd.xlane.f32.xlu0 %v4106_v7  ;;  %v5404_v18 = vsub.f32 %v4082_v30, %v972_v41  ;;  %v4946_v30 = vmov 0.0  }
  0xea   : > { %4321 = vmatprep.subr.bf16.mxu0 %v4946_v30  ;;  %v1037_v27 = vmul.f32 %v5410_v53, %v5410_v53  ;;  %4337 = vmatprep.mubr.msk.bf16.mxu0 %vm4947_vm0, %v4946_v30 }
  0xeb   : > { %v1036_v26 = vmul.f32 %v5404_v18, %v5404_v18  ;;  %4322 = vmatpush3.bf16.msra.mxu0 %v4453_v29 }
  0xec   : > { %4323 = vmatprep.subr.bf16.mxu0 %v4946_v30 }
  0xed   : > { %952 = vadd.xlane.f32.xlu1 %v4107_v57  ;;  %1074 = vadd.xlane.f32.xlu0 %v1030_v1  ;;  %v4459_v1 = vld [vmem:[%s6480_s6 + $0x20] sm:$0xff]  }
  0xef   : > { %4324 = vmatpush3.bf16.msra.mxu0 %v4455_v31 }
  0xf0   : > { %4325 = vmatprep.subr.bf16.mxu0 %v4946_v30 }
  0xf1   : > { %1076 = vadd.xlane.f32.xlu1 %v1031_v20  ;;  %1078 = vadd.xlane.f32.xlu0 %v1032_v22 }
  0xf3   : > { %4326 = vmatpush3.bf16.msra.mxu0 %v4456_v58 }
  0xf4   : > { %4327 = vmatprep.subr.bf16.mxu0 %v4946_v30 }
  0xf5   : > { %1080 = vadd.xlane.f32.xlu1 %v1033_v23  ;;  %676 = vadd.xlane.f32.xlu0 %v674_v36 }
  0xf7   : > { %4328 = vmatpush3.bf16.msra.mxu0 %v4458_v14 }
  0xf8   : > { %4329 = vmatprep.subr.bf16.mxu0 %v4946_v30 }
  0xf9   : > { %678 = vadd.xlane.f32.xlu1 %v675_v48  ;;  %1082 = vadd.xlane.f32.xlu0 %v1034_v28 }
  0xfb   : > { %4330 = vmatpush3.bf16.msra.mxu0 %v4459_v1 }
  0xfc   : > { %4331 = vmatprep.subr.bf16.mxu0 %v4946_v30 }
  0xfd   : > { %1084 = vadd.xlane.f32.xlu1 %v1035_v54  ;;  %1086 = vadd.xlane.f32.xlu0 %v1036_v26 }
  0xff   : > { %4332 = vmatpush3.bf16.msra.mxu0 %v4461_v5 }
 0x100   : > { %4333 = vmatprep.subr.bf16.mxu0 %v4946_v30 }
 0x101   : > { %1088 = vadd.xlane.f32.xlu1 %v1037_v27 }
 0x103   : > { %4334 = vmatpush3.bf16.msra.mxu0 %v4462_v6 }
 0x104   : > { %4335 = vmatprep.subr.bf16.mxu0 %v4946_v30 }
 0x107   : > { %4336 = vmatpush3.bf16.msra.mxu0 %v4464_v15 }
 0x14a   : > { %v1051_v20 = vpop.xlane.xlu0 %1050 }
 0x14b   : > { %v1114_v22 = vmul.f32 0.0078125, %v1051_v20 }
 0x14d   : > { %v1146_v34 = vadd.f32 1e-05, %v1114_v22 }
 0x14e   : > { %v1053_v35 = vpop.xlane.xlu1 %1052  ;;  %v931_v23 = vpop.xlane.xlu0 %930 }
 0x14f   : > { %v1115_v36 = vmul.f32 0.0078125, %v1053_v35  ;;  %v974_v11 = vmul.f32 0.0078125, %v931_v23  ;;  %4570 = vrsqrt.f32 %v1146_v34 }
 0x151   : > { %v1147_v41 = vadd.f32 1e-05, %v1115_v36  ;;  %v5454_v44 = vsub.f32 %v4086_v47, %v974_v11 }
 0x152   : > { %v933_v48 = vpop.xlane.xlu1 %932  ;;  %v1055_v28 = vpop.xlane.xlu0 %1054 }
 0x153   : > { %4572 = vrsqrt.f32 %v1147_v41  ;;  %v975_v50 = vmul.f32 0.0078125, %v933_v48  ;;  %v1116_v54 = vmul.f32 0.0078125, %v1055_v28  ;;  %v1038_v26 = vmul.f32 %v5454_v44, %v5454_v44 }
 0x155   : > { %v5460_v29 = vsub.f32 %v4087_v52, %v975_v50  ;;  %v1148_v27 = vadd.f32 1e-05, %v1116_v54  ;;  %1090 = vadd.xlane.f32.xlu0 %v1038_v26  ;;  %v4450_v26 = vld [vmem:[%s5104_s27] sm:$0xff]  }
 0x156   : > { %v1057_v31 = vpop.xlane.xlu1 %1056  ;;  %v935_v58 = vpop.xlane.xlu0 %934 }
 0x157   : > { %v1117_v14 = vmul.f32 0.0078125, %v1057_v31  ;;  %v976_v1 = vmul.f32 0.0078125, %v935_v58  ;;  %v1039_v47 = vmul.f32 %v5460_v29, %v5460_v29  ;;  %4574 = vrsqrt.f32 %v1148_v27 }
 0x159   : > { %v1149_v5 = vadd.f32 1e-05, %v1117_v14  ;;  %v5466_v6 = vsub.f32 %v4090_v59, %v976_v1  ;;  %1092 = vadd.xlane.f32.xlu1 %v1039_v47  ;;  %v4571_v52 = vpop.eup %4570 }
 0x15a   : > { %v937_v15 = vpop.xlane.xlu1 %936  ;;  %v1059_v42 = vpop.xlane.xlu0 %1058  ;;  %v1210_v41 = vmul.f32 %v4571_v52, %v5200_v39 }
 0x15b   : > { %4576 = vrsqrt.f32 %v1149_v5  ;;  %v977_v20 = vmul.f32 0.0078125, %v937_v15  ;;  %v1118_v22 = vmul.f32 0.0078125, %v1059_v42  ;;  %v1040_v34 = vmul.f32 %v5466_v6, %v5466_v6 }
 0x15d   : > { %v4573_v35 = vpop.eup %4572  ;;  %v5472_v23 = vsub.f32 %v4091_v63, %v977_v20  ;;  %v1150_v36 = vadd.f32 1e-05, %v1118_v22  ;;  %1094 = vadd.xlane.f32.xlu0 %v1040_v34 }
 0x15e   : > { %v1061_v59 = vpop.xlane.xlu1 %1060  ;;  %v939_v11 = vpop.xlane.xlu0 %938  ;;  %v1211_v48 = vmul.f32 %v4573_v35, %v5209_v46 }
 0x15f   : > { %v1119_v28 = vmul.f32 0.0078125, %v1061_v59  ;;  %v978_v50 = vmul.f32 0.0078125, %v939_v11  ;;  %v1041_v54 = vmul.f32 %v5472_v23, %v5472_v23  ;;  %4578 = vrsqrt.f32 %v1150_v36  ;;  %v4451_v36 = vld [vmem:[%s5104_s27 + $0x8] sm:$0xff]  }
 0x160   : > { %v1242_v27 = vpack.c.bf16 %v1211_v48, %v1210_v41 }
 0x161   : > { %v1151_v31 = vadd.f32 1e-05, %v1119_v28  ;;  %v5481_v56 = vsub.f32 %v4094_v9, %v978_v50  ;;  %1096 = vadd.xlane.f32.xlu1 %v1041_v54  ;;  %v4575_v39 = vpop.eup %4574 }
 0x162   : > { %v941_v63 = vpop.xlane.xlu1 %940  ;;  %1521 = vmatprep.mubr.bf16.mxu1 %v1242_v27  ;;  %v1063_v58 = vpop.xlane.xlu0 %1062  ;;  %v1212_v52 = vmul.f32 %v4575_v39, %v5214_v49 }
 0x163   : > { %4580 = vrsqrt.f32 %v1151_v31  ;;  %v979_v46 = vmul.f32 0.0078125, %v941_v63  ;;  %v1120_v14 = vmul.f32 0.0078125, %v1063_v58  ;;  %1522 = vmatmul.mubr.bf16.vlgmr.msra.gmra.mrb[0].mxu1 %v4450_v26  ;;  %v1042_v1 = vmul.f32 %v5481_v56, %v5481_v56 }
 0x165   : > { %v4577_v47 = vpop.eup %4576  ;;  %v5487_v5 = vsub.f32 %v4095_v37, %v979_v46  ;;  %v1152_v9 = vadd.f32 1e-05, %v1120_v14  ;;  %1098 = vadd.xlane.f32.xlu0 %v1042_v1  ;;  %v4452_v14 = vld [vmem:[%s5104_s27 + $0x10] sm:$0xff]  }
 0x166   : > { %v1065_v15 = vpop.xlane.xlu1 %1064  ;;  %v943_v42 = vpop.xlane.xlu0 %942  ;;  %v1213_v20 = vmul.f32 %v4577_v47, %v5225_v55 }
 0x167   : > { %v1121_v22 = vmul.f32 0.0078125, %v1065_v15  ;;  %v980_v34 = vmul.f32 0.0078125, %v943_v42  ;;  %v1043_v35 = vmul.f32 %v5487_v5, %v5487_v5  ;;  %4582 = vrsqrt.f32 %v1152_v9 }
 0x168   : > { %v1243_v59 = vpack.c.bf16 %v1213_v20, %v1212_v52 }
 0x169   : > { %v1153_v11 = vadd.f32 1e-05, %v1121_v22  ;;  %v5496_v4 = vsub.f32 %v4098_v12, %v980_v34  ;;  %1100 = vadd.xlane.f32.xlu1 %v1043_v35  ;;  %v4579_v49 = vpop.eup %4578 }
 0x16a   : > { %v945_v37 = vpop.xlane.xlu1 %944  ;;  %1529 = vmatprep.mubr.bf16.mxu1 %v1243_v59  ;;  %v1067_v41 = vpop.xlane.xlu0 %1066  ;;  %v1214_v31 = vmul.f32 %v4579_v49, %v5237_v61 }
 0x16b   : > { %4584 = vrsqrt.f32 %v1153_v11  ;;  %v981_v55 = vmul.f32 0.0078125, %v945_v37  ;;  %v1122_v48 = vmul.f32 0.0078125, %v1067_v41  ;;  %1530 = vmatmul.mubr.bf16.gmra.mrb[4].mxu1 %v4451_v36  ;;  %v1044_v28 = vmul.f32 %v5496_v4, %v5496_v4  ;;  %v4454_v41 = vld [vmem:[%s5104_s27 + $0x18] sm:$0xff]  }
 0x16d   : > { %v4581_v50 = vpop.eup %4580  ;;  %v5502_v54 = vsub.f32 %v4099_v60, %v981_v55  ;;  %v1154_v12 = vadd.f32 1e-05, %v1122_v48  ;;  %1102 = vadd.xlane.f32.xlu0 %v1044_v28 }
 0x16e   : > { %v1069_v26 = vpop.xlane.xlu1 %1068  ;;  %v947_v27 = vpop.xlane.xlu0 %946  ;;  %v1215_v63 = vmul.f32 %v4581_v50, %v5246_v2 }
 0x16f   : > { %v1123_v58 = vmul.f32 0.0078125, %v1069_v26  ;;  %v982_v39 = vmul.f32 0.0078125, %v947_v27  ;;  %v1045_v46 = vmul.f32 %v5502_v54, %v5502_v54  ;;  %4586 = vrsqrt.f32 %v1154_v12 }
 0x170   : > { %v1244_v1 = vpack.c.bf16 %v1215_v63, %v1214_v31 }
 0x171   : > { %v1155_v47 = vadd.f32 1e-05, %v1123_v58  ;;  %v5511_v43 = vsub.f32 %v4102_v32, %v982_v39  ;;  %1104 = vadd.xlane.f32.xlu1 %v1045_v46  ;;  %v4583_v61 = vpop.eup %4582 }
 0x172   : > { %v949_v60 = vpop.xlane.xlu1 %948  ;;  %1537 = vmatprep.mubr.bf16.mxu1 %v1244_v1  ;;  %v1071_v9 = vpop.xlane.xlu0 %1070  ;;  %v1216_v35 = vmul.f32 %v4583_v61, %v5264_v33  ;;  %v4457_v1 = vld [vmem:[%s5104_s27 + $0x20] sm:$0xff]  }
 0x173   : > { %4588 = vrsqrt.f32 %v1155_v47  ;;  %v983_v2 = vmul.f32 0.0078125, %v949_v60  ;;  %v1124_v15 = vmul.f32 0.0078125, %v1071_v9  ;;  %1538 = vmatmul.mubr.bf16.gmra.mrb[8].mxu1 %v4452_v14  ;;  %v1046_v42 = vmul.f32 %v5511_v43, %v5511_v43 }
 0x175   : > { %v4585_v52 = vpop.eup %4584  ;;  %v5517_v20 = vsub.f32 %v4103_v38, %v983_v2  ;;  %v1156_v32 = vadd.f32 1e-05, %v1124_v15  ;;  %1106 = vadd.xlane.f32.xlu0 %v1046_v42 }
 0x176   : > { %v1073_v22 = vpop.xlane.xlu1 %1072  ;;  %v951_v34 = vpop.xlane.xlu0 %950  ;;  %v1217_v36 = vmul.f32 %v4585_v52, %v5279_v40 }
 0x177   : > { %v1125_v59 = vmul.f32 0.0078125, %v1073_v22  ;;  %v984_v11 = vmul.f32 0.0078125, %v951_v34  ;;  %v1047_v37 = vmul.f32 %v5517_v20, %v5517_v20  ;;  %4590 = vrsqrt.f32 %v1156_v32 }
 0x178   : > { %v1245_v49 = vpack.c.bf16 %v1217_v36, %v1216_v35 }
 0x179   : > { %v1157_v55 = vadd.f32 1e-05, %v1125_v59  ;;  %v5526_v3 = vsub.f32 %v4106_v7, %v984_v11  ;;  %1108 = vadd.xlane.f32.xlu1 %v1047_v37  ;;  %v4587_v33 = vpop.eup %4586  ;;  %v4460_v59 = vld [vmem:[%s5104_s27 + $0x28] sm:$0xff]  }
 0x17a   : > { %v953_v38 = vpop.xlane.xlu1 %952  ;;  %1545 = vmatprep.mubr.bf16.mxu1 %v1245_v49  ;;  %v1075_v48 = vpop.xlane.xlu0 %1074  ;;  %v1218_v63 = vmul.f32 %v4587_v33, %v5297_v51 }
 0x17b   : > { %4592 = vrsqrt.f32 %v1157_v55  ;;  %v985_v40 = vmul.f32 0.0078125, %v953_v38  ;;  %v1126_v28 = vmul.f32 0.0078125, %v1075_v48  ;;  %1546 = vmatmul.mubr.bf16.gmra.mrb[12].mxu1 %v4454_v41  ;;  %v1048_v50 = vmul.f32 %v5526_v3, %v5526_v3 }
 0x17d   : > { %v4589_v12 = vpop.eup %4588  ;;  %v5532_v26 = vsub.f32 %v4107_v57, %v985_v40  ;;  %v1158_v7 = vadd.f32 1e-05, %v1126_v28  ;;  %1110 = vadd.xlane.f32.xlu0 %v1048_v50 }
 0x17e   : > { %v1077_v27 = vpop.xlane.xlu1 %1076  ;;  %v1079_v31 = vpop.xlane.xlu0 %1078  ;;  %v1219_v58 = vmul.f32 %v4589_v12, %v5312_v0 }
 0x17f   : > { %v1127_v39 = vmul.f32 0.0078125, %v1077_v27  ;;  %v1128_v46 = vmul.f32 0.0078125, %v1079_v31  ;;  %v1049_v14 = vmul.f32 %v5532_v26, %v5532_v26  ;;  %4594 = vrsqrt.f32 %v1158_v7  ;;  %v4463_v31 = vld [vmem:[%s5104_s27 + $0x30] sm:$0xff]  }
 0x180   : > { %v1246_v47 = vpack.c.bf16 %v1219_v58, %v1218_v63 }
 0x181   : > { %v1159_v60 = vadd.f32 1e-05, %v1127_v39  ;;  %v1160_v45 = vadd.f32 1e-05, %v1128_v46  ;;  %1112 = vadd.xlane.f32.xlu1 %v1049_v14  ;;  %v4591_v61 = vpop.eup %4590 }
 0x182   : > { %v1081_v57 = vpop.xlane.xlu1 %1080  ;;  %1553 = vmatprep.mubr.bf16.mxu1 %v1246_v47  ;;  %v677_v9 = vpop.xlane.xlu0 %676  ;;  %v1220_v22 = vmul.f32 %v4591_v61, %v5327_v10 }
 0x183   : > { %4596 = vrsqrt.f32 %v1159_v60  ;;  %v1129_v51 = vmul.f32 0.0078125, %v1081_v57  ;;  %v680_v2 = vmul.f32 0.0078125, %v677_v9  ;;  %1554 = vmatmul.mubr.bf16.gmra.mrb[16].mxu1 %v4457_v1  ;;  %v4465_v57 = vld [vmem:[%s5104_s27 + $0x38] sm:$0xff]  }
 0x184   : > { %4598 = vrsqrt.f32 %v1160_v45 }
 0x185   : > { %v4593_v0 = vpop.eup %4592  ;;  %v1161_v15 = vadd.f32 1e-05, %v1129_v51  ;;  %v682_v42 = vadd.f32 1e-05, %v680_v2 }
 0x186   : > { %v679_v52 = vpop.xlane.xlu1 %678  ;;  %v1083_v32 = vpop.xlane.xlu0 %1082  ;;  %v1221_v34 = vmul.f32 %v4593_v0, %v5342_v17 }
 0x187   : > { %4600 = vrsqrt.f32 %v1161_v15  ;;  %v681_v35 = vmul.f32 0.0078125, %v679_v52  ;;  %v1130_v36 = vmul.f32 0.0078125, %v1083_v32  ;;  %v4467_v52 = vld [vmem:[%s5104_s27 + $0x48] sm:$0xff]  }
 0x188   : > { %v1247_v11 = vpack.c.bf16 %v1221_v34, %v1220_v22  ;;  %4602 = vrsqrt.f32 %v682_v42 }
 0x189   : > { %v683_v37 = vadd.f32 1e-05, %v681_v35  ;;  %v1162_v41 = vadd.f32 1e-05, %v1130_v36  ;;  %v4595_v38 = vpop.eup %4594 }
 0x18a   : > { %v1085_v49 = vpop.xlane.xlu1 %1084  ;;  %1561 = vmatprep.mubr.bf16.mxu1 %v1247_v11  ;;  %v1087_v55 = vpop.xlane.xlu0 %1086  ;;  %v1222_v50 = vmul.f32 %v4595_v38, %v5355_v13 }
 0x18b   : > { %4604 = vrsqrt.f32 %v683_v37  ;;  %v1131_v48 = vmul.f32 0.0078125, %v1085_v49  ;;  %v1132_v33 = vmul.f32 0.0078125, %v1087_v55  ;;  %1562 = vmatmul.mubr.bf16.gmra.mrb[20].mxu1 %v4460_v59 }
 0x18c   : > { %4606 = vrsqrt.f32 %v1162_v41 }
 0x18d   : > { %v4597_v10 = vpop.eup %4596  ;;  %v1163_v17 = vadd.f32 1e-05, %v1131_v48  ;;  %v1164_v40 = vadd.f32 1e-05, %v1132_v33 }
 0x18e   : > { %v1089_v28 = vpop.xlane.xlu1 %1088  ;;  %v1223_v12 = vmul.f32 %v4597_v10, %v5364_v62  ;;  %v4599_v7 = vpop.eup %4598 }
 0x18f   : > { %4608 = vrsqrt.f32 %v1163_v17  ;;  %v1133_v27 = vmul.f32 0.0078125, %v1089_v28  ;;  %v1224_v46 = vmul.f32 %v4599_v7, %v5368_v19  ;;  %v4468_v28 = vld [vmem:[%s5104_s27 + $0x50] sm:$0xff]  }
 0x190   : > { %v1248_v63 = vpack.c.bf16 %v1223_v12, %v1222_v50  ;;  %4610 = vrsqrt.f32 %v1164_v40 }
 0x191   : > { %v4601_v58 = vpop.eup %4600  ;;  %v1165_v39 = vadd.f32 1e-05, %v1133_v27 }
 0x192   : > { %1569 = vmatprep.mubr.bf16.mxu1 %v1248_v63  ;;  %v1225_v14 = vmul.f32 %v4601_v58, %v5374_v8  ;;  %v4603_v1 = vpop.eup %4602 }
 0x193   : > { %4612 = vrsqrt.f32 %v1165_v39  ;;  %1570 = vmatmul.mubr.bf16.gmra.mrb[24].mxu1 %v4463_v31  ;;  %v686_v62 = vmul.f32 %v4603_v1, %v5379_v16  ;;  %v4466_v16 = vld [vmem:[%s5104_s27 + $0x40] sm:$0xff]  }
 0x194   : > { %v1249_v13 = vpack.c.bf16 %v1225_v14, %v1224_v46  ;;  %v4469_v14 = vld [vmem:[%s5104_s27 + $0x58] sm:$0xff]  }
 0x195   : > { %v4605_v47 = vpop.eup %4604 }
 0x196   : > { %1577 = vmatprep.mubr.bf16.mxu1 %v1249_v13  ;;  %v687_v60 = vmul.f32 %v4605_v47, %v5386_v21  ;;  %v4607_v45 = vpop.eup %4606  ;;  %v4474_v47 = vld [vmem:[%s6483_s9] sm:$0xff]  }
 0x197   : > { %v1226_v19 = vmul.f32 %v4607_v45, %v5392_v24  ;;  %4341 = vmatprep.subr.bf16.mxu0 %v4474_v47 }
 0x198   : > { %v688_v9 = vpack.c.bf16 %v687_v60, %v686_v62 }
 0x199   : > { %v4609_v61 = vpop.eup %4608 }
 0x19a   : > { %4338 = vmatmul.mubr.bf16.vlgmr.msra.gmra.mrb[0].mxu0 %v688_v9  ;;  %v1227_v8 = vmul.f32 %v4609_v61, %v5400_v25  ;;  %v4611_v51 = vpop.eup %4610 }
 0x19b   : > { %1578 = vmatmul.mubr.bf16.gmra.mrb[28].mxu1 %v4465_v57  ;;  %v1228_v21 = vmul.f32 %v4611_v51, %v5404_v18  ;;  %4342 = vmatpush3.bf16.msra.mxu0 %v4474_v47  ;;  %v4475_v57 = vld [vmem:[%s6483_s9 + $0x8] sm:$0xff]   ;;  %v4470_v51 = vld [vmem:[%s5104_s27 + $0x60] sm:$0xff]  }
 0x19c   : > { %v1250_v2 = vpack.c.bf16 %v1227_v8, %v1226_v19  ;;  %4343 = vmatprep.subr.bf16.mxu0 %v4475_v57 }
 0x19d   : > { %v4613_v0 = vpop.eup %4612 }
 0x19e   : > { %1585 = vmatprep.mubr.bf16.mxu1 %v1250_v2  ;;  %v1229_v15 = vmul.f32 %v4613_v0, %v5410_v53 }
 0x19f   : > { %4344 = vmatpush3.bf16.msra.mxu0 %v4475_v57 }
 0x1a0   : > { %v1251_v42 = vpack.c.bf16 %v1229_v15, %v1228_v21  ;;  %v4476_v15 = vld [vmem:[%s6483_s9 + $0x10] sm:$0xff]  }
 0x1a1   : > { %4345 = vmatprep.subr.bf16.mxu0 %v4476_v15 }
 0x1a3   : > { %1586 = vmatmul.mubr.bf16.gmra.mrb[32].mxu1 %v4466_v16  ;;  %4346 = vmatpush3.bf16.msra.mxu0 %v4476_v15 }
 0x1a4   : > { %1593 = vmatprep.mubr.bf16.mxu1 %v1251_v42 }
 0x1ab   : > { %1594 = vmatmul.mubr.bf16.gmra.mrb[36].mxu1 %v4467_v52  ;;  %v4477_v52 = vld [vmem:[%s6483_s9 + $0x18] sm:$0xff]  }
 0x1ac   : > { %4347 = vmatprep.subr.bf16.mxu0 %v4477_v52 }
 0x1ad   : > { %4348 = vmatpush3.bf16.msra.mxu0 %v4477_v52 }
 0x1e2   : > { %v1091_v32 = vpop.xlane.xlu0 %1090 }
 0x1e3   : > { %v1134_v22 = vmul.f32 0.0078125, %v1091_v32 }
 0x1e5   : > { %v1166_v24 = vadd.f32 1e-05, %v1134_v22 }
 0x1e6   : > { %v1093_v34 = vpop.xlane.xlu1 %1092 }
 0x1e7   : > { %v1135_v25 = vmul.f32 0.0078125, %v1093_v34  ;;  %4614 = vrsqrt.f32 %v1166_v24 }
 0x1e9   : > { %v1167_v35 = vadd.f32 1e-05, %v1135_v25  ;;  %v4471_v25 = vld [vmem:[%s5104_s27 + $0x68] sm:$0xff]  }
 0x1ea   : > { %v1095_v36 = vpop.xlane.xlu0 %1094 }
 0x1eb   : > { %4616 = vrsqrt.f32 %v1167_v35  ;;  %v1136_v59 = vmul.f32 0.0078125, %v1095_v36 }
 0x1ed   : > { %v1168_v53 = vadd.f32 1e-05, %v1136_v59  ;;  %v4478_v59 = vld [vmem:[%s6483_s9 + $0x20] sm:$0xff]  }
 0x1ee   : > { %v1097_v11 = vpop.xlane.xlu1 %1096  ;;  %4349 = vmatprep.subr.bf16.mxu0 %v4478_v59 }
 0x1ef   : > { %v1137_v37 = vmul.f32 0.0078125, %v1097_v11  ;;  %4618 = vrsqrt.f32 %v1168_v53  ;;  %4350 = vmatpush3.bf16.msra.mxu0 %v4478_v59 }
 0x1f1   : > { %v1169_v18 = vadd.f32 1e-05, %v1137_v37  ;;  %v4615_v49 = vpop.eup %4614 }
 0x1f2   : > { %v1099_v41 = vpop.xlane.xlu0 %1098  ;;  %v1230_v10 = vmul.f32 %v4615_v49, %v5454_v44  ;;  %v4480_v49 = vld [vmem:[%s6483_s9 + $0x30] sm:$0xff]  }
 0x1f3   : > { %4620 = vrsqrt.f32 %v1169_v18  ;;  %v1138_v55 = vmul.f32 0.0078125, %v1099_v41  ;;  %v4472_v18 = vld [vmem:[%s5104_s27 + $0x70] sm:$0xff]  }
 0x1f5   : > { %v4617_v38 = vpop.eup %4616  ;;  %v1170_v48 = vadd.f32 1e-05, %v1138_v55 }
 0x1f6   : > { %v1101_v33 = vpop.xlane.xlu1 %1100  ;;  %v1231_v17 = vmul.f32 %v4617_v38, %v5460_v29 }
 0x1f7   : > { %v1139_v40 = vmul.f32 0.0078125, %v1101_v33  ;;  %4622 = vrsqrt.f32 %v1170_v48  ;;  %v4473_v33 = vld [vmem:[%s5104_s27 + $0x78] sm:$0xff]  }
 0x1f8   : > { %v1252_v50 = vpack.c.bf16 %v1231_v17, %v1230_v10 }
 0x1f9   : > { %v1171_v12 = vadd.f32 1e-05, %v1139_v40  ;;  %v4619_v27 = vpop.eup %4618 }
 0x1fa   : > { %1601 = vmatprep.mubr.bf16.mxu1 %v1252_v50  ;;  %v1103_v7 = vpop.xlane.xlu0 %1102  ;;  %v1232_v46 = vmul.f32 %v4619_v27, %v5466_v6 }
 0x1fb   : > { %4624 = vrsqrt.f32 %v1171_v12  ;;  %v1140_v31 = vmul.f32 0.0078125, %v1103_v7  ;;  %1602 = vmatmul.mubr.bf16.gmra.mrb[40].mxu1 %v4468_v28 }
 0x1fd   : > { %v4621_v63 = vpop.eup %4620  ;;  %v1172_v58 = vadd.f32 1e-05, %v1140_v31 }
 0x1fe   : > { %v1105_v39 = vpop.xlane.xlu1 %1104  ;;  %v1233_v44 = vmul.f32 %v4621_v63, %v5472_v23 }
 0x1ff   : > { %v1141_v29 = vmul.f32 0.0078125, %v1105_v39  ;;  %4626 = vrsqrt.f32 %v1172_v58 }
 0x200   : > { %v1253_v1 = vpack.c.bf16 %v1233_v44, %v1232_v46 }
 0x201   : > { %v1173_v13 = vadd.f32 1e-05, %v1141_v29  ;;  %v4623_v60 = vpop.eup %4622 }
 0x202   : > { %1609 = vmatprep.mubr.bf16.mxu1 %v1253_v1  ;;  %v1107_v62 = vpop.xlane.xlu0 %1106  ;;  %v1234_v61 = vmul.f32 %v4623_v60, %v5481_v56 }
 0x203   : > { %4628 = vrsqrt.f32 %v1173_v13  ;;  %v1142_v45 = vmul.f32 0.0078125, %v1107_v62  ;;  %1610 = vmatmul.mubr.bf16.gmra.mrb[44].mxu1 %v4469_v14 }
 0x205   : > { %v4625_v6 = vpop.eup %4624  ;;  %v1174_v23 = vadd.f32 1e-05, %v1142_v45 }
 0x206   : > { %v1109_v9 = vpop.xlane.xlu1 %1108  ;;  %v1235_v19 = vmul.f32 %v4625_v6, %v5487_v5 }
 0x207   : > { %v1143_v8 = vmul.f32 0.0078125, %v1109_v9  ;;  %4630 = vrsqrt.f32 %v1174_v23 }
 0x208   : > { %v1254_v2 = vpack.c.bf16 %v1235_v19, %v1234_v61 }
 0x209   : > { %v1175_v0 = vadd.f32 1e-05, %v1143_v8  ;;  %v4627_v21 = vpop.eup %4626 }
 0x20a   : > { %1617 = vmatprep.mubr.bf16.mxu1 %v1254_v2  ;;  %v1111_v16 = vpop.xlane.xlu0 %1110  ;;  %v1236_v22 = vmul.f32 %v4627_v21, %v5496_v4  ;;  %v4948_v21 = vmov 1966171168  }
 0x20b   : > { %4632 = vrsqrt.f32 %v1175_v0  ;;  %v1144_v42 = vmul.f32 0.0078125, %v1111_v16  ;;  %1618 = vmatmul.mubr.bf16.gmra.mrb[48].mxu1 %v4470_v51 }
 0x20d   : > { %v4629_v56 = vpop.eup %4628  ;;  %v1176_v5 = vadd.f32 1e-05, %v1144_v42  ;;  %v1654_v42 = vunpack.c.l.s4 %v4948_v21 }
 0x20e   : > { %v1113_v32 = vpop.xlane.xlu1 %1112  ;;  %v1237_v24 = vmul.f32 %v4629_v56, %v5502_v54  ;;  %v4479_v54 = vld [vmem:[%s6483_s9 + $0x28] sm:$0xff]   ;;  %v1656_v56 = vlaneseq }
 0x20f   : > { %v1145_v34 = vmul.f32 0.0078125, %v1113_v32  ;;  %4634 = vrsqrt.f32 %v1176_v5  ;;  %4351 = vmatprep.subr.bf16.mxu0 %v4479_v54  ;;  %v1655_v52 = vunpack.c.0.s8 %v1654_v42 }
 0x210   : > { %v1255_v35 = vpack.c.bf16 %v1237_v24, %v1236_v22  ;;  %4352 = vmatpush3.bf16.msra.mxu0 %v4479_v54  ;;  %v5601_v32 = vshrl.u32 %v1656_v56, 7 }
 0x211   : > { %v1177_v36 = vadd.f32 1e-05, %v1145_v34  ;;  %v4631_v53 = vpop.eup %4630  ;;  %4353 = vmatprep.subr.bf16.mxu0 %v4480_v49 }
 0x212   : > { %1625 = vmatprep.mubr.bf16.mxu1 %v1255_v35  ;;  %v1238_v11 = vmul.f32 %v4631_v53, %v5511_v43  ;;  %v4481_v43 = vld [vmem:[%s6483_s9 + $0x38] sm:$0xff]   ;;  %v5609_v53 = vld [vmem:[%s6482_s8] ss:$0 sm:$0xff] }
 0x213   : > { %4636 = vrsqrt.f32 %v1177_v36  ;;  %1626 = vmatmul.mubr.bf16.gmra.mrb[52].mxu1 %v4471_v25  ;;  %v5604_v36 = vsub.s32 %v1655_v52, %v5601_v32 }
 0x214   : > { %4354 = vmatpush3.bf16.msra.mxu0 %v4480_v49 }
 0x215   : > { %v4633_v4 = vpop.eup %4632  ;;  %4355 = vmatprep.subr.bf16.mxu0 %v4481_v43 }
 0x216   : > { %v1239_v37 = vmul.f32 %v4633_v4, %v5517_v20 }
 0x218   : > { %v1256_v41 = vpack.c.bf16 %v1239_v37, %v1238_v11  ;;  %4356 = vmatpush3.bf16.msra.mxu0 %v4481_v43  ;;  %v5613_v37 = vsub.s32 0, %v5601_v32 }
 0x219   : > { %v4635_v55 = vpop.eup %4634  ;;  %4389 = vmatprep.subr.bf16.mxu0 %v4946_v30 }
 0x21a   : > { %1633 = vmatprep.mubr.bf16.mxu1 %v1256_v41  ;;  %v1240_v20 = vmul.f32 %v4635_v55, %v5526_v3 }
 0x21b   : > { %1634 = vmatmul.mubr.bf16.gmra.mrb[56].mxu1 %v4472_v18 }
 0x21d   : > { %v4637_v38 = vpop.eup %4636 }
 0x21e   : > { %v1241_v48 = vmul.f32 %v4637_v38, %v5532_v26 }
 0x220   : > { %v1257_v10 = vpack.c.bf16 %v1241_v48, %v1240_v20 }
 0x222   : > { %1641 = vmatprep.mubr.bf16.mxu1 %v1257_v10 }
 0x223   : > { %1642 = vmatmul.mubr.bf16.gmra.mrb[60].mxu1 %v4473_v33 }
 0x236   : > { %v4148_v17 = vpop.f32.mrb[0].mxu1 }
 0x237   : > { %v4149_v40 = vpop.f32.mrb[1].mxu1 }
 0x238   : > { %v4150_v28 = vadd.f32 %v4149_v40, %v4148_v17  ;;  %v4151_v50 = vpop.f32.mrb[2].mxu1 }
 0x239   : > { %v4152_v12 = vpop.f32.mrb[3].mxu1 }
 0x23a   : > { %v4153_v7 = vadd.f32 %v4152_v12, %v4151_v50  ;;  %v1524_v49 = vadd.f32 %v4150_v28, %v5609_v53 }
 0x23c   : > { %v1527_v55 = vadd.f32 %v4153_v7, %v5609_v53 }
 0x23e   : > { %v4154_v27 = vpop.f32.mrb[4].mxu1 }
 0x23f   : > { %v4155_v31 = vpop.f32.mrb[5].mxu1 }
 0x240   : > { %v4156_v63 = vadd.f32 %v4155_v31, %v4154_v27  ;;  %v4157_v3 = vpop.f32.mrb[6].mxu1 }
 0x241   : > { %v4158_v58 = vpop.f32.mrb[7].mxu1 }
 0x242   : > { %v4159_v26 = vadd.f32 %v4158_v58, %v4157_v3  ;;  %v1532_v38 = vadd.f32 %v4156_v63, %v5609_v53 }
 0x244   : > { %v1535_v43 = vadd.f32 %v4159_v26, %v5609_v53 }
 0x246   : > { %v4160_v39 = vpop.f32.mrb[8].mxu1 }
 0x247   : > { %v4161_v46 = vpop.f32.mrb[9].mxu1 }
 0x248   : > { %v4162_v44 = vadd.f32 %v4161_v46, %v4160_v39  ;;  %v4163_v29 = vpop.f32.mrb[10].mxu1 }
 0x249   : > { %v4164_v14 = vpop.f32.mrb[11].mxu1 }
 0x24a   : > { %v4165_v1 = vadd.f32 %v4164_v14, %v4163_v29  ;;  %v5622_v27 = vadd.f32 %v4162_v44, %v5609_v53 }
 0x24c   : > { %v5625_v28 = vadd.f32 %v4165_v1, %v5609_v53 }
 0x24e   : > { %v4166_v13 = vpop.f32.mrb[12].mxu1 }
 0x24f   : > { %v4167_v47 = vpop.f32.mrb[13].mxu1 }
 0x250   : > { %v4168_v62 = vadd.f32 %v4167_v47, %v4166_v13  ;;  %v4169_v60 = vpop.f32.mrb[14].mxu1 }
 0x251   : > { %v4170_v45 = vpop.f32.mrb[15].mxu1 }
 0x252   : > { %v4171_v6 = vadd.f32 %v4170_v45, %v4169_v60  ;;  %v5628_v7 = vadd.f32 %v4168_v62, %v5609_v53 }
 0x254   : > { %v5631_v3 = vadd.f32 %v4171_v6, %v5609_v53 }
 0x256   : > { %v4172_v23 = vpop.f32.mrb[16].mxu1 }
 0x257   : > { %v4173_v57 = vpop.f32.mrb[17].mxu1 }
 0x258   : > { %v4174_v9 = vadd.f32 %v4173_v57, %v4172_v23  ;;  %v4175_v61 = vpop.f32.mrb[18].mxu1 }
 0x259   : > { %v4176_v19 = vpop.f32.mrb[19].mxu1 }
 0x25a   : > { %v4177_v8 = vadd.f32 %v4176_v19, %v4175_v61  ;;  %v5640_v46 = vadd.f32 %v4174_v9, %v5609_v53 }
 0x25c   : > { %v5643_v44 = vadd.f32 %v4177_v8, %v5609_v53 }
 0x25e   : > { %v4178_v51 = vpop.f32.mrb[20].mxu1 }
 0x25f   : > { %v4179_v2 = vpop.f32.mrb[21].mxu1 }
 0x260   : > { %v5599_v0 = vadd.f32 %v4179_v2, %v4178_v51  ;;  %v4181_v15 = vpop.f32.mrb[22].mxu1 }
 0x261   : > { %v4182_v16 = vpop.f32.mrb[23].mxu1 }
 0x262   : > { %v4183_v5 = vadd.f32 %v4182_v16, %v4181_v15 }
 0x264   : > { %v1567_v47 = vadd.f32 %v4183_v5, %v5609_v53 }
 0x266   : > { %v4184_v22 = vpop.f32.mrb[24].mxu1 }
 0x267   : > { %v4185_v24 = vpop.f32.mrb[25].mxu1 }
 0x268   : > { %v4186_v34 = vadd.f32 %v4185_v24, %v4184_v22  ;;  %v4187_v25 = vpop.f32.mrb[26].mxu1 }
 0x269   : > { %v4188_v35 = vpop.f32.mrb[27].mxu1 }
 0x26a   : > { %v4189_v59 = vadd.f32 %v4188_v35, %v4187_v25  ;;  %v1572_v23 = vadd.f32 %v4186_v34, %v5609_v53 }
 0x26c   : > { %v1575_v35 = vadd.f32 %v4189_v59, %v5609_v53 }
 0x26d   : > { %v787_v4 = vpop.f32.mrb[0].mxu0 }
 0x26e   : > { %v1652_v54 = vcombine.high %v787_v4, %v787_v4  ;;  %v1659_v11 = vrot.slane %v787_v4, %v5604_v36  ;;  %v4339_v18 = vpop.f32.mrb[1].mxu0  ;;  %v4190_v41 = vpop.f32.mrb[28].mxu1 }
 0x26f   : > { %v790_v20 = vpop.f32.mrb[2].mxu0  ;;  %v4191_v48 = vpop.f32.mrb[29].mxu1 }
 0x270   : > { %v1666_v33 = vrot.slane %v1652_v54, %v5604_v36  ;;  %v1667_v10 = vcombine.high %v1659_v11, %v1659_v11  ;;  %v1675_v17 = vrot.slane %v1659_v11, %v5604_v36  ;;  %v1701_v40 = vcombine.high %v790_v20, %v790_v20  ;;  %v4340_v50 = vpop.f32.mrb[3].mxu0  ;;  %v4193_v12 = vpop.f32.mrb[30].mxu1 }
 0x271   : > { %v4192_v31 = vadd.f32 %v4191_v48, %v4190_v41  ;;  %v4194_v63 = vpop.f32.mrb[31].mxu1  ;;  %v1708_v62 = vrot.slane %v790_v20, %v5604_v36  ;;  %v5682_v54 = vadd.f32 %v5599_v0, %v5609_v53 }
 0x272   : > { %v1668_v58 = vcombine.high %v1666_v33, %v1666_v33  ;;  %v5634_v26 = vrot.slane %v1666_v33, %v5604_v36  ;;  %v5637_v39 = vrot.slane %v1667_v10, %v5604_v36  ;;  %v1753_v29 = vrot.slane %v1675_v17, %v5613_v37 }
 0x273   : > { %v1715_v14 = vrot.slane %v1701_v40, %v5604_v36  ;;  %v1697_v60 = vcombine.high %v1675_v17, %v1675_v17  ;;  %v1716_v52 = vcombine.high %v1708_v62, %v1708_v62  ;;  %v5685_v41 = vrot.slane %v1708_v62, %v5604_v36 }
 0x274   : > { %v1696_v1 = vrot.slane %v1668_v58, %v5604_v36  ;;  %v1757_v13 = vrot.slane %v5637_v39, %v5613_v37  ;;  %v5652_v45 = vadd.f32 %v1753_v29, %v1524_v49  ;;  %v5654_v6 = vadd.f32 %v1753_v29, %v1527_v55 }
 0x275   : > { %v1698_v57 = vcombine.high %v5634_v26, %v5634_v26  ;;  %v1717_v15 = vcombine.high %v1715_v14, %v1715_v14  ;;  %v5669_v16 = vrot.slane %v1715_v14, %v5604_v36  ;;  %v1699_v49 = vcombine.high %v5637_v39, %v5637_v39 }
 0x276   : > { %v5659_v9 = vadd.f32 %v1757_v13, %v1532_v38  ;;  %v5661_v61 = vadd.f32 %v1757_v13, %v1535_v43  ;;  %v5664_v19 = vrot.slane %v1696_v1, %v5613_v37  ;;  %v4196_v8 = vpop.f32.mrb[32].mxu1  ;;  %v1862_v51 = vsub.f32 0.0, %v5652_v45 }
 0x277   : > { %v1863_v2 = vsub.f32 0.0, %v5654_v6  ;;  %v4197_v21 = vpop.f32.mrb[33].mxu1  ;;  %v5677_v25 = vrot.slane %v1717_v15, %v5604_v36  ;;  %v1761_v55 = vrot.slane %v1697_v60, %v5613_v37  ;;  %v1777_v38 = vrot.slane %v1698_v57, %v5613_v37 }
 0x278   : > { %v1864_v42 = vsub.f32 0.0, %v5659_v9  ;;  %v1865_v56 = vsub.f32 0.0, %v5661_v61  ;;  %v5674_v5 = vadd.f32 %v5664_v19, %v1567_v47  ;;  %v4199_v22 = vpop.f32.mrb[34].mxu1  ;;  %v1894_v24 = vmul.f32 1.442695, %v1862_v51 }
 0x279   : > { %v1896_v34 = vmul.f32 1.442695, %v1863_v2  ;;  %v4200_v4 = vpop.f32.mrb[35].mxu1  ;;  %v5692_v59 = vrot.slane %v1716_v52, %v5604_v36  ;;  %v1580_v0 = vadd.f32 %v4192_v31, %v5609_v53  ;;  %v1700_v43 = vcombine.high %v1696_v1, %v1696_v1 }
 0x27a   : > { %v1898_v11 = vmul.f32 1.442695, %v1864_v42  ;;  %v1900_v18 = vmul.f32 1.442695, %v1865_v56  ;;  %4638 = vpow2.f32 %v1894_v24  ;;  %v5695_v20 = vadd.f32 %v1777_v38, %v1572_v23 }
 0x27b   : > { %4640 = vpow2.f32 %v1896_v34  ;;  %v5697_v48 = vadd.f32 %v1777_v38, %v1575_v35  ;;  %v4195_v33 = vadd.f32 %v4194_v63, %v4193_v12  ;;  %v1781_v10 = vrot.slane %v1700_v43, %v5613_v37 }
 0x27c   : > { %4642 = vpow2.f32 %v1898_v11  ;;  %v4198_v17 = vadd.f32 %v4197_v21, %v4196_v8  ;;  %v4201_v40 = vadd.f32 %v4200_v4, %v4199_v22  ;;  %v1785_v58 = vrot.slane %v5685_v41, %v5613_v37 }
 0x27d   : > { %4644 = vpow2.f32 %v1900_v18  ;;  %v1874_v36 = vsub.f32 0.0, %v5695_v20  ;;  %v1875_v31 = vsub.f32 0.0, %v5697_v48  ;;  %v1583_v39 = vadd.f32 %v4195_v33, %v5609_v53 }
 0x27e   : > { %v4202_v50 = vpop.f32.mrb[36].mxu1  ;;  %v5705_v14 = vadd.f32 %v1781_v10, %v1580_v0  ;;  %v1588_v12 = vadd.f32 %v4198_v17, %v5609_v53  ;;  %v1591_v63 = vadd.f32 %v4201_v40, %v5609_v53  ;;  %v1789_v23 = vrot.slane %v5692_v59, %v5613_v37 }
 0x27f   : > { %v4203_v29 = vpop.f32.mrb[37].mxu1  ;;  %v1918_v47 = vmul.f32 1.442695, %v1874_v36  ;;  %v1920_v62 = vmul.f32 1.442695, %v1875_v31  ;;  %v5709_v60 = vadd.f32 %v1781_v10, %v1583_v39  ;;  %v5721_v56 = vadd.f32 %v1761_v55, %v5622_v27 }
 0x280   : > { %v4204_v1 = vadd.f32 %v4203_v29, %v4202_v50  ;;  %v4205_v13 = vpop.f32.mrb[38].mxu1  ;;  %v1876_v8 = vsub.f32 0.0, %v5705_v14  ;;  %v5714_v51 = vadd.f32 %v1785_v58, %v1588_v12  ;;  %v5716_v2 = vadd.f32 %v1785_v58, %v1591_v63 }
 0x281   : > { %v4206_v57 = vpop.f32.mrb[39].mxu1  ;;  %4646 = vpow2.f32 %v1918_v47  ;;  %v1877_v21 = vsub.f32 0.0, %v5709_v60  ;;  %v1873_v52 = vsub.f32 0.0, %v5674_v5  ;;  %v5729_v18 = vadd.f32 %v1761_v55, %v5625_v28 }
 0x282   : > { %v1596_v15 = vadd.f32 %v4204_v1, %v5609_v53  ;;  %v4207_v42 = vadd.f32 %v4206_v57, %v4205_v13  ;;  %4648 = vpow2.f32 %v1920_v62  ;;  %v1922_v22 = vmul.f32 1.442695, %v1876_v8  ;;  %v5765_v57 = vld [vmem:[%s5759_s21] sm:$0xff] }
 0x283   : > { %v1878_v24 = vsub.f32 0.0, %v5714_v51  ;;  %v1924_v35 = vmul.f32 1.442695, %v1877_v21  ;;  %v1765_v0 = vrot.slane %v1699_v49, %v5613_v37  ;;  %v1879_v43 = vsub.f32 0.0, %v5716_v2 }
 0x284   : > { %v4639_v34 = vpop.eup %4638  ;;  %v5725_v4 = vadd.f32 %v1789_v23, %v1596_v15  ;;  %v1599_v11 = vadd.f32 %v4207_v42, %v5609_v53  ;;  %4650 = vpow2.f32 %v1922_v22  ;;  %v1769_v58 = vrot.slane %v5634_v26, %v5613_v37 }
 0x285   : > { %v4641_v38 = vpop.eup %4640  ;;  %v1958_v27 = vadd.f32 1.0, %v4639_v34  ;;  %4652 = vpow2.f32 %v1924_v35  ;;  %v1916_v55 = vmul.f32 1.442695, %v1873_v52  ;;  %v1926_v36 = vmul.f32 1.442695, %v1878_v24  ;;  %v5770_v24 = vld [vmem:[%s5759_s21 + $0x8] sm:$0xff] }
 0x286   : > { %v4643_v33 = vpop.eup %4642  ;;  %v1959_v10 = vadd.f32 1.0, %v4641_v38  ;;  %v1880_v17 = vsub.f32 0.0, %v5725_v4  ;;  %v5734_v40 = vadd.f32 %v1789_v23, %v1599_v11  ;;  %v1928_v31 = vmul.f32 1.442695, %v1879_v43 }
 0x287   : > { %v4645_v50 = vpop.eup %4644  ;;  %v1960_v28 = vadd.f32 1.0, %v4643_v33  ;;  %4654 = vrcp.f32 %v1958_v27  ;;  %v5740_v12 = vadd.f32 %v1765_v0, %v5628_v7  ;;  %v5743_v63 = vadd.f32 %v1765_v0, %v5631_v3 }
 0x288   : > { %v1961_v49 = vadd.f32 1.0, %v4645_v50  ;;  %4656 = vrcp.f32 %v1959_v10  ;;  %v1881_v39 = vsub.f32 0.0, %v5734_v40  ;;  %v1930_v29 = vmul.f32 1.442695, %v1880_v17 }
 0x289   : > { %4658 = vrcp.f32 %v1960_v28  ;;  %v5746_v26 = vadd.f32 %v1769_v58, %v5640_v46  ;;  %v5749_v1 = vadd.f32 %v1769_v58, %v5643_v44  ;;  %v5753_v13 = vadd.f32 %v5664_v19, %v5682_v54 }
 0x28a   : > { %4660 = vrcp.f32 %v1961_v49  ;;  %v1866_v7 = vsub.f32 0.0, %v5721_v56  ;;  %v1932_v44 = vmul.f32 1.442695, %v1881_v39  ;;  %v1867_v62 = vsub.f32 0.0, %v5729_v18 }
 0x28b   : > { %4662 = vpow2.f32 %v1916_v55  ;;  %v4647_v47 = vpop.eup %4646  ;;  %v1868_v19 = vsub.f32 0.0, %v5740_v12  ;;  %v1869_v8 = vsub.f32 0.0, %v5743_v63  ;;  %v1870_v52 = vsub.f32 0.0, %v5746_v26 }
 0x28c   : > { %4664 = vpow2.f32 %v1926_v36  ;;  %v4649_v3 = vpop.eup %4648  ;;  %v1970_v46 = vadd.f32 1.0, %v4647_v47  ;;  %v1902_v42 = vmul.f32 1.442695, %v1866_v7  ;;  %v1904_v35 = vmul.f32 1.442695, %v1867_v62 }
 0x28d   : > { %4666 = vpow2.f32 %v1928_v31  ;;  %v1971_v23 = vadd.f32 1.0, %v4649_v3  ;;  %v1871_v11 = vsub.f32 0.0, %v5749_v1  ;;  %v1906_v27 = vmul.f32 1.442695, %v1868_v19 }
 0x28e   : > { %4668 = vpow2.f32 %v1930_v29  ;;  %v4651_v54 = vpop.eup %4650  ;;  %v2499_v43 = vrot.slane %v5765_v57, %v5613_v37  ;;  %v1908_v17 = vmul.f32 1.442695, %v1869_v8  ;;  %v5778_v50 = vsub.s32 1, %v5601_v32 }
 0x28f   : > { %4670 = vrcp.f32 %v1970_v46  ;;  %v4653_v15 = vpop.eup %4652  ;;  %v1972_v21 = vadd.f32 1.0, %v4651_v54  ;;  %v1910_v55 = vmul.f32 1.442695, %v1870_v52  ;;  %v1912_v3 = vmul.f32 1.442695, %v1871_v11 }
 0x290   : > { %4672 = vrcp.f32 %v1971_v23  ;;  %v1973_v34 = vadd.f32 1.0, %v4653_v15  ;;  %2505 = vbcast.lane.b32.xlu1 %v2499_v43, 264  ;;  %2501 = vbcast.lane.b32.xlu0 %v2499_v43, 256  ;;  %v2510_v29 = vrot.slane %v5765_v57, %v5778_v50  ;;  %v5790_v62 = vsub.s32 2, %v5601_v32 }
 0x291   : > { %v4655_v22 = vpop.eup %4654  ;;  %4674 = vpow2.f32 %v1932_v44 }
 0x292   : > { %v4657_v38 = vpop.eup %4656  ;;  %4676 = vrcp.f32 %v1972_v21  ;;  %v2022_v0 = vmul.f32 %v4655_v22, %v5652_v45  ;;  %v2587_v45 = vrot.slane %v5770_v24, %v5613_v37 }
 0x293   : > { %v4659_v33 = vpop.eup %4658  ;;  %4678 = vrcp.f32 %v1973_v34  ;;  %v2023_v10 = vmul.f32 %v4657_v38, %v5654_v6  ;;  %v1872_v6 = vsub.f32 0.0, %v5753_v13  ;;  %v2521_v34 = vrot.slane %v5765_v57, %v5790_v62 }
 0x294   : > { %v4661_v58 = vpop.eup %4660  ;;  %v2024_v28 = vmul.f32 %v4659_v33, %v5659_v9  ;;  %4680 = vpow2.f32 %v1902_v42  ;;  %2512 = vbcast.lane.b32.xlu1 %v2510_v29, 256  ;;  %2589 = vbcast.lane.b32.xlu0 %v2587_v45, 256 }
 0x295   : > { %v4663_v49 = vpop.eup %4662  ;;  %v2054_v36 = vpack.c.bf16 %v2023_v10, %v2022_v0  ;;  %v2025_v31 = vmul.f32 %v4661_v58, %v5661_v61  ;;  %4682 = vpow2.f32 %v1904_v35  ;;  %v2598_v61 = vrot.slane %v5770_v24, %v5778_v50 }
 0x296   : > { %v4665_v39 = vpop.eup %4664  ;;  %4684 = vpow2.f32 %v1906_v27  ;;  %v1914_v54 = vmul.f32 1.442695, %v1872_v6 }
 0x297   : > { %v4667_v9 = vpop.eup %4666  ;;  %v1974_v47 = vadd.f32 1.0, %v4665_v39  ;;  %4357 = vmatprep.mubr.bf16.mxu0 %v2054_v36  ;;  %v2055_v7 = vpack.c.bf16 %v2025_v31, %v2024_v28  ;;  %4686 = vpow2.f32 %v1908_v17  ;;  %v2609_v17 = vrot.slane %v5770_v24, %v5790_v62 }
 0x298   : > { %v4669_v46 = vpop.eup %4668  ;;  %v1975_v44 = vadd.f32 1.0, %v4667_v9  ;;  %4688 = vpow2.f32 %v1910_v55  ;;  %2516 = vbcast.lane.b32.xlu1 %v2510_v29, 264  ;;  %2600 = vbcast.lane.b32.xlu0 %v2598_v61, 256  ;;  %v1969_v55 = vadd.f32 1.0, %v4663_v49 }
 0x299   : > { %v4671_v23 = vpop.eup %4670  ;;  %4690 = vrcp.f32 %v1974_v47  ;;  %v1976_v19 = vadd.f32 1.0, %v4669_v46  ;;  %4358 = vmatmul.mubr.bf16.vlgmr.msra.gmra.mrb[4].mxu0 %v2055_v7 }
 0x29a   : > { %v4673_v8 = vpop.eup %4672  ;;  %4692 = vrcp.f32 %v1975_v44  ;;  %v5793_v15 = vmul.f32 %v4671_v23, %v5695_v20 }
 0x29b   : > { %v4675_v21 = vpop.eup %4674  ;;  %4694 = vrcp.f32 %v1976_v19  ;;  %v5796_v42 = vmul.f32 %v4673_v8, %v5697_v48 }
 0x29c   : > { %v4677_v52 = vpop.eup %4676  ;;  %v1977_v22 = vadd.f32 1.0, %v4675_v21  ;;  %4696 = vpow2.f32 %v1912_v3  ;;  %2593 = vbcast.lane.b32.xlu1 %v2587_v45, 264  ;;  %2523 = vbcast.lane.b32.xlu0 %v2521_v34, 256 }
 0x29d   : > { %v4679_v35 = vpop.eup %4678  ;;  %4698 = vpow2.f32 %v1914_v54  ;;  %v2060_v11 = vpack.c.bf16 %v5796_v42, %v5793_v15  ;;  %v5803_v20 = vmul.f32 %v4677_v52, %v5705_v14  ;;  %v5813_v14 = vsub.s32 3, %v5601_v32 }
 0x29e   : > { %v4681_v38 = vpop.eup %4680  ;;  %4700 = vrcp.f32 %v1977_v22  ;;  %v5806_v48 = vmul.f32 %v4679_v35, %v5709_v60  ;;  %v1746_v42 = vcombine.high %v5685_v41, %v5685_v41 }
 0x29f   : > { %v4683_v0 = vpop.eup %4682  ;;  %v1962_v27 = vadd.f32 1.0, %v4681_v38  ;;  %v2532_v45 = vrot.slane %v5765_v57, %v5813_v14  ;;  %v2620_v23 = vrot.slane %v5770_v24, %v5813_v14 }
 0x2a0   : > { %v4685_v43 = vpop.eup %4684  ;;  %v1963_v33 = vadd.f32 1.0, %v4683_v0  ;;  %v2061_v10 = vpack.c.bf16 %v5806_v48, %v5803_v20  ;;  %2604 = vbcast.lane.b32.xlu1 %v2598_v61, 264  ;;  %2611 = vbcast.lane.b32.xlu0 %v2609_v17, 256 }
 0x2a1   : > { %v4687_v58 = vpop.eup %4686  ;;  %4702 = vrcp.f32 %v1962_v27  ;;  %v1964_v28 = vadd.f32 1.0, %v4685_v43 }
 0x2a2   : > { %v4689_v60 = vpop.eup %4688  ;;  %4704 = vrcp.f32 %v1963_v33  ;;  %v1965_v36 = vadd.f32 1.0, %v4687_v58 }
 0x2a3   : > { %v4691_v31 = vpop.eup %4690  ;;  %4706 = vrcp.f32 %v1964_v28  ;;  %v1966_v6 = vadd.f32 1.0, %v4689_v60 }
 0x2a4   : > { %v4693_v39 = vpop.eup %4692  ;;  %4708 = vrcp.f32 %v1965_v36  ;;  %v5818_v9 = vmul.f32 %v4691_v31, %v5714_v51  ;;  %2527 = vbcast.lane.b32.xlu1 %v2521_v34, 264  ;;  %2534 = vbcast.lane.b32.xlu0 %v2532_v45, 256  ;;  %v2542_v51 = vsub.s32 4, %v5601_v32 }
 0x2a5   : > { %v4695_v29 = vpop.eup %4694  ;;  %4710 = vrcp.f32 %v1966_v6  ;;  %v5821_v47 = vmul.f32 %v4693_v39, %v5716_v2  ;;  %v2564_v6 = vsub.s32 6, %v5601_v32 }
 0x2a6   : > { %v4697_v49 = vpop.eup %4696  ;;  %4712 = vrcp.f32 %v1969_v55  ;;  %v2040_v2 = vmul.f32 %v4695_v29, %v5725_v4  ;;  %v2543_v22 = vrot.slane %v5765_v57, %v2542_v51  ;;  %v2631_v33 = vrot.slane %v5770_v24, %v2542_v51 }
 0x2a7   : > { %v4699_v7 = vpop.eup %4698  ;;  %v1967_v3 = vadd.f32 1.0, %v4697_v49  ;;  %v2062_v46 = vpack.c.bf16 %v5821_v47, %v5818_v9  ;;  %v1748_v49 = vcombine.high %v5692_v59, %v5692_v59 }
 0x2a8   : > { %v4701_v44 = vpop.eup %4700  ;;  %v1968_v61 = vadd.f32 1.0, %v4699_v7  ;;  %2615 = vbcast.lane.b32.xlu1 %v2609_v17, 264  ;;  %2622 = vbcast.lane.b32.xlu0 %v2620_v23, 256  ;;  %v2553_v17 = vsub.s32 5, %v5601_v32 }
 0x2a9   : > { %4714 = vrcp.f32 %v1967_v3  ;;  %v2041_v19 = vmul.f32 %v4701_v44, %v5734_v40 }
 0x2aa   : > { %4716 = vrcp.f32 %v1968_v61  ;;  %v2554_v55 = vrot.slane %v5765_v57, %v2553_v17 }
 0x2ab   : > { %v4703_v54 = vpop.eup %4702  ;;  %v2063_v8 = vpack.c.bf16 %v2041_v19, %v2040_v2  ;;  %v1797_v2 = vrot.slane %v1748_v49, %v5613_v37 }
 0x2ac   : > { %v4705_v21 = vpop.eup %4704  ;;  %v2026_v52 = vmul.f32 %v4703_v54, %v5721_v56  ;;  %2538 = vbcast.lane.b32.xlu1 %v2532_v45, 264  ;;  %2545 = vbcast.lane.b32.xlu0 %v2543_v22, 256 }
 0x2ad   : > { %v4707_v34 = vpop.eup %4706  ;;  %v2027_v35 = vmul.f32 %v4705_v21, %v5729_v18 }
 0x2ae   : > { %v4709_v38 = vpop.eup %4708  ;;  %v2028_v0 = vmul.f32 %v4707_v34, %v5740_v12 }
 0x2af   : > { %v4711_v27 = vpop.eup %4710  ;;  %v2056_v4 = vpack.c.bf16 %v2027_v35, %v2026_v52  ;;  %v2029_v40 = vmul.f32 %v4709_v38, %v5743_v63 }
 0x2b0   : > { %v4713_v43 = vpop.eup %4712  ;;  %v2030_v58 = vmul.f32 %v4711_v27, %v5746_v26  ;;  %2626 = vbcast.lane.b32.xlu1 %v2620_v23, 264  ;;  %2633 = vbcast.lane.b32.xlu0 %v2631_v33, 256  ;;  %v2642_v26 = vrot.slane %v5770_v24, %v2553_v17 }
 0x2b1   : > { %4361 = vmatprep.mubr.bf16.mxu0 %v2056_v4  ;;  %v2057_v56 = vpack.c.bf16 %v2029_v40, %v2028_v0  ;;  %v2033_v18 = vmul.f32 %v4713_v43, %v5674_v5  ;;  %v2565_v5 = vrot.slane %v5765_v57, %v2564_v6  ;;  %v1801_v43 = vrot.slane %v5669_v16, %v5613_v37 }
 0x2b3   : > { %v4715_v28 = vpop.eup %4714  ;;  %4362 = vmatmul.mubr.bf16.gmra.mrb[8].mxu0 %v2057_v56 }
 0x2b4   : > { %v4717_v12 = vpop.eup %4716  ;;  %v2031_v60 = vmul.f32 %v4715_v28, %v5749_v1  ;;  %2549 = vbcast.lane.b32.xlu1 %v2543_v22, 264  ;;  %2556 = vbcast.lane.b32.xlu0 %v2554_v55, 256  ;;  %v2653_v1 = vrot.slane %v5770_v24, %v2564_v6 }
 0x2b5   : > { %v2032_v63 = vmul.f32 %v4717_v12, %v5753_v13  ;;  %v2575_v13 = vsub.s32 7, %v5601_v32 }
 0x2b6   : > { %v2058_v36 = vpack.c.bf16 %v2031_v60, %v2030_v58 }
 0x2b7   : > { %v2059_v31 = vpack.c.bf16 %v2033_v18, %v2032_v63  ;;  %v2576_v15 = vrot.slane %v5765_v57, %v2575_v13 }
 0x2b8   : > { %4365 = vmatprep.mubr.bf16.mxu0 %v2058_v36  ;;  %2637 = vbcast.lane.b32.xlu1 %v2631_v33, 264 }
 0x2b9   : > { %2644 = vbcast.lane.b32.xlu0 %v2642_v26, 256 }
 0x2bb   : > { %4366 = vmatmul.mubr.bf16.gmra.mrb[12].mxu0 %v2059_v31 }
 0x2bc   : > { %4369 = vmatprep.mubr.bf16.mxu0 %v2060_v11  ;;  %2560 = vbcast.lane.b32.xlu1 %v2554_v55, 264 }
 0x2bd   : > { %2567 = vbcast.lane.b32.xlu0 %v2565_v5, 256 }
 0x2c0   : > { %2648 = vbcast.lane.b32.xlu1 %v2642_v26, 264 }
 0x2c1   : > { %2655 = vbcast.lane.b32.xlu0 %v2653_v1, 256 }
 0x2c3   : > { %4370 = vmatmul.mubr.bf16.gmra.mrb[16].mxu0 %v2061_v10  ;;  %v1793_v10 = vrot.slane %v1746_v42, %v5613_v37 }
 0x2c4   : > { %4373 = vmatprep.mubr.bf16.mxu0 %v2062_v46  ;;  %2571 = vbcast.lane.b32.xlu1 %v2565_v5, 264 }
 0x2c5   : > { %2578 = vbcast.lane.b32.xlu0 %v2576_v15, 256 }
 0x2c8   : > { %2659 = vbcast.lane.b32.xlu1 %v2653_v1, 264 }
 0x2cb   : > { %4374 = vmatmul.mubr.bf16.gmra.mrb[20].mxu0 %v2063_v8 }
 0x2cc   : > { %2582 = vbcast.lane.b32.xlu1 %v2576_v15, 264 }
 0x2ce   : > { %v4208_v11 = vpop.f32.mrb[40].mxu1 }
 0x2cf   : > { %v4209_v39 = vpop.f32.mrb[41].mxu1 }
 0x2d0   : > { %v4210_v45 = vadd.f32 %v4209_v39, %v4208_v11  ;;  %v4211_v29 = vpop.f32.mrb[42].mxu1  ;;  %v1805_v11 = vrot.slane %v5677_v25, %v5613_v37 }
 0x2d1   : > { %v4212_v20 = vpop.f32.mrb[43].mxu1 }
 0x2d2   : > { %v1604_v48 = vadd.f32 %v4210_v45, %v5609_v53  ;;  %v4213_v9 = vadd.f32 %v4212_v20, %v4211_v29 }
 0x2d4   : > { %v5860_v47 = vadd.f32 %v1793_v10, %v1604_v48  ;;  %v1607_v57 = vadd.f32 %v4213_v9, %v5609_v53 }
 0x2d6   : > { %v1882_v41 = vsub.f32 0.0, %v5860_v47  ;;  %v5866_v7 = vadd.f32 %v1793_v10, %v1607_v57  ;;  %v4214_v3 = vpop.f32.mrb[44].mxu1  ;;  %v1747_v57 = vcombine.high %v5669_v16, %v5669_v16 }
 0x2d7   : > { %v4215_v46 = vpop.f32.mrb[45].mxu1 }
 0x2d8   : > { %v1934_v44 = vmul.f32 1.442695, %v1882_v41  ;;  %v1883_v61 = vsub.f32 0.0, %v5866_v7  ;;  %v4216_v23 = vadd.f32 %v4215_v46, %v4214_v3  ;;  %v4217_v51 = vpop.f32.mrb[46].mxu1 }
 0x2d9   : > { %v4218_v19 = vpop.f32.mrb[47].mxu1 }
 0x2da   : > { %4718 = vpow2.f32 %v1934_v44  ;;  %v1936_v54 = vmul.f32 1.442695, %v1883_v61  ;;  %v1612_v8 = vadd.f32 %v4216_v23, %v5609_v53  ;;  %v4219_v21 = vadd.f32 %v4218_v19, %v4217_v51 }
 0x2dc   : > { %4720 = vpow2.f32 %v1936_v54  ;;  %v5871_v59 = vadd.f32 %v1797_v2, %v1612_v8  ;;  %v1615_v52 = vadd.f32 %v4219_v21, %v5609_v53  ;;  %v1809_v21 = vrot.slane %v1747_v57, %v5613_v37 }
 0x2de   : > { %v1884_v22 = vsub.f32 0.0, %v5871_v59  ;;  %v5875_v34 = vadd.f32 %v1797_v2, %v1615_v52  ;;  %v4220_v35 = vpop.f32.mrb[48].mxu1 }
 0x2df   : > { %v4221_v38 = vpop.f32.mrb[49].mxu1 }
 0x2e0   : > { %v1938_v0 = vmul.f32 1.442695, %v1884_v22  ;;  %v1885_v27 = vsub.f32 0.0, %v5875_v34  ;;  %v4222_v4 = vadd.f32 %v4221_v38, %v4220_v35  ;;  %v4223_v40 = vpop.f32.mrb[50].mxu1 }
 0x2e1   : > { %v4224_v33 = vpop.f32.mrb[51].mxu1 }
 0x2e2   : > { %4722 = vpow2.f32 %v1938_v0  ;;  %v1940_v56 = vmul.f32 1.442695, %v1885_v27  ;;  %v1620_v17 = vadd.f32 %v4222_v4, %v5609_v53  ;;  %v4225_v58 = vadd.f32 %v4224_v33, %v4223_v40 }
 0x2e4   : > { %v4719_v28 = vpop.eup %4718  ;;  %4724 = vpow2.f32 %v1940_v56  ;;  %v5881_v18 = vadd.f32 %v1801_v43, %v1620_v17  ;;  %v1623_v12 = vadd.f32 %v4225_v58, %v5609_v53  ;;  %v1749_v56 = vcombine.high %v5677_v25, %v5677_v25 }
 0x2e5   : > { %v1978_v60 = vadd.f32 1.0, %v4719_v28 }
 0x2e6   : > { %v4721_v63 = vpop.eup %4720  ;;  %v1886_v55 = vsub.f32 0.0, %v5881_v18  ;;  %v5885_v36 = vadd.f32 %v1801_v43, %v1623_v12  ;;  %v4226_v31 = vpop.f32.mrb[52].mxu1  ;;  %v1813_v25 = vrot.slane %v1749_v56, %v5613_v37 }
 0x2e7   : > { %4726 = vrcp.f32 %v1978_v60  ;;  %v1979_v26 = vadd.f32 1.0, %v4721_v63  ;;  %v4227_v6 = vpop.f32.mrb[53].mxu1 }
 0x2e8   : > { %v1942_v5 = vmul.f32 1.442695, %v1886_v55  ;;  %v1887_v1 = vsub.f32 0.0, %v5885_v36  ;;  %v4228_v15 = vadd.f32 %v4227_v6, %v4226_v31  ;;  %v4229_v42 = vpop.f32.mrb[54].mxu1 }
 0x2e9   : > { %4728 = vrcp.f32 %v1979_v26  ;;  %v4230_v39 = vpop.f32.mrb[55].mxu1 }
 0x2ea   : > { %4730 = vpow2.f32 %v1942_v5  ;;  %v1944_v45 = vmul.f32 1.442695, %v1887_v1  ;;  %v1628_v29 = vadd.f32 %v4228_v15, %v5609_v53  ;;  %v4231_v20 = vadd.f32 %v4230_v39, %v4229_v42 }
 0x2ec   : > { %v4723_v48 = vpop.eup %4722  ;;  %4732 = vpow2.f32 %v1944_v45  ;;  %v5891_v10 = vadd.f32 %v1805_v11, %v1628_v29  ;;  %v1631_v9 = vadd.f32 %v4231_v20, %v5609_v53 }
 0x2ed   : > { %v1980_v49 = vadd.f32 1.0, %v4723_v48 }
 0x2ee   : > { %v4725_v41 = vpop.eup %4724  ;;  %v1888_v3 = vsub.f32 0.0, %v5891_v10  ;;  %v5897_v46 = vadd.f32 %v1805_v11, %v1631_v9  ;;  %v4232_v44 = vpop.f32.mrb[56].mxu1 }
 0x2ef   : > { %4734 = vrcp.f32 %v1980_v49  ;;  %v1981_v61 = vadd.f32 1.0, %v4725_v41  ;;  %v4233_v23 = vpop.f32.mrb[57].mxu1 }
 0x2f0   : > { %v1946_v51 = vmul.f32 1.442695, %v1888_v3  ;;  %v1889_v2 = vsub.f32 0.0, %v5897_v46  ;;  %v4234_v19 = vadd.f32 %v4233_v23, %v4232_v44  ;;  %v4235_v54 = vpop.f32.mrb[58].mxu1 }
 0x2f1   : > { %v4727_v8 = vpop.eup %4726  ;;  %4736 = vrcp.f32 %v1981_v61  ;;  %v4236_v16 = vpop.f32.mrb[59].mxu1 }
 0x2f2   : > { %4738 = vpow2.f32 %v1946_v51  ;;  %v1948_v52 = vmul.f32 1.442695, %v1889_v2  ;;  %v1636_v22 = vadd.f32 %v4234_v19, %v5609_v53  ;;  %v4237_v35 = vadd.f32 %v4236_v16, %v4235_v54 }
 0x2f3   : > { %v4729_v38 = vpop.eup %4728  ;;  %v2042_v0 = vmul.f32 %v4727_v8, %v5860_v47 }
 0x2f4   : > { %v4731_v27 = vpop.eup %4730  ;;  %4740 = vpow2.f32 %v1948_v52  ;;  %v5903_v4 = vadd.f32 %v1809_v21, %v1636_v22  ;;  %v1639_v40 = vadd.f32 %v4237_v35, %v5609_v53  ;;  %v2043_v43 = vmul.f32 %v4729_v38, %v5866_v7 }
 0x2f5   : > { %v1982_v33 = vadd.f32 1.0, %v4731_v27 }
 0x2f6   : > { %v4733_v17 = vpop.eup %4732  ;;  %v1890_v58 = vsub.f32 0.0, %v5903_v4  ;;  %v5910_v28 = vadd.f32 %v1809_v21, %v1639_v40  ;;  %v4238_v12 = vpop.f32.mrb[60].mxu1  ;;  %v2064_v60 = vpack.c.bf16 %v2043_v43, %v2042_v0 }
 0x2f7   : > { %4742 = vrcp.f32 %v1982_v33  ;;  %v1983_v47 = vadd.f32 1.0, %v4733_v17  ;;  %v4239_v63 = vpop.f32.mrb[61].mxu1 }
 0x2f8   : > { %v1950_v55 = vmul.f32 1.442695, %v1890_v58  ;;  %v1891_v31 = vsub.f32 0.0, %v5910_v28  ;;  %v4240_v26 = vadd.f32 %v4239_v63, %v4238_v12  ;;  %v4241_v6 = vpop.f32.mrb[62].mxu1  ;;  %4377 = vmatprep.mubr.bf16.mxu0 %v2064_v60  ;;  %v2664_v63 = vrot.slane %v5770_v24, %v2575_v13 }
 0x2f9   : > { %v4735_v7 = vpop.eup %4734  ;;  %4744 = vrcp.f32 %v1983_v47  ;;  %v4242_v5 = vpop.f32.mrb[63].mxu1 }
 0x2fa   : > { %4746 = vpow2.f32 %v1950_v55  ;;  %v1952_v1 = vmul.f32 1.442695, %v1891_v31  ;;  %v1644_v15 = vadd.f32 %v4240_v26, %v5609_v53  ;;  %v4243_v42 = vadd.f32 %v4242_v5, %v4241_v6  ;;  %2666 = vbcast.lane.b32.xlu0 %v2664_v63, 256  ;;  %2670 = vbcast.lane.b32.xlu1 %v2664_v63, 264  ;;  %v5940_v26 = vld [vmem:[%s6484_s10] ss:$0 sm:$0xff] }
 0x2fb   : > { %v4737_v11 = vpop.eup %4736  ;;  %v2044_v39 = vmul.f32 %v4735_v7, %v5871_v59 }
 0x2fc   : > { %v4739_v45 = vpop.eup %4738  ;;  %4748 = vpow2.f32 %v1952_v1  ;;  %v1860_v29 = vadd.f32 %v1813_v25, %v1644_v15  ;;  %v1647_v20 = vadd.f32 %v4243_v42, %v5609_v53  ;;  %v2045_v48 = vmul.f32 %v4737_v11, %v5875_v34 }
 0x2fd   : > { %v1984_v9 = vadd.f32 1.0, %v4739_v45 }
 0x2fe   : > { %v4741_v57 = vpop.eup %4740  ;;  %v1892_v49 = vsub.f32 0.0, %v1860_v29  ;;  %v1861_v41 = vadd.f32 %v1813_v25, %v1647_v20  ;;  %v2065_v3 = vpack.c.bf16 %v2045_v48, %v2044_v39 }
 0x2ff   : > { %4750 = vrcp.f32 %v1984_v9  ;;  %v1985_v44 = vadd.f32 1.0, %v4741_v57 }
 0x300   : > { %v1954_v61 = vmul.f32 1.442695, %v1892_v49  ;;  %v1893_v23 = vsub.f32 0.0, %v1861_v41  ;;  %4378 = vmatmul.mubr.bf16.gmra.mrb[24].mxu0 %v2065_v3 }
 0x301   : > { %v4743_v51 = vpop.eup %4742  ;;  %4752 = vrcp.f32 %v1985_v44 }
 0x302   : > { %4754 = vpow2.f32 %v1954_v61  ;;  %v1956_v59 = vmul.f32 1.442695, %v1893_v23  ;;  %v2046_v53 = vmul.f32 %v4743_v51, %v5881_v18  ;;  %v5933_v55 = vpop.permute.xlu0 %2501 }
 0x303   : > { %v4745_v2 = vpop.eup %4744 }
 0x304   : > { %v4747_v19 = vpop.eup %4746  ;;  %4756 = vpow2.f32 %v1956_v59  ;;  %v2047_v34 = vmul.f32 %v4745_v2, %v5885_v36 }
 0x305   : > { %v1986_v54 = vadd.f32 1.0, %v4747_v19 }
 0x306   : > { %v4749_v8 = vpop.eup %4748  ;;  %v2066_v21 = vpack.c.bf16 %v2047_v34, %v2046_v53  ;;  %v5944_v25 = vpop.permute.xlu0 %2589 }
 0x307   : > { %4758 = vrcp.f32 %v1986_v54  ;;  %v1987_v16 = vadd.f32 1.0, %v4749_v8 }
 0x308   : > { %4381 = vmatprep.mubr.bf16.mxu0 %v2066_v21 }
 0x309   : > { %v4751_v52 = vpop.eup %4750  ;;  %4760 = vrcp.f32 %v1987_v16 }
 0x30a   : > { %v2048_v38 = vmul.f32 %v4751_v52, %v5891_v10  ;;  %v5950_v49 = vpop.permute.xlu0 %2600 }
 0x30b   : > { %v4753_v22 = vpop.eup %4752 }
 0x30c   : > { %v4755_v35 = vpop.eup %4754  ;;  %v2049_v0 = vmul.f32 %v4753_v22, %v5897_v46 }
 0x30d   : > { %v1988_v27 = vadd.f32 1.0, %v4755_v35 }
 0x30e   : > { %v4757_v40 = vpop.eup %4756  ;;  %v2067_v43 = vpack.c.bf16 %v2049_v0, %v2048_v38  ;;  %v5954_v3 = vpop.permute.xlu0 %2523 }
 0x30f   : > { %4762 = vrcp.f32 %v1988_v27  ;;  %v1989_v18 = vadd.f32 1.0, %v4757_v40 }
 0x310   : > { %4382 = vmatmul.mubr.bf16.gmra.mrb[28].mxu0 %v2067_v43 }
 0x311   : > { %v4759_v36 = vpop.eup %4758  ;;  %4764 = vrcp.f32 %v1989_v18 }
 0x312   : > { %v2050_v56 = vmul.f32 %v4759_v36, %v5903_v4  ;;  %v5929_v4 = vpop.permute.xlu1 %2505  ;;  %v5958_v34 = vpop.permute.xlu0 %2611 }
 0x313   : > { %v4761_v33 = vpop.eup %4760 }
 0x314   : > { %v2051_v17 = vmul.f32 %v4761_v33, %v5910_v28 }
 0x316   : > { %v2068_v58 = vpack.c.bf16 %v2051_v17, %v2050_v56  ;;  %v5931_v28 = vpop.permute.xlu1 %2512  ;;  %v5962_v16 = vpop.permute.xlu0 %2534 }
 0x318   : > { %4385 = vmatprep.mubr.bf16.mxu0 %v2068_v58 }
 0x319   : > { %v4763_v12 = vpop.eup %4762 }
 0x31a   : > { %v2052_v10 = vmul.f32 %v4763_v12, %v1860_v29  ;;  %v5935_v31 = vpop.permute.xlu1 %2516  ;;  %v5982_v63 = vpop.permute.xlu0 %2622 }
 0x31b   : > { %v4765_v60 = vpop.eup %4764 }
 0x31c   : > { %v2053_v47 = vmul.f32 %v4765_v60, %v1861_v41 }
 0x31e   : > { %v2069_v46 = vpack.c.bf16 %v2053_v47, %v2052_v10  ;;  %v5947_v42 = vpop.permute.xlu1 %2593 }
 0x320   : > { %4386 = vmatmul.mubr.bf16.gmra.mrb[32].mxu0 %v2069_v46 }
 0x321   : > { %4405 = vmatprep.mubr.msk.bf16.mxu0 %vm4947_vm0, %v4946_v30 }
 0x322   : > { %v5952_v41 = vpop.permute.xlu1 %2604 }
 0x326   : > { %v5956_v44 = vpop.permute.xlu1 %2527 }
 0x32a   : > { %v5960_v8 = vpop.permute.xlu1 %2615 }
 0x32e   : > { %v5967_v35 = vpop.permute.xlu1 %2538 }
 0x36c   : > { %v4359_v6 = vpop.f32.mrb[4].mxu0 }
 0x36d   : > { %v2184_v32 = vadd.f32 %v4359_v6, %v5940_v26  ;;  %v2175_v7 = vpop.f32.mrb[5].mxu0 }
 0x36e   : > { %v2176_v24 = vadd.f32 %v5940_v26, %v2175_v7  ;;  %v4360_v13 = vpop.f32.mrb[6].mxu0 }
 0x36f   : > { %v2304_v5 = vsub.f32 0.0, %v2184_v32  ;;  %v2187_v1 = vadd.f32 %v4360_v13, %v5940_v26  ;;  %v2178_v15 = vpop.f32.mrb[7].mxu0 }
 0x370   : > { %v2302_v11 = vsub.f32 0.0, %v2176_v24  ;;  %v2179_v39 = vadd.f32 %v5940_v26, %v2178_v15 }
 0x371   : > { %v2338_v45 = vmul.f32 1.442695, %v2304_v5  ;;  %v2305_v29 = vsub.f32 0.0, %v2187_v1  ;;  %v5984_v5 = vpop.permute.xlu1 %2626 }
 0x372   : > { %v2334_v20 = vmul.f32 1.442695, %v2302_v11  ;;  %v2303_v48 = vsub.f32 0.0, %v2179_v39 }
 0x373   : > { %4766 = vpow2.f32 %v2338_v45  ;;  %v2340_v9 = vmul.f32 1.442695, %v2305_v29 }
 0x374   : > { %4768 = vpow2.f32 %v2334_v20  ;;  %v2336_v57 = vmul.f32 1.442695, %v2303_v48 }
 0x375   : > { %4770 = vpow2.f32 %v2340_v9 }
 0x376   : > { %4772 = vpow2.f32 %v2336_v57 }
 0x37d   : > { %v4767_v61 = vpop.eup %4766 }
 0x37e   : > { %v4769_v23 = vpop.eup %4768  ;;  %v2400_v51 = vadd.f32 1.0, %v4767_v61 }
 0x37f   : > { %v4771_v59 = vpop.eup %4770  ;;  %v2398_v2 = vadd.f32 1.0, %v4769_v23 }
 0x380   : > { %v4773_v19 = vpop.eup %4772  ;;  %4774 = vrcp.f32 %v2400_v51  ;;  %v2401_v53 = vadd.f32 1.0, %v4771_v59 }
 0x381   : > { %4776 = vrcp.f32 %v2398_v2  ;;  %v2399_v54 = vadd.f32 1.0, %v4773_v19 }
 0x382   : > { %4778 = vrcp.f32 %v2401_v53  ;;  %v6007_v53 = vpop.permute.xlu1 %2549 }
 0x383   : > { %4780 = vrcp.f32 %v2399_v54 }
 0x386   : > { %v4363_v21 = vpop.f32.mrb[8].mxu0 }
 0x387   : > { %v5965_v52 = vadd.f32 %v4363_v21, %v5940_v26  ;;  %v2191_v22 = vpop.f32.mrb[9].mxu0 }
 0x388   : > { %v5970_v38 = vadd.f32 %v5940_v26, %v2191_v22  ;;  %v4364_v0 = vpop.f32.mrb[10].mxu0 }
 0x389   : > { %v2308_v27 = vsub.f32 0.0, %v5965_v52  ;;  %v5974_v40 = vadd.f32 %v4364_v0, %v5940_v26  ;;  %v2194_v43 = vpop.f32.mrb[11].mxu0 }
 0x38a   : > { %v4775_v18 = vpop.eup %4774  ;;  %v2306_v36 = vsub.f32 0.0, %v5970_v38  ;;  %v5978_v33 = vadd.f32 %v5940_v26, %v2194_v43 }
 0x38b   : > { %v4777_v56 = vpop.eup %4776  ;;  %v2464_v17 = vmul.f32 %v4775_v18, %v2184_v32  ;;  %v2346_v58 = vmul.f32 1.442695, %v2308_v27  ;;  %v2309_v12 = vsub.f32 0.0, %v5974_v40 }
 0x38c   : > { %v4779_v60 = vpop.eup %4778  ;;  %v2462_v10 = vmul.f32 %v4777_v56, %v2176_v24  ;;  %v2342_v47 = vmul.f32 1.442695, %v2306_v36  ;;  %v2307_v46 = vsub.f32 0.0, %v5978_v33 }
 0x38d   : > { %v4781_v6 = vpop.eup %4780  ;;  %v2465_v7 = vmul.f32 %v4779_v60, %v2187_v1  ;;  %4782 = vpow2.f32 %v2346_v58  ;;  %v2348_v13 = vmul.f32 1.442695, %v2309_v12  ;;  %v2674_v45 = vmul.f32 %v5931_v28, %v2464_v17 }
 0x38e   : > { %v2463_v15 = vmul.f32 %v4781_v6, %v2179_v39  ;;  %4784 = vpow2.f32 %v2342_v47  ;;  %v2344_v11 = vmul.f32 1.442695, %v2307_v46  ;;  %v4367_v32 = vpop.f32.mrb[12].mxu0  ;;  %v2672_v1 = vmul.f32 %v5933_v55, %v2462_v10 }
 0x38f   : > { %v2675_v29 = vmul.f32 %v5935_v31, %v2465_v7  ;;  %4786 = vpow2.f32 %v2348_v13  ;;  %v5989_v24 = vadd.f32 %v4367_v32, %v5940_v26  ;;  %v2207_v20 = vpop.f32.mrb[13].mxu0 }
 0x390   : > { %v2673_v48 = vmul.f32 %v5929_v4, %v2463_v15  ;;  %4788 = vpow2.f32 %v2344_v11  ;;  %v5994_v9 = vadd.f32 %v5940_v26, %v2207_v20  ;;  %v4368_v39 = vpop.f32.mrb[14].mxu0  ;;  %v6004_v4 = vpop.permute.xlu0 %2545 }
 0x391   : > { %v2711_v57 = vadd.f32 %v2675_v29, %v2674_v45  ;;  %v2312_v61 = vsub.f32 0.0, %v5989_v24  ;;  %v5998_v28 = vadd.f32 %v4368_v39, %v5940_v26  ;;  %v2210_v31 = vpop.f32.mrb[15].mxu0  ;;  %v6022_v20 = vpop.permute.xlu1 %2637 }
 0x392   : > { %v2704_v23 = vadd.f32 %v2673_v48, %v2672_v1  ;;  %v2310_v51 = vsub.f32 0.0, %v5994_v9  ;;  %v6002_v59 = vadd.f32 %v5940_v26, %v2210_v31 }
 0x393   : > { %v2712_v55 = vrot.slane %v2711_v57, 4  ;;  %v2354_v2 = vmul.f32 1.442695, %v2312_v61  ;;  %v2313_v19 = vsub.f32 0.0, %v5998_v28 }
 0x394   : > { %v2705_v54 = vrot.slane %v2704_v23, 4  ;;  %v2350_v21 = vmul.f32 1.442695, %v2310_v51  ;;  %v2311_v22 = vsub.f32 0.0, %v6002_v59  ;;  %v6016_v7 = vpop.permute.xlu0 %2633  ;;  %v4482_v51 = vld [vmem:[%s6485_s11] sm:$0xff]  }
 0x395   : > { %v2713_v0 = vadd.f32 %v2712_v55, %v2711_v57  ;;  %4790 = vpow2.f32 %v2354_v2  ;;  %v2356_v27 = vmul.f32 1.442695, %v2313_v19  ;;  %4390 = vmatpush3.bf16.msra.mxu0 %v4482_v51 }
 0x396   : > { %v2706_v43 = vadd.f32 %v2705_v54, %v2704_v23  ;;  %4792 = vpow2.f32 %v2350_v21  ;;  %v2352_v18 = vmul.f32 1.442695, %v2311_v22  ;;  %v4371_v36 = vpop.f32.mrb[16].mxu0  ;;  %4391 = vmatprep.subr.bf16.mxu0 %v4946_v30 }
 0x397   : > { %v4783_v56 = vpop.eup %4782  ;;  %v2714_v17 = vrot.slane %v2713_v0, 2  ;;  %4794 = vpow2.f32 %v2356_v27  ;;  %v6011_v58 = vadd.f32 %v4371_v36, %v5940_v26  ;;  %v2223_v12 = vpop.f32.mrb[17].mxu0 }
 0x398   : > { %v4785_v60 = vpop.eup %4784  ;;  %v2707_v10 = vrot.slane %v2706_v43, 2  ;;  %v2404_v47 = vadd.f32 1.0, %v4783_v56  ;;  %4796 = vpow2.f32 %v2352_v18  ;;  %v6014_v46 = vadd.f32 %v5940_v26, %v2223_v12  ;;  %v4372_v6 = vpop.f32.mrb[18].mxu0 }
 0x399   : > { %v4787_v13 = vpop.eup %4786  ;;  %v2715_v15 = vadd.f32 %v2714_v17, %v2713_v0  ;;  %v2402_v11 = vadd.f32 1.0, %v4785_v60  ;;  %v2316_v32 = vsub.f32 0.0, %v6011_v58  ;;  %v6020_v45 = vadd.f32 %v4372_v6, %v5940_v26  ;;  %v2226_v29 = vpop.f32.mrb[19].mxu0 }
 0x39a   : > { %v4789_v48 = vpop.eup %4788  ;;  %v2708_v1 = vadd.f32 %v2707_v10, %v2706_v43  ;;  %4798 = vrcp.f32 %v2404_v47  ;;  %v2405_v39 = vadd.f32 1.0, %v4787_v13  ;;  %v2314_v57 = vsub.f32 0.0, %v6014_v46  ;;  %v6032_v43 = vpop.permute.xlu0 %2556 }
 0x39b   : > { %v2716_v61 = vrot.slane %v2715_v15, 1  ;;  %4800 = vrcp.f32 %v2402_v11  ;;  %v2403_v31 = vadd.f32 1.0, %v4789_v48  ;;  %v2362_v23 = vmul.f32 1.442695, %v2316_v32  ;;  %v6039_v60 = vpop.permute.xlu1 %2560 }
 0x39c   : > { %v2709_v55 = vrot.slane %v2708_v1, 1  ;;  %4802 = vrcp.f32 %v2405_v39  ;;  %v2358_v2 = vmul.f32 1.442695, %v2314_v57  ;;  %v2317_v19 = vsub.f32 0.0, %v6020_v45 }
 0x39d   : > { %v2717_v54 = vadd.f32 %v2716_v61, %v2715_v15  ;;  %4804 = vrcp.f32 %v2403_v31  ;;  %v6030_v21 = vadd.f32 %v5940_v26, %v2226_v29 }
 0x39e   : > { %v2710_v22 = vadd.f32 %v2709_v55, %v2708_v1  ;;  %4806 = vpow2.f32 %v2362_v23  ;;  %v2364_v0 = vmul.f32 1.442695, %v2317_v19  ;;  %v4375_v27 = vpop.f32.mrb[20].mxu0 }
 0x39f   : > { %v4791_v18 = vpop.eup %4790  ;;  %v2824_v36 = vpack.c.bf16 %v2717_v54, %v2717_v54  ;;  %4808 = vpow2.f32 %v2358_v2  ;;  %v2315_v56 = vsub.f32 0.0, %v6030_v21  ;;  %v6037_v17 = vadd.f32 %v4375_v27, %v5940_v26  ;;  %v2239_v12 = vpop.f32.mrb[21].mxu0 }
 0x3a0   : > { %v4793_v10 = vpop.eup %4792  ;;  %v2823_v47 = vpack.c.bf16 %v2710_v22, %v2710_v22  ;;  %v2408_v6 = vadd.f32 1.0, %v4791_v18  ;;  %4810 = vpow2.f32 %v2364_v0  ;;  %v6042_v13 = vadd.f32 %v5940_v26, %v2239_v12  ;;  %v4376_v15 = vpop.f32.mrb[22].mxu0 }
 0x3a1   : > { %v4795_v11 = vpop.eup %4794  ;;  %v2881_v32 = vunpack.c.l.b16 %v2824_v36  ;;  %v2406_v29 = vadd.f32 1.0, %v4793_v10  ;;  %v2360_v48 = vmul.f32 1.442695, %v2315_v56  ;;  %v2320_v1 = vsub.f32 0.0, %v6037_v17  ;;  %v2242_v39 = vpop.f32.mrb[23].mxu0 }
 0x3a2   : > { %v4797_v57 = vpop.eup %4796  ;;  %v2880_v61 = vunpack.c.l.b16 %v2823_v47  ;;  %4812 = vrcp.f32 %v2408_v6  ;;  %v2409_v31 = vadd.f32 1.0, %v4795_v11  ;;  %v2318_v23 = vsub.f32 0.0, %v6042_v13  ;;  %v6057_v56 = vpop.permute.xlu0 %2644 }
 0x3a3   : > { %4814 = vrcp.f32 %v2406_v29  ;;  %v2407_v51 = vadd.f32 1.0, %v4797_v57  ;;  %v2370_v55 = vmul.f32 1.442695, %v2320_v1  ;;  %v6047_v2 = vadd.f32 %v4376_v15, %v5940_v26  ;;  %v6059_v12 = vpop.permute.xlu1 %2648 }
 0x3a4   : > { %v4799_v19 = vpop.eup %4798  ;;  %v6050_v54 = vsel %vm2896_vm1, %v2881_v32, %v2880_v61  ;;  %4816 = vrcp.f32 %v2409_v31  ;;  %v2366_v22 = vmul.f32 1.442695, %v2318_v23  ;;  %v6053_v0 = vadd.f32 %v5940_v26, %v2242_v39 }
 0x3a5   : > { %v4801_v27 = vpop.eup %4800  ;;  %4818 = vrcp.f32 %v2407_v51  ;;  %v2468_v18 = vmul.f32 %v4799_v19, %v5965_v52  ;;  %v2321_v36 = vsub.f32 0.0, %v6047_v2 }
 0x3a6   : > { %v4803_v10 = vpop.eup %4802  ;;  %v2466_v47 = vmul.f32 %v4801_v27, %v5970_v38  ;;  %4820 = vpow2.f32 %v2360_v48  ;;  %v2319_v6 = vsub.f32 0.0, %v6053_v0  ;;  %v6072_v19 = vpop.permute.xlu0 %2567 }
 0x3a7   : > { %v4805_v15 = vpop.eup %4804  ;;  %v2469_v11 = vmul.f32 %v4803_v10, %v5974_v40  ;;  %4822 = vpow2.f32 %v2370_v55  ;;  %v2372_v32 = vmul.f32 1.442695, %v2321_v36  ;;  %v2678_v61 = vmul.f32 %v5962_v16, %v2468_v18  ;;  %v6074_v16 = vpop.permute.xlu1 %2571 }
 0x3a8   : > { %v4807_v29 = vpop.eup %4806  ;;  %v2467_v52 = vmul.f32 %v4805_v15, %v5978_v33  ;;  %4824 = vpow2.f32 %v2366_v22  ;;  %v2368_v1 = vmul.f32 1.442695, %v2319_v6  ;;  %v2676_v48 = vmul.f32 %v5954_v3, %v2466_v47  ;;  %v4483_v33 = vld [vmem:[%s6485_s11 + $0x8] sm:$0xff]   ;;  %v4484_v3 = vld [vmem:[%s6485_s11 + $0x10] sm:$0xff]  }
 0x3a9   : > { %v4809_v39 = vpop.eup %4808  ;;  %v2412_v57 = vadd.f32 1.0, %v4807_v29  ;;  %v2679_v31 = vmul.f32 %v5967_v35, %v2469_v11  ;;  %4826 = vpow2.f32 %v2372_v32  ;;  %4392 = vmatpush3.bf16.msra.mxu0 %v4483_v33  ;;  %v4915_v33 = vld [vmem:[%s5759_s21 + $0x8] sm:$0xff] }
 0x3aa   : > { %v4811_v38 = vpop.eup %4810  ;;  %v2677_v23 = vmul.f32 %v5956_v44, %v2467_v52  ;;  %v2410_v40 = vadd.f32 1.0, %v4809_v39  ;;  %4828 = vpow2.f32 %v2368_v1  ;;  %4393 = vmatprep.subr.bf16.mxu0 %v4946_v30  ;;  %v4485_v39 = vld [vmem:[%s6485_s11 + $0x18] sm:$0xff]  }
 0x3ab   : > { %4830 = vrcp.f32 %v2412_v57  ;;  %v2725_v51 = vadd.f32 %v2679_v31, %v2678_v61  ;;  %v2413_v55 = vadd.f32 1.0, %v4811_v38  ;;  %v6090_v31 = vpop.permute.xlu0 %2655 }
 0x3ac   : > { %v4813_v35 = vpop.eup %4812  ;;  %v2718_v22 = vadd.f32 %v2677_v23, %v2676_v48 }
 0x3ad   : > { %v4815_v44 = vpop.eup %4814  ;;  %v2726_v27 = vrot.slane %v2725_v51, 4  ;;  %4832 = vrcp.f32 %v2413_v55  ;;  %v2472_v18 = vmul.f32 %v4813_v35, %v5989_v24  ;;  %4394 = vmatpush3.bf16.msra.mxu0 %v4484_v3 }
 0x3ae   : > { %v4817_v36 = vpop.eup %4816  ;;  %v2719_v10 = vrot.slane %v2718_v22, 4  ;;  %4834 = vrcp.f32 %v2410_v40  ;;  %v2470_v47 = vmul.f32 %v4815_v44, %v5994_v9  ;;  %4395 = vmatprep.subr.bf16.mxu0 %v4946_v30 }
 0x3af   : > { %v4819_v6 = vpop.eup %4818  ;;  %v2727_v15 = vadd.f32 %v2726_v27, %v2725_v51  ;;  %v2682_v11 = vmul.f32 %v6032_v43, %v2472_v18  ;;  %v2473_v32 = vmul.f32 %v4817_v36, %v5998_v28  ;;  %v6092_v28 = vpop.permute.xlu1 %2659  ;;  %v2820_v51 = vsel %vm2816_vm2, %v4915_v33, 0.0 }
 0x3b0   : > { %v4821_v29 = vpop.eup %4820  ;;  %v2720_v52 = vadd.f32 %v2719_v10, %v2718_v22  ;;  %v2680_v1 = vmul.f32 %v6004_v4, %v2470_v47  ;;  %v2471_v24 = vmul.f32 %v4819_v6, %v6002_v59  ;;  %v4914_v4 = vld [vmem:[%s5759_s21] sm:$0xff]  ;;  %2821 = vadd.xlane.f32.xlu1 %v2820_v51  ;;  %s652_s21 = scalar_lea.vmem %s6479_s5, %s5142_s28 }
 0x3b1   : > { %v4823_v9 = vpop.eup %4822  ;;  %v2728_v57 = vrot.slane %v2727_v15, 2  ;;  %v2411_v61 = vadd.f32 1.0, %v4821_v29  ;;  %v2683_v43 = vmul.f32 %v6039_v60, %v2473_v32  ;;  %v2817_v59 = vsel %vm2816_vm2, %v4914_v4, 0.0  ;;  %4396 = vmatpush3.bf16.msra.mxu0 %v4485_v39  ;;  %v4487_v4 = vld [vmem:[%s6485_s11 + $0x28] sm:$0xff]  }
 0x3b2   : > { %v4825_v38 = vpop.eup %4824  ;;  %v2721_v48 = vrot.slane %v2720_v52, 2  ;;  %v2416_v23 = vadd.f32 1.0, %v4823_v9  ;;  %v2681_v40 = vmul.f32 %v6007_v53, %v2471_v24  ;;  %2818 = vadd.xlane.f32.xlu0 %v2817_v59  ;;  %v4486_v53 = vld [vmem:[%s6485_s11 + $0x20] sm:$0xff]   ;;  %4397 = vmatprep.subr.bf16.mxu0 %v4946_v30  ;;  %v2579_v24 = vpop.permute.xlu0 %2578 }
 0x3b3   : > { %v4827_v55 = vpop.eup %4826  ;;  %v2729_v60 = vadd.f32 %v2728_v57, %v2727_v15  ;;  %4836 = vrcp.f32 %v2411_v61  ;;  %v2414_v35 = vadd.f32 1.0, %v4825_v38  ;;  %v2739_v22 = vadd.f32 %v2683_v43, %v2682_v11  ;;  %v2583_v39 = vpop.permute.xlu1 %2582 }
 0x3b4   : > { %v4829_v3 = vpop.eup %4828  ;;  %v2722_v44 = vadd.f32 %v2721_v48, %v2720_v52  ;;  %4838 = vrcp.f32 %v2416_v23  ;;  %v2732_v27 = vadd.f32 %v2681_v40, %v2680_v1  ;;  %v2417_v18 = vadd.f32 1.0, %v4827_v55 }
 0x3b5   : > { %v4831_v36 = vpop.eup %4830  ;;  %v2730_v10 = vrot.slane %v2729_v60, 1  ;;  %4840 = vrcp.f32 %v2414_v35  ;;  %v2415_v47 = vadd.f32 1.0, %v4829_v3  ;;  %v2740_v6 = vrot.slane %v2739_v22, 4  ;;  %4398 = vmatpush3.bf16.msra.mxu0 %v4486_v53  ;;  %v4488_v35 = vld [vmem:[%s6485_s11 + $0x30] sm:$0xff]  }
 0x3b6   : > { %v2723_v15 = vrot.slane %v2722_v44, 1  ;;  %v2733_v11 = vrot.slane %v2732_v27, 4  ;;  %4842 = vrcp.f32 %v2417_v18  ;;  %v2476_v32 = vmul.f32 %v4831_v36, %v6011_v58  ;;  %4399 = vmatprep.subr.bf16.mxu0 %v4946_v30 }
 0x3b7   : > { %v4833_v29 = vpop.eup %4832  ;;  %v2731_v52 = vadd.f32 %v2730_v10, %v2729_v60  ;;  %4844 = vrcp.f32 %v2415_v47  ;;  %v2741_v1 = vadd.f32 %v2740_v6, %v2739_v22 }
 0x3b8   : > { %v4835_v9 = vpop.eup %4834  ;;  %v2724_v57 = vadd.f32 %v2723_v15, %v2722_v44  ;;  %v2734_v61 = vadd.f32 %v2733_v11, %v2732_v27  ;;  %v2477_v43 = vmul.f32 %v4833_v29, %v6020_v45  ;;  %v2686_v23 = vmul.f32 %v2579_v24, %v2476_v32 }
 0x3b9   : > { %v2826_v59 = vpack.c.bf16 %v2731_v52, %v2731_v52  ;;  %v2742_v38 = vrot.slane %v2741_v1, 2  ;;  %v2474_v51 = vmul.f32 %v4835_v9, %v6014_v46  ;;  %4400 = vmatpush3.bf16.msra.mxu0 %v4487_v4 }
 0x3ba   : > { %v2825_v58 = vpack.c.bf16 %v2724_v57, %v2724_v57  ;;  %v2735_v48 = vrot.slane %v2734_v61, 2  ;;  %v2687_v40 = vmul.f32 %v2583_v39, %v2477_v43  ;;  %4401 = vmatprep.subr.bf16.mxu0 %v4946_v30 }
 0x3bb   : > { %v2743_v33 = vadd.f32 %v2742_v38, %v2741_v1  ;;  %v2883_v3 = vunpack.c.l.b16 %v2826_v59  ;;  %v2684_v11 = vmul.f32 %v6072_v19, %v2474_v51 }
 0x3bc   : > { %v2882_v55 = vunpack.c.l.b16 %v2825_v58  ;;  %v2736_v45 = vadd.f32 %v2735_v48, %v2734_v61  ;;  %v2753_v60 = vadd.f32 %v2687_v40, %v2686_v23 }
 0x3bd   : > { %v4837_v22 = vpop.eup %4836  ;;  %v2744_v44 = vrot.slane %v2743_v33, 1  ;;  %4402 = vmatpush3.bf16.msra.mxu0 %v4488_v35 }
 0x3be   : > { %v4839_v27 = vpop.eup %4838  ;;  %v2899_v18 = vsel %vm2898_vm3, %v2882_v55, %v6050_v54  ;;  %v2737_v53 = vrot.slane %v2736_v45, 1  ;;  %v2475_v46 = vmul.f32 %v4837_v22, %v6030_v21  ;;  %v2754_v36 = vrot.slane %v2753_v60, 4  ;;  %v4489_v21 = vld [vmem:[%s6485_s11 + $0x38] sm:$0xff]   ;;  %4403 = vmatprep.subr.bf16.mxu0 %v4946_v30 }
 0x3bf   : > { %v4841_v10 = vpop.eup %4840  ;;  %v2901_v47 = vsel %vm2900_vm4, %v2883_v3, %v2899_v18  ;;  %v2480_v6 = vmul.f32 %v4839_v27, %v6037_v17  ;;  %v2745_v15 = vadd.f32 %v2744_v44, %v2743_v33 }
 0x3c0   : > { %v4843_v32 = vpop.eup %4842  ;;  %v2478_v29 = vmul.f32 %v4841_v10, %v6042_v13  ;;  %v2738_v52 = vadd.f32 %v2737_v53, %v2736_v45  ;;  %v2685_v1 = vmul.f32 %v6074_v16, %v2475_v46  ;;  %v2755_v24 = vadd.f32 %v2754_v36, %v2753_v60 }
 0x3c1   : > { %v4845_v54 = vpop.eup %4844  ;;  %v2481_v39 = vmul.f32 %v4843_v32, %v6047_v2  ;;  %v2828_v9 = vpack.c.bf16 %v2745_v15, %v2745_v15  ;;  %v2690_v57 = vmul.f32 %v5950_v49, %v2480_v6  ;;  %4404 = vmatpush3.bf16.msra.mxu0 %v4489_v21 }
 0x3c2   : > { %v2827_v17 = vpack.c.bf16 %v2738_v52, %v2738_v52  ;;  %v2479_v19 = vmul.f32 %v4845_v54, %v6053_v0  ;;  %v2746_v13 = vadd.f32 %v2685_v1, %v2684_v11  ;;  %v2756_v61 = vrot.slane %v2755_v24, 2 }
 0x3c3   : > { %v2691_v16 = vmul.f32 %v5952_v41, %v2481_v39  ;;  %v2688_v43 = vmul.f32 %v5944_v25, %v2478_v29  ;;  %v2885_v30 = vunpack.c.l.b16 %v2828_v9 }
 0x3c4   : > { %v2884_v4 = vunpack.c.l.b16 %v2827_v17  ;;  %v2689_v59 = vmul.f32 %v5947_v42, %v2479_v19  ;;  %v2747_v2 = vrot.slane %v2746_v13, 4  ;;  %v2757_v58 = vadd.f32 %v2756_v61, %v2755_v24 }
 0x3c5   : > { %v2767_v38 = vadd.f32 %v2691_v16, %v2690_v57 }
 0x3c6   : > { %v2903_v48 = vsel %vm2902_vm5, %v2884_v4, %v2901_v47  ;;  %v2760_v0 = vadd.f32 %v2689_v59, %v2688_v43  ;;  %v2748_v23 = vadd.f32 %v2747_v2, %v2746_v13  ;;  %v2758_v41 = vrot.slane %v2757_v58, 1 }
 0x3c7   : > { %v2768_v40 = vrot.slane %v2767_v38, 4  ;;  %v2905_v49 = vsel %vm2904_vm6, %v2885_v30, %v2903_v48 }
 0x3c8   : > { %v2761_v33 = vrot.slane %v2760_v0, 4  ;;  %v2749_v51 = vrot.slane %v2748_v23, 2  ;;  %v2759_v42 = vadd.f32 %v2758_v41, %v2757_v58 }
 0x3c9   : > { %v2769_v55 = vadd.f32 %v2768_v40, %v2767_v38 }
 0x3ca   : > { %v2762_v25 = vadd.f32 %v2761_v33, %v2760_v0  ;;  %v2750_v45 = vadd.f32 %v2749_v51, %v2748_v23  ;;  %v2830_v53 = vpack.c.bf16 %v2759_v42, %v2759_v42 }
 0x3cb   : > { %v2770_v60 = vrot.slane %v2769_v55, 2 }
 0x3cc   : > { %v2763_v35 = vrot.slane %v2762_v25, 2  ;;  %v2751_v22 = vrot.slane %v2750_v45, 1  ;;  %v2887_v32 = vunpack.c.l.b16 %v2830_v53 }
 0x3cd   : > { %v2771_v3 = vadd.f32 %v2770_v60, %v2769_v55 }
 0x3ce   : > { %v2764_v44 = vadd.f32 %v2763_v35, %v2762_v25  ;;  %v2752_v27 = vadd.f32 %v2751_v22, %v2750_v45 }
 0x3cf   : > { %v2772_v18 = vrot.slane %v2771_v3, 1 }
 0x3d0   : > { %v2765_v46 = vrot.slane %v2764_v44, 1  ;;  %v2829_v36 = vpack.c.bf16 %v2752_v27, %v2752_v27 }
 0x3d1   : > { %v2773_v10 = vadd.f32 %v2772_v18, %v2771_v3 }
 0x3d2   : > { %v2766_v47 = vadd.f32 %v2765_v46, %v2764_v44  ;;  %v2886_v6 = vunpack.c.l.b16 %v2829_v36 }
 0x3d3   : > { %v4379_v15 = vpop.f32.mrb[24].mxu0  ;;  %v2832_v11 = vpack.c.bf16 %v2773_v10, %v2773_v10 }
 0x3d4   : > { %v2264_v29 = vadd.f32 %v4379_v15, %v5940_v26  ;;  %v2255_v52 = vpop.f32.mrb[25].mxu0  ;;  %v2831_v1 = vpack.c.bf16 %v2766_v47, %v2766_v47  ;;  %v2907_v24 = vsel %vm2906_vm7, %v2886_v6, %v2905_v49 }
 0x3d5   : > { %v2256_v21 = vadd.f32 %v5940_v26, %v2255_v52  ;;  %v4380_v54 = vpop.f32.mrb[26].mxu0  ;;  %v2889_v39 = vunpack.c.l.b16 %v2832_v11  ;;  %v6140_v13 = vsel %vm2908_vm8, %v2887_v32, %v2907_v24 }
 0x3d6   : > { %v2324_v9 = vsub.f32 0.0, %v2264_v29  ;;  %v2267_v17 = vadd.f32 %v4380_v54, %v5940_v26  ;;  %v2258_v19 = vpop.f32.mrb[27].mxu0  ;;  %v2888_v57 = vunpack.c.l.b16 %v2831_v1 }
 0x3d7   : > { %v2322_v16 = vsub.f32 0.0, %v2256_v21  ;;  %v2259_v61 = vadd.f32 %v5940_v26, %v2258_v19 }
 0x3d8   : > { %v2378_v43 = vmul.f32 1.442695, %v2324_v9  ;;  %v2325_v4 = vsub.f32 0.0, %v2267_v17  ;;  %v6144_v59 = vsel %vm2896_vm1, %v2889_v39, %v2888_v57 }
 0x3d9   : > { %v2374_v2 = vmul.f32 1.442695, %v2322_v16  ;;  %v2323_v38 = vsub.f32 0.0, %v2259_v61 }
 0x3da   : > { %4846 = vpow2.f32 %v2378_v43  ;;  %v2380_v30 = vmul.f32 1.442695, %v2325_v4 }
 0x3db   : > { %4848 = vpow2.f32 %v2374_v2  ;;  %v2376_v58 = vmul.f32 1.442695, %v2323_v38 }
 0x3dc   : > { %4850 = vpow2.f32 %v2380_v30 }
 0x3dd   : > { %4852 = vpow2.f32 %v2376_v58 }
 0x3e3   : > { %v4383_v48 = vpop.f32.mrb[28].mxu0 }
 0x3e4   : > { %v4847_v0 = vpop.eup %4846  ;;  %v6147_v23 = vadd.f32 %v4383_v48, %v5940_v26  ;;  %v2271_v40 = vpop.f32.mrb[29].mxu0 }
 0x3e5   : > { %v4849_v49 = vpop.eup %4848  ;;  %v2420_v41 = vadd.f32 1.0, %v4847_v0  ;;  %v6150_v33 = vadd.f32 %v5940_v26, %v2271_v40  ;;  %v4384_v51 = vpop.f32.mrb[30].mxu0 }
 0x3e6   : > { %v4851_v55 = vpop.eup %4850  ;;  %v2418_v25 = vadd.f32 1.0, %v4849_v49  ;;  %v2328_v45 = vsub.f32 0.0, %v6147_v23  ;;  %v6154_v60 = vadd.f32 %v4384_v51, %v5940_v26  ;;  %v2274_v42 = vpop.f32.mrb[31].mxu0 }
 0x3e7   : > { %v4853_v35 = vpop.eup %4852  ;;  %4854 = vrcp.f32 %v2420_v41  ;;  %v2421_v22 = vadd.f32 1.0, %v4851_v55  ;;  %v2326_v3 = vsub.f32 0.0, %v6150_v33  ;;  %v6158_v44 = vadd.f32 %v5940_v26, %v2274_v42 }
 0x3e8   : > { %4856 = vrcp.f32 %v2418_v25  ;;  %v2419_v27 = vadd.f32 1.0, %v4853_v35  ;;  %v2386_v18 = vmul.f32 1.442695, %v2328_v45  ;;  %v2329_v53 = vsub.f32 0.0, %v6154_v60 }
 0x3e9   : > { %4858 = vrcp.f32 %v2421_v22  ;;  %v2382_v46 = vmul.f32 1.442695, %v2326_v3  ;;  %v2327_v36 = vsub.f32 0.0, %v6158_v44 }
 0x3ea   : > { %4860 = vrcp.f32 %v2419_v27  ;;  %v2388_v10 = vmul.f32 1.442695, %v2329_v53 }
 0x3eb   : > { %4862 = vpow2.f32 %v2386_v18  ;;  %v2384_v47 = vmul.f32 1.442695, %v2327_v36 }
 0x3ec   : > { %4864 = vpow2.f32 %v2382_v46 }
 0x3ed   : > { %4866 = vpow2.f32 %v2388_v10 }
 0x3ee   : > { %4868 = vpow2.f32 %v2384_v47 }
 0x3f1   : > { %v4855_v6 = vpop.eup %4854 }
 0x3f2   : > { %v4857_v15 = vpop.eup %4856  ;;  %v2484_v11 = vmul.f32 %v4855_v6, %v2264_v29 }
 0x3f3   : > { %v4859_v32 = vpop.eup %4858  ;;  %v2482_v52 = vmul.f32 %v4857_v15, %v2256_v21  ;;  %v4387_v1 = vpop.f32.mrb[32].mxu0 }
 0x3f4   : > { %v4861_v24 = vpop.eup %4860  ;;  %v2485_v54 = vmul.f32 %v4859_v32, %v2267_v17  ;;  %v6163_v39 = vadd.f32 %v4387_v1, %v5940_v26  ;;  %v2287_v9 = vpop.f32.mrb[33].mxu0  ;;  %v2694_v57 = vmul.f32 %v5982_v63, %v2484_v11 }
 0x3f5   : > { %v4863_v19 = vpop.eup %4862  ;;  %v2692_v16 = vmul.f32 %v5958_v34, %v2482_v52  ;;  %v2483_v43 = vmul.f32 %v4861_v24, %v2259_v61  ;;  %v6168_v4 = vadd.f32 %v5940_v26, %v2287_v9  ;;  %v4388_v2 = vpop.f32.mrb[34].mxu0 }
 0x3f6   : > { %v4865_v29 = vpop.eup %4864  ;;  %v2695_v21 = vmul.f32 %v5984_v5, %v2485_v54  ;;  %v2424_v38 = vadd.f32 1.0, %v4863_v19  ;;  %v2332_v17 = vsub.f32 0.0, %v6163_v39  ;;  %v6173_v30 = vadd.f32 %v4388_v2, %v5940_v26  ;;  %v2290_v58 = vpop.f32.mrb[35].mxu0 }
 0x3f7   : > { %v4867_v48 = vpop.eup %4866  ;;  %v2693_v63 = vmul.f32 %v5960_v8, %v2483_v43  ;;  %v2422_v0 = vadd.f32 1.0, %v4865_v29  ;;  %v2330_v34 = vsub.f32 0.0, %v6168_v4  ;;  %v6178_v61 = vadd.f32 %v5940_v26, %v2290_v58 }
 0x3f8   : > { %v4869_v40 = vpop.eup %4868  ;;  %v2781_v49 = vadd.f32 %v2695_v21, %v2694_v57  ;;  %4870 = vrcp.f32 %v2424_v38  ;;  %v2425_v5 = vadd.f32 1.0, %v4867_v48  ;;  %v2394_v41 = vmul.f32 1.442695, %v2332_v17 }
 0x3f9   : > { %v2774_v51 = vadd.f32 %v2693_v63, %v2692_v16  ;;  %4872 = vrcp.f32 %v2422_v0  ;;  %v2423_v55 = vadd.f32 1.0, %v4869_v40  ;;  %v2390_v25 = vmul.f32 1.442695, %v2330_v34 }
 0x3fa   : > { %v2782_v45 = vrot.slane %v2781_v49, 4  ;;  %4874 = vrcp.f32 %v2425_v5  ;;  %v2333_v42 = vsub.f32 0.0, %v6173_v30  ;;  %v2331_v8 = vsub.f32 0.0, %v6178_v61 }
 0x3fb   : > { %v2775_v35 = vrot.slane %v2774_v51, 4  ;;  %4876 = vrcp.f32 %v2423_v55 }
 0x3fc   : > { %v2783_v22 = vadd.f32 %v2782_v45, %v2781_v49  ;;  %4878 = vpow2.f32 %v2394_v41  ;;  %v2396_v26 = vmul.f32 1.442695, %v2333_v42  ;;  %v2392_v3 = vmul.f32 1.442695, %v2331_v8 }
 0x3fd   : > { %v2776_v27 = vadd.f32 %v2775_v35, %v2774_v51  ;;  %4880 = vpow2.f32 %v2390_v25 }
 0x3fe   : > { %v2784_v18 = vrot.slane %v2783_v22, 2  ;;  %4882 = vpow2.f32 %v2396_v26 }
 0x3ff   : > { %v2777_v53 = vrot.slane %v2776_v27, 2  ;;  %4884 = vpow2.f32 %v2392_v3 }
 0x400   : > { %v2785_v46 = vadd.f32 %v2784_v18, %v2783_v22  ;;  %v2671_v18 = vpop.permute.xlu1 %2670 }
 0x401   : > { %v2778_v36 = vadd.f32 %v2777_v53, %v2776_v27  ;;  %v2667_v27 = vpop.permute.xlu0 %2666 }
 0x402   : > { %v4871_v10 = vpop.eup %4870  ;;  %v2786_v47 = vrot.slane %v2785_v46, 1 }
 0x403   : > { %v4873_v6 = vpop.eup %4872  ;;  %v2779_v15 = vrot.slane %v2778_v36, 1  ;;  %v2488_v11 = vmul.f32 %v4871_v10, %v6147_v23 }
 0x404   : > { %v4875_v32 = vpop.eup %4874  ;;  %v2787_v52 = vadd.f32 %v2786_v47, %v2785_v46  ;;  %v2486_v1 = vmul.f32 %v4873_v6, %v6150_v33 }
 0x405   : > { %v4877_v24 = vpop.eup %4876  ;;  %v2780_v54 = vadd.f32 %v2779_v15, %v2778_v36  ;;  %v2489_v9 = vmul.f32 %v4875_v32, %v6154_v60  ;;  %v2698_v29 = vmul.f32 %v6057_v56, %v2488_v11 }
 0x406   : > { %v4879_v19 = vpop.eup %4878  ;;  %v2834_v57 = vpack.c.bf16 %v2787_v52, %v2787_v52  ;;  %v2487_v16 = vmul.f32 %v4877_v24, %v6158_v44  ;;  %v2696_v17 = vmul.f32 %v6016_v7, %v2486_v1 }
 0x407   : > { %v4881_v43 = vpop.eup %4880  ;;  %v2833_v2 = vpack.c.bf16 %v2780_v54, %v2780_v54  ;;  %v2699_v21 = vmul.f32 %v6059_v12, %v2489_v9  ;;  %v2428_v38 = vadd.f32 1.0, %v4879_v19 }
 0x408   : > { %v4883_v23 = vpop.eup %4882  ;;  %v2697_v33 = vmul.f32 %v6022_v20, %v2487_v16  ;;  %v2426_v58 = vadd.f32 1.0, %v4881_v43  ;;  %v2891_v34 = vunpack.c.l.b16 %v2834_v57 }
 0x409   : > { %v4885_v48 = vpop.eup %4884  ;;  %v2890_v63 = vunpack.c.l.b16 %v2833_v2  ;;  %v2795_v60 = vadd.f32 %v2699_v21, %v2698_v29  ;;  %4886 = vrcp.f32 %v2428_v38  ;;  %v2429_v0 = vadd.f32 1.0, %v4883_v23 }
 0x40a   : > { %v2788_v44 = vadd.f32 %v2697_v33, %v2696_v17  ;;  %4888 = vrcp.f32 %v2426_v58  ;;  %v2427_v40 = vadd.f32 1.0, %v4885_v48 }
 0x40b   : > { %v2911_v56 = vsel %vm2898_vm3, %v2890_v63, %v6144_v59  ;;  %v2796_v12 = vrot.slane %v2795_v60, 4  ;;  %4890 = vrcp.f32 %v2429_v0  ;;  %v3966_v0 = vld [vmem:[%s6486_s12] ss:$0 sm:$0xff] }
 0x40c   : > { %v2789_v49 = vrot.slane %v2788_v44, 4  ;;  %v2912_v7 = vsel %vm2900_vm4, %v2891_v34, %v2911_v56  ;;  %4892 = vrcp.f32 %v2427_v40 }
 0x40d   : > { %v2797_v20 = vadd.f32 %v2796_v12, %v2795_v60 }
 0x40e   : > { %v2790_v5 = vadd.f32 %v2789_v49, %v2788_v44  ;;  %v3008_v49 = vstv %s3915_s19 }
 0x40f   : > { %v2798_v41 = vrot.slane %v2797_v20, 2 }
 0x410   : > { %v2791_v51 = vrot.slane %v2790_v5, 2 }
 0x411   : > { %v2799_v55 = vadd.f32 %v2798_v41, %v2797_v20 }
 0x412   : > { %v2792_v25 = vadd.f32 %v2791_v51, %v2790_v5 }
 0x413   : > { %v4887_v45 = vpop.eup %4886  ;;  %v2800_v42 = vrot.slane %v2799_v55, 1 }
 0x414   : > { %v4889_v8 = vpop.eup %4888  ;;  %v2793_v35 = vrot.slane %v2792_v25, 1  ;;  %v2492_v22 = vmul.f32 %v4887_v45, %v6163_v39 }
 0x415   : > { %v4891_v26 = vpop.eup %4890  ;;  %v2801_v59 = vadd.f32 %v2800_v42, %v2799_v55  ;;  %v2490_v3 = vmul.f32 %v4889_v8, %v6168_v4  ;;  %v4917_v42 = vld [vmem:[%s5154_s18 + $0x8] sm:$0xff] }
 0x416   : > { %v4893_v53 = vpop.eup %4892  ;;  %v2794_v46 = vadd.f32 %v2793_v35, %v2792_v25  ;;  %v2493_v36 = vmul.f32 %v4891_v26, %v6173_v30  ;;  %v2702_v15 = vmul.f32 %v2667_v27, %v2492_v22  ;;  %v4916_v25 = vld [vmem:[%s5154_s18] sm:$0xff]  ;;  %v4490_v35 = vld [vmem:[%s6487_s13 + $0x8] ss:$16 sps:$4 sm:$0xff]   ;;  %v4492_v22 = vld [vmem:[%s6487_s13 + $0xc] ss:$16 sps:$4 sm:$0xff]  }
 0x417   : > { %v2836_v10 = vpack.c.bf16 %v2801_v59, %v2801_v59  ;;  %v2491_v47 = vmul.f32 %v4893_v53, %v6178_v61  ;;  %v2700_v32 = vmul.f32 %v6090_v31, %v2490_v3  ;;  %v4495_v26 = vld [vmem:[%s6487_s13 + $0x2c] ss:$16 sps:$4 sm:$0xff]   ;;  %3293 = vmatprep.subr.bf16.mxu1 %v4492_v22  ;;  %v4493_v59 = vld [vmem:[%s6487_s13 + $0x28] ss:$16 sps:$4 sm:$0xff]   ;;  %v4508_v27 = vld [vmem:[%s6487_s13] ss:$16 sps:$4 sm:$0xff]  }
 0x418   : > { %v2835_v6 = vpack.c.bf16 %v2794_v46, %v2794_v46  ;;  %v2703_v11 = vmul.f32 %v2671_v18, %v2493_v36  ;;  %3294 = vmatpush1.bf16.msra.mxu1 %v4490_v35  ;;  %v4498_v3 = vld [vmem:[%s6487_s13 + $0x4c] ss:$16 sps:$4 sm:$0xff]   ;;  %v4510_v18 = vld [vmem:[%s6487_s13 + $0x4] ss:$16 sps:$4 sm:$0xff]   ;;  %v4496_v46 = vld [vmem:[%s6487_s13 + $0x48] ss:$16 sps:$4 sm:$0xff]  }
 0x419   : > { %v2701_v39 = vmul.f32 %v6092_v28, %v2491_v47  ;;  %v2893_v24 = vunpack.c.l.b16 %v2836_v10  ;;  %3295 = vmatprep.subr.bf16.mxu1 %v4495_v26  ;;  %v4516_v53 = vld [vmem:[%s6487_s13 + $0x24] ss:$16 sps:$4 sm:$0xff]   ;;  %3250 = vmatprep.subr.bf16.mxu0 %v4510_v18  ;;  %v4514_v36 = vld [vmem:[%s6487_s13 + $0x20] ss:$16 sps:$4 sm:$0xff]   ;;  %v4501_v10 = vld [vmem:[%s6487_s13 + $0x6c] ss:$16 sps:$4 sm:$0xff]  }
 0x41a   : > { %v2892_v52 = vunpack.c.l.b16 %v2835_v6  ;;  %v2809_v1 = vadd.f32 %v2703_v11, %v2702_v15  ;;  %v4519_v47 = vld [vmem:[%s6487_s13 + $0x44] ss:$16 sps:$4 sm:$0xff]   ;;  %v4499_v6 = vld [vmem:[%s6487_s13 + $0x68] ss:$16 sps:$4 sm:$0xff]   ;;  %v4517_v15 = vld [vmem:[%s6487_s13 + $0x40] ss:$16 sps:$4 sm:$0xff]  }
 0x41b   : > { %v2802_v4 = vadd.f32 %v2701_v39, %v2700_v32  ;;  %v4504_v11 = vld [vmem:[%s6487_s13 + $0x8c] ss:$16 sps:$4 sm:$0xff]   ;;  %v4502_v32 = vld [vmem:[%s6487_s13 + $0x88] ss:$16 sps:$4 sm:$0xff]   ;;  %v4546_v26 = vld [vmem:[%s6489_s15 + $0x50] sm:$0xff]  }
 0x41c   : > { %v2913_v54 = vsel %vm2902_vm5, %v2892_v52, %v2912_v7  ;;  %v2810_v9 = vrot.slane %v2809_v1, 4  ;;  %3296 = vmatpush1.bf16.msra.mxu1 %v4493_v59  ;;  %v4507_v39 = vld [vmem:[%s6487_s13 + $0xac] ss:$16 sps:$4 sm:$0xff]   ;;  %v4505_v52 = vld [vmem:[%s6487_s13 + $0xa8] ss:$16 sps:$4 sm:$0xff]   ;;  %v4547_v59 = vld [vmem:[%s6489_s15 + $0xd0] sm:$0xff]  }
 0x41d   : > { %v2803_v19 = vrot.slane %v2802_v4, 4  ;;  %v2914_v30 = vsel %vm2904_vm6, %v2893_v24, %v2913_v54  ;;  %3297 = vmatprep.subr.bf16.mxu1 %v4498_v3  ;;  %v4511_v24 = vld [vmem:[%s6487_s13 + $0xc8] ss:$16 sps:$4 sm:$0xff]   ;;  %v4548_v3 = vld [vmem:[%s6489_s15 + $0x10] sm:$0xff]  }
 0x41e   : > { %v2811_v57 = vadd.f32 %v2810_v9, %v2809_v1  ;;  %v4513_v1 = vld [vmem:[%s6487_s13 + $0xcc] ss:$16 sps:$4 sm:$0xff]  }
 0x41f   : > { %v2804_v16 = vadd.f32 %v2803_v19, %v2802_v4  ;;  %v4544_v35 = vld [vmem:[%s6489_s15 + $0x8] sm:$0xff]   ;;  %v4550_v18 = vld [vmem:[%s6489_s15 + $0x58] sm:$0xff]  }
 0x420   : > { %v2812_v61 = vrot.slane %v2811_v57, 2  ;;  %3298 = vmatpush1.bf16.msra.mxu1 %v4496_v46  ;;  %v4545_v22 = vld [vmem:[%s6489_s15 + $0x88] sm:$0xff]   ;;  %v4552_v46 = vld [vmem:[%s6489_s15 + $0x18] sm:$0xff]  }
 0x421   : > { %v2805_v43 = vrot.slane %v2804_v16, 2  ;;  %3299 = vmatprep.subr.bf16.mxu1 %v4501_v10  ;;  %v4554_v10 = vld [vmem:[%s6489_s15 + $0x60] sm:$0xff]  }
 0x422   : > { %v2813_v2 = vadd.f32 %v2812_v61, %v2811_v57 }
 0x423   : > { %v2806_v29 = vadd.f32 %v2805_v43, %v2804_v16  ;;  %v4520_v43 = vld [vmem:[%s6487_s13 + $0x60] ss:$16 sps:$4 sm:$0xff]  }
 0x424   : > { %v2814_v21 = vrot.slane %v2813_v2, 1  ;;  %3300 = vmatpush1.bf16.msra.mxu1 %v4499_v6  ;;  %v4556_v6 = vld [vmem:[%s6489_s15 + $0x20] sm:$0xff]  }
 0x425   : > { %v2807_v31 = vrot.slane %v2806_v29, 1  ;;  %3301 = vmatprep.subr.bf16.mxu1 %v4504_v11  ;;  %v4558_v11 = vld [vmem:[%s6489_s15 + $0x68] sm:$0xff]  }
 0x426   : > { %v2815_v38 = vadd.f32 %v2814_v21, %v2813_v2  ;;  %v4522_v2 = vld [vmem:[%s6487_s13 + $0x64] ss:$16 sps:$4 sm:$0xff]  }
 0x427   : > { %v2808_v28 = vadd.f32 %v2807_v31, %v2806_v29  ;;  %v4523_v29 = vld [vmem:[%s6487_s13 + $0x80] ss:$16 sps:$4 sm:$0xff]   ;;  %v4525_v21 = vld [vmem:[%s6487_s13 + $0x84] ss:$16 sps:$4 sm:$0xff]   ;;  %v4526_v31 = vld [vmem:[%s6487_s13 + $0xe8] ss:$16 sps:$4 sm:$0xff]  }
 0x428   : > { %v2838_v23 = vpack.c.bf16 %v2815_v38, %v2815_v38  ;;  %3302 = vmatpush1.bf16.msra.mxu1 %v4502_v32  ;;  %v4528_v38 = vld [vmem:[%s6487_s13 + $0xec] ss:$16 sps:$4 sm:$0xff]  }
 0x429   : > { %v2837_v17 = vpack.c.bf16 %v2808_v28, %v2808_v28  ;;  %3303 = vmatprep.subr.bf16.mxu1 %v4507_v39  ;;  %v4531_v28 = vld [vmem:[%s6487_s13 + $0xa4] ss:$16 sps:$4 sm:$0xff]   ;;  %v4559_v32 = vld [vmem:[%s6489_s15 + $0xe8] sm:$0xff]  }
 0x42a   : > { %v2895_v58 = vunpack.c.l.b16 %v2838_v23  ;;  %v4529_v23 = vld [vmem:[%s6487_s13 + $0xa0] ss:$16 sps:$4 sm:$0xff]   ;;  %v4560_v39 = vld [vmem:[%s6489_s15 + $0x28] sm:$0xff]  }
 0x42b   : > { %v2894_v33 = vunpack.c.l.b16 %v2837_v17  ;;  %v4534_v17 = vld [vmem:[%s6487_s13 + $0xc4] ss:$16 sps:$4 sm:$0xff]  }
 0x42c   : > { %3304 = vmatpush1.bf16.msra.mxu1 %v4505_v52  ;;  %v4561_v52 = vld [vmem:[%s6489_s15 + $0xa8] sm:$0xff]  }
 0x42d   : > { %v2915_v48 = vsel %vm2906_vm7, %v2894_v33, %v2914_v30  ;;  %3305 = vmatprep.subr.bf16.mxu1 %v4513_v1  ;;  %v4949_v33 = vmov 0   ;;  %v4562_v1 = vld [vmem:[%s6489_s15 + $0x70] sm:$0xff]  }
 0x42e   : > { %v2916_v63 = vsel %vm2908_vm8, %v2895_v58, %v2915_v48  ;;  %3325 = vmatprep.mubr.bf16.mxu1 %v4949_v33  ;;  %4432 = vset.pattern.permute.xlu0 %v4949_v33  ;;  %v4532_v58 = vld [vmem:[%s6487_s13 + $0xc0] ss:$16 sps:$4 sm:$0xff]   ;;  %v4537_v48 = vld [vmem:[%s6487_s13 + $0xe4] ss:$16 sps:$4 sm:$0xff]  }
 0x42f   : > { %v2917_v60 = vpack.c.b16 %v2916_v63, %v6140_v13  ;;  %4433 = vset.pattern.permute.xlu1 %v4949_v33  ;;  %v4535_v63 = vld [vmem:[%s6487_s13 + $0xe0] ss:$16 sps:$4 sm:$0xff]  }
 0x430   : > { %3306 = vmatpush1.bf16.msra.mxu1 %v4511_v24  ;;  %v4563_v24 = vld [vmem:[%s6489_s15 + $0xf0] sm:$0xff]  }
 0x431   : > { %4406 = vmatmul.mubr.bf16.vlgmr.msra.gmra.mrb[36].mxu0 %v2917_v60  ;;  %3307 = vmatprep.subr.bf16.mxu1 %v4528_v38 }
 0x432   : > { %3251 = vmatpush1.bf16.msra.mxu0 %v4508_v27  ;;  %3282 = vmatprep.mubr.bf16.mxu0 %v4949_v33  ;;  %v4549_v27 = vld [vmem:[%s6489_s15 + $0x90] sm:$0xff]  }
 0x433   : > { %3252 = vmatprep.subr.bf16.mxu0 %v4516_v53  ;;  %v4551_v53 = vld [vmem:[%s6489_s15 + $0xd8] sm:$0xff]  }
 0x434   : > { %3308 = vmatpush1.bf16.msra.mxu1 %v4526_v31 }
 0x436   : > { %3253 = vmatpush1.bf16.msra.mxu0 %v4514_v36  ;;  %v4553_v36 = vld [vmem:[%s6489_s15 + $0x98] sm:$0xff]  }
 0x437   : > { %3254 = vmatprep.subr.bf16.mxu0 %v4519_v47  ;;  %v4555_v47 = vld [vmem:[%s6489_s15 + $0xe0] sm:$0xff]  }
 0x43a   : > { %3255 = vmatpush1.bf16.msra.mxu0 %v4517_v15  ;;  %v4557_v15 = vld [vmem:[%s6489_s15 + $0xa0] sm:$0xff]  }
 0x43b   : > { %3256 = vmatprep.subr.bf16.mxu0 %v4522_v2 }
 0x43d   : > { %v2822_v44 = vpop.xlane.xlu1 %2821 }
 0x43e   : > { %v2863_v56 = vmul.f32 %v3966_v0, %v2822_v44  ;;  %3257 = vmatpush1.bf16.msra.mxu0 %v4520_v43  ;;  %v3068_v43 = vld [vmem:[%s6488_s14] sm:$0xf] }
 0x43f   : > { %v2819_v34 = vpop.xlane.xlu0 %2818  ;;  %3258 = vmatprep.subr.bf16.mxu0 %v4525_v21  ;;  %v3073_v2 = vrot.slane %v3068_v43, %v5613_v37  ;;  %v3077_v21 = vrot.slane %v3068_v43, %v5778_v50  ;;  %v3085_v31 = vrot.slane %v3068_v43, %v5813_v14 }
 0x440   : > { %v2862_v40 = vmul.f32 %v3966_v0, %v2819_v34 }
 0x442   : > { %3259 = vmatpush1.bf16.msra.mxu0 %v4523_v29  ;;  %v3081_v29 = vrot.slane %v3068_v43, %v5790_v62 }
 0x443   : > { %3260 = vmatprep.subr.bf16.mxu0 %v4531_v28 }
 0x446   : > { %3261 = vmatpush1.bf16.msra.mxu0 %v4529_v23 }
 0x447   : > { %3262 = vmatprep.subr.bf16.mxu0 %v4534_v17 }
 0x44a   : > { %3263 = vmatpush1.bf16.msra.mxu0 %v4532_v58 }
 0x44b   : > { %3264 = vmatprep.subr.bf16.mxu0 %v4537_v48 }
 0x44e   : > { %3265 = vmatpush1.bf16.msra.mxu0 %v4535_v63 }
 0x504   : > { %v3001_v12 = vpop.f32.mrb[36].mxu0 }
 0x505   : > { %v3002_v7 = vadd.f32 %v3001_v12, %v2862_v40  ;;  %v4407_v20 = vpop.f32.mrb[37].mxu0 }
 0x506   : > { %v3004_v5 = vpop.f32.mrb[38].mxu0 }
 0x507   : > { %v3009_v41 = vmul.f32 %v3008_v49, %v3002_v7  ;;  %v3005_v51 = vadd.f32 %v3004_v5, %v2863_v56  ;;  %v4408_v13 = vpop.f32.mrb[39].mxu0 }
 0x508   : > { %v4540_v13 = vld [vmem:[%s6489_s15] sm:$0xff]  }
 0x509   : > { %v3010_v55 = vmul.f32 %v3008_v49, %v3005_v51  ;;  %v6208_v45 = vadd.f32 %v4916_v25, %v3009_v41  ;;  %v4538_v41 = vld [vmem:[%s6489_s15 + $0x40] sm:$0xff]   ;;  %v4542_v25 = vld [vmem:[%s6489_s15 + $0x48] sm:$0xff]  }
 0x50a   : > { %v4539_v51 = vld [vmem:[%s6489_s15 + $0xc0] sm:$0xff]   ;;  %4277 = vmatprep.subr.bf16.mxu0 %v4538_v41 }
 0x50b   : > { %3013 = vadd.xlane.f32.xlu0 %v6208_v45  ;;  %v6212_v8 = vadd.f32 %v4917_v42, %v3010_v55  ;;  %v4541_v55 = vld [vmem:[%s6489_s15 + $0x80] sm:$0xff]   ;;  %v4543_v42 = vld [vmem:[%s6489_s15 + $0xc8] sm:$0xff]   ;;  %4299 = vmatprep.subr.bf16.mxu1 %v4539_v51 }
 0x50f   : > { %3015 = vadd.xlane.f32.xlu0 %v6212_v8 }
 0x598   : > { %v3014_v4 = vpop.xlane.xlu0 %3013 }
 0x599   : > { %v3017_v54 = vmul.f32 0.0078125, %v3014_v4  ;;  %v4564_v4 = vld [vmem:[%s6489_s15 + $0x30] sm:$0xff]  }
 0x59b   : > { %v3019_v9 = vsub.f32 %v6208_v45, %v3017_v54  ;;  %v4565_v54 = vld [vmem:[%s6489_s15 + $0xb0] sm:$0xff]  }
 0x59c   : > { %v3016_v19 = vpop.xlane.xlu0 %3015 }
 0x59d   : > { %v3018_v30 = vmul.f32 0.0078125, %v3016_v19  ;;  %v3021_v57 = vmul.f32 %v3019_v9, %v3019_v9  ;;  %v3763_v19 = vld [vmem:[%s652_s21 + $0x8] sm:$0xff] }
 0x59f   : > { %v3020_v16 = vsub.f32 %v6212_v8, %v3018_v30  ;;  %3023 = vadd.xlane.f32.xlu0 %v3021_v57  ;;  %v4566_v30 = vld [vmem:[%s6489_s15 + $0x78] sm:$0xff]  }
 0x5a0   : > { %v4567_v57 = vld [vmem:[%s6489_s15 + $0xf8] sm:$0xff]  }
 0x5a1   : > { %v3022_v61 = vmul.f32 %v3020_v16, %v3020_v16 }
 0x5a3   : > { %3025 = vadd.xlane.f32.xlu1 %v3022_v61  ;;  %v4569_v61 = vld [vmem:[%s6489_s15 + $0xb8] sm:$0xff]  }
 0x5b4   : > { %3771 = vperm.xlu1 %4433, %v3763_v19  }
 0x62c   : > { %v3024_v60 = vpop.xlane.xlu0 %3023 }
 0x62d   : > { %v3027_v0 = vmul.f32 0.0078125, %v3024_v60 }
 0x62f   : > { %v3029_v34 = vadd.f32 1e-05, %v3027_v0 }
 0x630   : > { %v3026_v44 = vpop.xlane.xlu1 %3025 }
 0x631   : > { %v3028_v40 = vmul.f32 0.0078125, %v3026_v44  ;;  %4894 = vrsqrt.f32 %v3029_v34 }
 0x633   : > { %v3030_v56 = vadd.f32 1e-05, %v3028_v40 }
 0x635   : > { %4896 = vrsqrt.f32 %v3030_v56 }
 0x63b   : > { %v4895_v12 = vpop.eup %4894 }
 0x63c   : > { %v3033_v7 = vmul.f32 %v4895_v12, %v3019_v9  ;;  %v3762_v9 = vld [vmem:[%s652_s21] sm:$0xff]  ;;  %s661_s21 = sld [smem:[#allocation2]] }
 0x63d   : > { %3766 = vperm.xlu0 %4432, %v3762_v9  }
 0x63f   : > { %v4897_v49 = vpop.eup %4896 }
 0x640   : > { %v3034_v20 = vmul.f32 %v4897_v49, %v3020_v16  ;;  %v4568_v16 = vld [vmem:[%s6489_s15 + $0x38] sm:$0xff]  }
 0x642   : > { %v3035_v5 = vpack.c.bf16 %v3034_v20, %v3033_v7 }
 0x644   : > { %3283 = vmatmul.mubr.bf16.vlgmr.msra.gmra.mrb[40].mxu0 %v3035_v5  ;;  %3326 = vmatmul.mubr.bf16.vlgmr.msra.gmra.mrb[64].mxu1 %v3035_v5 }
 0x645   : > { %4278 = vmatpush3.bf16.msra.mxu0 %v4540_v13  ;;  %4300 = vmatpush3.bf16.msra.mxu1 %v4541_v55 }
 0x646   : > { %4279 = vmatprep.subr.bf16.mxu0 %v4542_v25  ;;  %4301 = vmatprep.subr.bf16.mxu1 %v4543_v42 }
 0x649   : > { %4280 = vmatpush3.bf16.msra.mxu0 %v4544_v35  ;;  %4302 = vmatpush3.bf16.msra.mxu1 %v4545_v22 }
 0x64a   : > { %4281 = vmatprep.subr.bf16.mxu0 %v4546_v26  ;;  %4303 = vmatprep.subr.bf16.mxu1 %v4547_v59 }
 0x64d   : > { %4282 = vmatpush3.bf16.msra.mxu0 %v4548_v3  ;;  %4304 = vmatpush3.bf16.msra.mxu1 %v4549_v27 }
 0x64e   : > { %4283 = vmatprep.subr.bf16.mxu0 %v4550_v18  ;;  %4305 = vmatprep.subr.bf16.mxu1 %v4551_v53 }
 0x651   : > { %4284 = vmatpush3.bf16.msra.mxu0 %v4552_v46  ;;  %4306 = vmatpush3.bf16.msra.mxu1 %v4553_v36 }
 0x652   : > { %4285 = vmatprep.subr.bf16.mxu0 %v4554_v10  ;;  %4307 = vmatprep.subr.bf16.mxu1 %v4555_v47 }
 0x655   : > { %4286 = vmatpush3.bf16.msra.mxu0 %v4556_v6  ;;  %4308 = vmatpush3.bf16.msra.mxu1 %v4557_v15 }
 0x656   : > { %4287 = vmatprep.subr.bf16.mxu0 %v4558_v11  ;;  %4309 = vmatprep.subr.bf16.mxu1 %v4559_v32 }
 0x659   : > { %4288 = vmatpush3.bf16.msra.mxu0 %v4560_v39  ;;  %4310 = vmatpush3.bf16.msra.mxu1 %v4561_v52 }
 0x65a   : > { %4289 = vmatprep.subr.bf16.mxu0 %v4562_v1  ;;  %4311 = vmatprep.subr.bf16.mxu1 %v4563_v24 }
 0x65d   : > { %4290 = vmatpush3.bf16.msra.mxu0 %v4564_v4  ;;  %4312 = vmatpush3.bf16.msra.mxu1 %v4565_v54 }
 0x65e   : > { %4291 = vmatprep.subr.bf16.mxu0 %v4566_v30  ;;  %4313 = vmatprep.subr.bf16.mxu1 %v4567_v57 }
 0x661   : > { %4292 = vmatpush3.bf16.msra.mxu0 %v4568_v16  ;;  %4314 = vmatpush3.bf16.msra.mxu1 %v4569_v61 }
 0x717   : > { %v3284_v38 = vpop.f32.mrb[40].mxu0  ;;  %v3327_v28 = vpop.f32.mrb[64].mxu1 }
 0x718   : > { %v6420_v23 = vadd.f32 %v3284_v38, %v3073_v2  ;;  %v6422_v17 = vadd.f32 %v3327_v28, %v3081_v29  ;;  %v3286_v33 = vpop.f32.mrb[41].mxu0  ;;  %v3329_v58 = vpop.f32.mrb[65].mxu1 }
 0x719   : > { %v6424_v48 = vadd.f32 %v3286_v33, %v3077_v21  ;;  %v6426_v63 = vadd.f32 %v3329_v58, %v3085_v31  ;;  %v3288_v60 = vpop.f32.mrb[42].mxu0  ;;  %v3331_v37 = vpop.f32.mrb[66].mxu1 }
 0x71a   : > { %v3344_v62 = vmul.f32 0.044715, %v6420_v23  ;;  %v3346_v50 = vmul.f32 0.044715, %v6422_v17  ;;  %v3289_v0 = vadd.f32 %v3288_v60, %v3073_v2  ;;  %v3332_v14 = vadd.f32 %v3331_v37, %v3081_v29  ;;  %v3290_v34 = vpop.f32.mrb[43].mxu0  ;;  %v3333_v44 = vpop.f32.mrb[67].mxu1 }
 0x71b   : > { %v3345_v40 = vmul.f32 0.044715, %v6424_v48  ;;  %v3347_v56 = vmul.f32 0.044715, %v6426_v63  ;;  %v6432_v12 = vadd.f32 %v3290_v34, %v3077_v21  ;;  %v6434_v49 = vadd.f32 %v3333_v44, %v3085_v31 }
 0x71c   : > { %v3352_v7 = vmul.f32 %v3344_v62, %v6420_v23  ;;  %v3354_v20 = vmul.f32 %v3346_v50, %v6422_v17  ;;  %v3348_v5 = vmul.f32 0.044715, %v3289_v0  ;;  %v3350_v41 = vmul.f32 0.044715, %v3332_v14 }
 0x71d   : > { %v3353_v51 = vmul.f32 %v3345_v40, %v6424_v48  ;;  %v3355_v13 = vmul.f32 %v3347_v56, %v6426_v63  ;;  %v3349_v55 = vmul.f32 0.044715, %v6432_v12  ;;  %v3351_v25 = vmul.f32 0.044715, %v6434_v49 }
 0x71e   : > { %v3360_v42 = vmul.f32 %v3352_v7, %v6420_v23  ;;  %v3362_v35 = vmul.f32 %v3354_v20, %v6422_v17  ;;  %v3356_v22 = vmul.f32 %v3348_v5, %v3289_v0  ;;  %v3358_v26 = vmul.f32 %v3350_v41, %v3332_v14 }
 0x71f   : > { %v3361_v59 = vmul.f32 %v3353_v51, %v6424_v48  ;;  %v3363_v3 = vmul.f32 %v3355_v13, %v6426_v63  ;;  %v3357_v27 = vmul.f32 %v3349_v55, %v6432_v12  ;;  %v3359_v18 = vmul.f32 %v3351_v25, %v6434_v49 }
 0x720   : > { %v3368_v53 = vadd.f32 %v3360_v42, %v6420_v23  ;;  %v3370_v46 = vadd.f32 %v3362_v35, %v6422_v17  ;;  %v3364_v36 = vmul.f32 %v3356_v22, %v3289_v0  ;;  %v3366_v10 = vmul.f32 %v3358_v26, %v3332_v14 }
 0x721   : > { %v3365_v47 = vmul.f32 %v3357_v27, %v6432_v12  ;;  %v3367_v6 = vmul.f32 %v3359_v18, %v6434_v49  ;;  %v3369_v52 = vadd.f32 %v3361_v59, %v6424_v48  ;;  %v3371_v54 = vadd.f32 %v3363_v3, %v6426_v63 }
 0x722   : > { %v3376_v15 = vmul.f32 0.7978846, %v3368_v53  ;;  %v3378_v11 = vmul.f32 0.7978846, %v3370_v46  ;;  %v3372_v32 = vadd.f32 %v3364_v36, %v3289_v0  ;;  %v3374_v39 = vadd.f32 %v3366_v10, %v3332_v14 }
 0x723   : > { %v3373_v1 = vadd.f32 %v3365_v47, %v6432_v12  ;;  %v3377_v9 = vmul.f32 0.7978846, %v3369_v52  ;;  %v3375_v30 = vadd.f32 %v3367_v6, %v6434_v49  ;;  %v3379_v57 = vmul.f32 0.7978846, %v3371_v54 }
 0x724   : > { %4898 = vtanh.f32 %v3376_v15  ;;  %v3380_v24 = vmul.f32 0.7978846, %v3372_v32  ;;  %v3382_v4 = vmul.f32 0.7978846, %v3374_v39  ;;  %v3336_v38 = vmul.f32 0.5, %v6420_v23 }
 0x725   : > { %4900 = vtanh.f32 %v3378_v11  ;;  %v3381_v19 = vmul.f32 0.7978846, %v3373_v1  ;;  %v3383_v16 = vmul.f32 0.7978846, %v3375_v30  ;;  %v3340_v28 = vmul.f32 0.5, %v3289_v0 }
 0x726   : > { %4902 = vtanh.f32 %v3380_v24  ;;  %v3338_v60 = vmul.f32 0.5, %v6422_v17  ;;  %v3342_v37 = vmul.f32 0.5, %v3332_v14  ;;  %v3337_v34 = vmul.f32 0.5, %v6424_v48 }
 0x727   : > { %4904 = vtanh.f32 %v3382_v4  ;;  %v3341_v20 = vmul.f32 0.5, %v6432_v12  ;;  %v3339_v0 = vmul.f32 0.5, %v6426_v63  ;;  %v3343_v13 = vmul.f32 0.5, %v6434_v49  ;;  %v4007_v63 = vld [vmem:[%s6490_s16] ss:$0 sm:$0xff]  ;;  %v3767_v4 = vpop.permute.xlu0 %3766 }
 0x728   : > { %4906 = vtanh.f32 %v3377_v9  ;;  %v3757_v11 = vstv %s661_s21 }
 0x729   : > { %4908 = vtanh.f32 %v3381_v19  ;;  %v3772_v19 = vpop.permute.xlu1 %3771 }
 0x72a   : > { %4910 = vtanh.f32 %v3379_v57 }
 0x72b   : > { %4912 = vtanh.f32 %v3383_v16 }
 0x72e   : > { %v4899_v61 = vpop.eup %4898 }
 0x72f   : > { %v4901_v43 = vpop.eup %4900  ;;  %v3392_v2 = vadd.f32 1.0, %v4899_v61 }
 0x730   : > { %v4903_v29 = vpop.eup %4902  ;;  %v3394_v21 = vadd.f32 1.0, %v4901_v43 }
 0x731   : > { %v4905_v31 = vpop.eup %4904  ;;  %v3396_v33 = vadd.f32 1.0, %v4903_v29  ;;  %v3400_v40 = vmul.f32 %v3392_v2, %v3336_v38 }
 0x732   : > { %v4907_v58 = vpop.eup %4906  ;;  %v3398_v62 = vadd.f32 1.0, %v4905_v31  ;;  %v3402_v41 = vmul.f32 %v3394_v21, %v3338_v60 }
 0x733   : > { %v4909_v50 = vpop.eup %4908  ;;  %v3393_v44 = vadd.f32 1.0, %v4907_v58  ;;  %v3404_v56 = vmul.f32 %v3396_v33, %v3340_v28 }
 0x734   : > { %v4911_v7 = vpop.eup %4910  ;;  %v3397_v5 = vadd.f32 1.0, %v4909_v50  ;;  %v3406_v51 = vmul.f32 %v3398_v62, %v3342_v37 }
 0x735   : > { %v4913_v23 = vpop.eup %4912  ;;  %v3395_v17 = vadd.f32 1.0, %v4911_v7  ;;  %v3408_v14 = vpack.c.bf16 %v3404_v56, %v3400_v40  ;;  %v3401_v55 = vmul.f32 %v3393_v44, %v3337_v34 }
 0x736   : > { %v3405_v25 = vmul.f32 %v3397_v5, %v3341_v20  ;;  %v3399_v42 = vadd.f32 1.0, %v4913_v23  ;;  %v3410_v48 = vpack.c.bf16 %v3406_v51, %v3402_v41 }
 0x737   : > { %v3403_v22 = vmul.f32 %v3395_v17, %v3339_v0 }
 0x738   : > { %v3409_v35 = vpack.c.bf16 %v3405_v25, %v3401_v55  ;;  %v3407_v26 = vmul.f32 %v3399_v42, %v3343_v13 }
 0x73a   : > { %3707 = vmatprep.mubr.bf16.mxu0 %v3409_v35  ;;  %v3411_v59 = vpack.c.bf16 %v3407_v26, %v3403_v22 }
 0x73b   : > { %3708 = vmatmul.mubr.bf16.vlgmr.msra.gmra.mrb[44].mxu0 %v3408_v14 }
 0x73c   : > { %3748 = vmatprep.mubr.bf16.mxu1 %v3411_v59 }
 0x73d   : > { %3749 = vmatmul.mubr.bf16.vlgmr.msra.gmra.mrb[68].mxu1 %v3410_v48 }
 0x80e   : > { %v4293_v12 = vpop.f32.mrb[44].mxu0 }
 0x80f   : > { %v4294_v49 = vpop.f32.mrb[45].mxu0 }
 0x810   : > { %v4315_v3 = vpop.f32.mrb[68].mxu1  ;;  %v4295_v27 = vadd.f32 %v4294_v49, %v4293_v12  ;;  %v4296_v18 = vpop.f32.mrb[46].mxu0 }
 0x811   : > { %v4316_v53 = vpop.f32.mrb[69].mxu1  ;;  %v4297_v46 = vpop.f32.mrb[47].mxu0 }
 0x812   : > { %v3710_v36 = vadd.f32 %v4295_v27, %v4007_v63  ;;  %v4317_v10 = vadd.f32 %v4316_v53, %v4315_v3  ;;  %v4318_v47 = vpop.f32.mrb[70].mxu1  ;;  %v4298_v6 = vadd.f32 %v4297_v46, %v4296_v18 }
 0x813   : > { %v4319_v15 = vpop.f32.mrb[71].mxu1 }
 0x814   : > { %v3751_v32 = vadd.f32 %v4317_v10, %v3710_v36  ;;  %v3713_v39 = vadd.f32 %v4298_v6, %v4007_v63  ;;  %v4320_v52 = vadd.f32 %v4319_v15, %v4318_v47 }
 0x816   : > { %v3754_v1 = vadd.f32 %v4320_v52, %v3713_v39  ;;  %v3758_v24 = vmul.f32 %v3757_v11, %v3751_v32 }
 0x818   : > { %v3760_v54 = vadd.f32 %v3758_v24, %v6208_v45  ;;  %v3759_v9 = vmul.f32 %v3757_v11, %v3754_v1 }
 0x81a   : > { %v3774_v30 = vmul.f32 %v3767_v4, %v3760_v54  ;;  %v3761_v57 = vadd.f32 %v3759_v9, %v6212_v8 }
 0x81c   : > { %3776 = vst [vmem:[%s658_s0] sm:$0xff] %v3774_v30  ;;  %v3775_v16 = vmul.f32 %v3772_v19, %v3761_v57 }
 0x81e   : > { %3777 = vst [vmem:[%s658_s0 + $0x8] sm:$0xff] %v3775_v16 }
 0x81f PF: > { %s28_s24 = sadd.s32 1, %s4943_s24  }
 0x820   : > { %p25_p2 = scmp.ge.s32.totalorder %s28_s24, 4  }
 0x822   :  { %27 = sbr.rel (!%p25_p2) target bundleno = 4 (0x4), region = 135 }
 0x829   :  { %3800 = vsyncpa [#allocation3], 1 }
 0x82a   :  { %3802 = vsyncpa [#allocation3 + $0x1], 1 }

</bundles_post_ra>
